<compile_context>
chip_gen: v7x
topology: tpu7x:2x2x1
jax: 0.10.0
libtpu: 0.0.40
codegen_flags: <defaults>
</compile_context>

<pallas_src>
import math
from functools import partial

import jax
import jax.numpy as jnp
from jax import lax
from jax.experimental import pallas as pl
from jax.experimental.pallas import tpu as pltpu

BN_EPS = 1e-3


def _round_up(v, m):
    return ((v + m - 1) // m) * m


# ---------------------------------------------------------------------------
# Fused tiled matmul + bias + activation (+ residual) Pallas kernel
# ---------------------------------------------------------------------------
def _fused_mm_kernel(*refs, act, has_residual):
    if has_residual:
        x_ref, w_ref, b_ref, r_ref, o_ref, acc_ref = refs
    else:
        x_ref, w_ref, b_ref, o_ref, acc_ref = refs
        r_ref = None

    k = pl.program_id(2)

    @pl.when(k == 0)
    def _init():
        acc_ref[...] = jnp.zeros_like(acc_ref)

    acc_ref[...] += jnp.dot(
        x_ref[...], w_ref[...], preferred_element_type=jnp.float32
    )

    @pl.when(k == pl.num_programs(2) - 1)
    def _finalize():
        y = acc_ref[...] + b_ref[...]          # (1, tn) broadcast, f32 epilogue
        if act == "silu":
            y = y * jax.nn.sigmoid(y)
        if has_residual:
            y = y + r_ref[...].astype(jnp.float32)
        o_ref[...] = y.astype(o_ref.dtype)


def fused_matmul_bias_act(x, w, bias, *, act="silu", residual=None,
                          out_dtype=jnp.bfloat16):
    """out = act(x @ w + bias) [+ residual], tiled over (M, N, K)."""
    M, K = x.shape
    K2, N = w.shape
    assert K == K2

    # Tile sizes: lane-dense (multiples of 128) on N / K, sublane-aligned M.
    tm = min(512, _round_up(M, 16))
    tn = min(256, _round_up(N, 128))
    tk = min(512, _round_up(K, 128))
    Mp, Kp, Np = _round_up(M, tm), _round_up(K, tk), _round_up(N, tn)

    xb = jnp.pad(x.astype(jnp.bfloat16), ((0, Mp - M), (0, Kp - K)))
    wb = jnp.pad(w.astype(jnp.bfloat16), ((0, Kp - K), (0, Np - N)))
    bb = jnp.pad(bias.astype(jnp.float32).reshape(1, N), ((0, 0), (0, Np - N)))

    args = [xb, wb, bb]
    in_specs = [
        pl.BlockSpec((tm, tk), lambda i, j, k: (i, k)),
        pl.BlockSpec((tk, tn), lambda i, j, k: (k, j)),
        pl.BlockSpec((1, tn), lambda i, j, k: (0, j)),
    ]
    has_residual = residual is not None
    if has_residual:
        rb = jnp.pad(residual.astype(jnp.bfloat16), ((0, Mp - M), (0, Np - N)))
        args.append(rb)
        in_specs.append(pl.BlockSpec((tm, tn), lambda i, j, k: (i, j)))

    grid = (Mp // tm, Np // tn, Kp // tk)
    out = pl.pallas_call(
        partial(_fused_mm_kernel, act=act, has_residual=has_residual),
        out_shape=jax.ShapeDtypeStruct((Mp, Np), out_dtype),
        grid_spec=pltpu.PrefetchScalarGridSpec(
            num_scalar_prefetch=0,
            grid=grid,
            in_specs=in_specs,
            out_specs=pl.BlockSpec((tm, tn), lambda i, j, k: (i, j)),
            scratch_shapes=[pltpu.VMEM((tm, tn), jnp.float32)],
        ),
        compiler_params=pltpu.CompilerParams(
            dimension_semantics=("parallel", "parallel", "arbitrary"),
            vmem_limit_bytes=32 * 1024 * 1024,
        ),
    )(*args)
    return out[:M, :N]


# ---------------------------------------------------------------------------
# Conv + (folded) BN + activation via strided gather + fused matmul kernel
# ---------------------------------------------------------------------------
def conv_bn_act(x, w_hwio, bias, *, stride=1, act="silu", residual=None,
                out_dtype=jnp.bfloat16):
    """x: NHWC (bf16), w_hwio: (kh, kw, cin, cout) with BN scale pre-folded."""
    kh, kw, cin, cout = w_hwio.shape
    pad = (kh - 1) // 2
    n, h, wd, c = x.shape
    assert c == cin
    ho = (h + 2 * pad - kh) // stride + 1
    wo = (wd + 2 * pad - kw) // stride + 1

    if kh == 1 and kw == 1 and stride == 1:
        mat = x.reshape(n * h * wd, cin)
    else:
        xp = jnp.pad(x, ((0, 0), (pad, pad), (pad, pad), (0, 0)))
        patches = []
        for i in range(kh):
            for j in range(kw):
                patches.append(
                    lax.slice(
                        xp,
                        (0, i, j, 0),
                        (n, i + (ho - 1) * stride + 1,
                         j + (wo - 1) * stride + 1, cin),
                        (1, stride, stride, 1),
                    )
                )
        mat = jnp.concatenate(patches, axis=-1).reshape(n * ho * wo, kh * kw * cin)

    w2d = w_hwio.reshape(kh * kw * cin, cout)
    res2d = None
    if residual is not None:
        res2d = residual.reshape(n * ho * wo, cout)
    y = fused_matmul_bias_act(mat, w2d, bias, act=act, residual=res2d,
                              out_dtype=out_dtype)
    return y.reshape(n, ho, wo, cout)


# ---------------------------------------------------------------------------
# FusedMBConv block
# ---------------------------------------------------------------------------
def fused_mbconv_block(blk, x):
    """x: NHWC bf16 activations. Matches FusedMBConv.forward in eval mode."""
    shortcut = x if blk["has_shortcut"] else None
    if blk["has_expansion"]:
        r = conv_bn_act(x, blk["expand"]["w"], blk["expand"]["bias"],
                        stride=blk["stride"], act="silu")
        # project conv (1x1, Identity act) with the residual fused in-kernel
        r = conv_bn_act(r, blk["project"]["w"], blk["project"]["bias"],
                        stride=1, act="identity", residual=shortcut)
    else:
        # no expansion: project conv is k x k with SiLU; shortcut fused after act
        r = conv_bn_act(x, blk["project"]["w"], blk["project"]["bias"],
                        stride=blk["stride"], act="silu", residual=shortcut)
    return r


def fused_mbconv_stack_forward(blocks, x_nchw):
    x = jnp.transpose(x_nchw, (0, 2, 3, 1)).astype(jnp.bfloat16)  # NCHW -> NHWC
    for blk in blocks:
        x = fused_mbconv_block(blk, x)
    return jnp.transpose(x.astype(jnp.float32), (0, 3, 1, 2))     # NHWC -> NCHW


# ---------------------------------------------------------------------------
# Parameters (kaiming-normal conv weights, eval-mode BN folded in)
# ---------------------------------------------------------------------------
def _conv_bn_params(key, k, cin, cout):
    fan_out = cout * k * k
    w = jax.random.normal(key, (k, k, cin, cout), jnp.float32) * math.sqrt(2.0 / fan_out)
    bn_scale = 1.0 / math.sqrt(1.0 + BN_EPS)  # fresh running stats, eval mode
    return {"w": w * bn_scale, "bias": jnp.zeros((cout,), jnp.float32)}


def init_fused_mbconv_params(key, cfgs):
    blocks = []
    keys = jax.random.split(key, 2 * len(cfgs))
    ki = 0
    for (cin, cout, ksz, expand_ratio, stride) in cfgs:
        assert stride in (1, 2)
        blk = {
            "stride": stride,
            "has_shortcut": stride == 1 and cin == cout,
            "has_expansion": expand_ratio != 1,
        }
        if expand_ratio != 1:
            exp_c = cin * expand_ratio
            blk["expand"] = _conv_bn_params(keys[ki], ksz, cin, exp_c); ki += 1
            blk["project"] = _conv_bn_params(keys[ki], 1, exp_c, cout); ki += 1
        else:
            blk["project"] = _conv_bn_params(keys[ki], ksz, cin, cout); ki += 1
        blocks.append(blk)
    return blocks


# ---------------------------------------------------------------------------
# Pure-JAX reference (same bf16 quantization points) for validation
# ---------------------------------------------------------------------------
def _q(v):
    return v.astype(jnp.bfloat16).astype(jnp.float32)


def _ref_conv_bn_act(x, w, bias, stride, act):
    wq = w.astype(jnp.bfloat16).astype(jnp.float32)
    pad = (w.shape[0] - 1) // 2
    y = lax.conv_general_dilated(
        x, wq, (stride, stride), ((pad, pad), (pad, pad)),
        dimension_numbers=("NHWC", "HWIO", "NHWC"),
        precision=lax.Precision.HIGHEST)
    y = y + bias.reshape(1, 1, 1, -1)
    if act == "silu":
        y = y * jax.nn.sigmoid(y)
    return y


def reference_forward(blocks, x_nchw):
    x = _q(jnp.transpose(x_nchw, (0, 2, 3, 1)))
    for blk in blocks:
        sc = x if blk["has_shortcut"] else None
        if blk["has_expansion"]:
            r = _q(_ref_conv_bn_act(x, blk["expand"]["w"], blk["expand"]["bias"],
                                    blk["stride"], "silu"))
            r = _ref_conv_bn_act(r, blk["project"]["w"], blk["project"]["bias"],
                                 1, "identity")
        else:
            r = _ref_conv_bn_act(x, blk["project"]["w"], blk["project"]["bias"],
                                 blk["stride"], "silu")
        if sc is not None:
            r = r + sc
        x = _q(r)
    return jnp.transpose(x, (0, 3, 1, 2))


# ---------------------------------------------------------------------------
if __name__ == "__main__":
    # (in_c, out_c, kernel, expand_ratio, stride) -- exercise all FusedMBConv paths:
    #   no-expansion + shortcut, expansion + shortcut, expansion + stride-2 downsample
    cfgs = [
        (8, 8, 3, 1, 1),
        (8, 8, 3, 4, 1),
        (8, 16, 3, 4, 2),
    ]
    blocks = init_fused_mbconv_params(jax.random.PRNGKey(1), cfgs)
    x = jax.random.normal(jax.random.PRNGKey(0), (2, 8, 16, 16), jnp.float32)

    fwd = jax.jit(partial(fused_mbconv_stack_forward, blocks))
    out = jax.block_until_ready(fwd(x))

    assert out.shape == (2, 16, 8, 8), out.shape
    assert bool(jnp.all(jnp.isfinite(out)))

    ref = reference_forward(blocks, x)
    assert bool(jnp.allclose(out, ref, atol=0.1, rtol=0.1)), float(
        jnp.max(jnp.abs(out - ref)))

    print("KERNEL_OK")
</pallas_src>

<mosaic_0001>
module attributes {stable_mosaic.version = 11 : i64} {
  func.func @_fused_mm_kernel(%arg0: i32, %arg1: i32, %arg2: i32, %arg3: memref<512x128xbf16, #tpu.memory_space<vmem>>, %arg4: memref<128x128xbf16, #tpu.memory_space<vmem>>, %arg5: memref<1x128xf32, #tpu.memory_space<vmem>>, %arg6: memref<512x128xbf16, #tpu.memory_space<vmem>>, %arg7: memref<512x128xbf16, #tpu.memory_space<vmem>>, %arg8: memref<512x128xf32, #tpu.memory_space<vmem>>) attributes {dimension_semantics = [#tpu.dimension_semantics<parallel>, #tpu.dimension_semantics<parallel>, #tpu.dimension_semantics<arbitrary>], iteration_bounds = array<i64: 1, 1, 1>, scalar_prefetch = 0 : i64, scratch_operands = 1 : i64, tpu.core_type = #tpu.core_type<tc>, window_params = [{transform_indices = @transform_0, window_bounds = array<i64: 512, 128>}, {transform_indices = @transform_1, window_bounds = array<i64: 128, 128>}, {transform_indices = @transform_2, window_bounds = array<i64: 1, 128>}, {transform_indices = @transform_3, window_bounds = array<i64: 512, 128>}, {transform_indices = @transform_4, window_bounds = array<i64: 512, 128>}]} {
    %c0_i32 = arith.constant 0 : i32
    %0 = arith.cmpi eq, %arg2, %c0_i32 : i32
    %1 = arith.extui %0 : i1 to i32
    %c0_i32_0 = arith.constant 0 : i32
    %2 = arith.cmpi ne, %1, %c0_i32_0 : i32
    scf.if %2 {
      %cst_10 = arith.constant 0.000000e+00 : f32
      %12 = vector.broadcast %cst_10 : f32 to vector<512x128xf32>
      %c0_11 = arith.constant 0 : index
      %c0_12 = arith.constant 0 : index
      %13 = vector.load %arg8[%c0_11, %c0_12] : memref<512x128xf32, #tpu.memory_space<vmem>>, vector<512x128xf32>
      tpu.vector_store %arg8[%c0_11, %c0_12], %12 {strides = array<i32>} : memref<512x128xf32, #tpu.memory_space<vmem>>, vector<512x128xf32>,
    } else {
    }
    %c0 = arith.constant 0 : index
    %c0_1 = arith.constant 0 : index
    %3 = vector.load %arg8[%c0, %c0_1] : memref<512x128xf32, #tpu.memory_space<vmem>>, vector<512x128xf32>
    %c0_2 = arith.constant 0 : index
    %c0_3 = arith.constant 0 : index
    %4 = vector.load %arg3[%c0_2, %c0_3] : memref<512x128xbf16, #tpu.memory_space<vmem>>, vector<512x128xbf16>
    %c0_4 = arith.constant 0 : index
    %c0_5 = arith.constant 0 : index
    %5 = vector.load %arg4[%c0_4, %c0_5] : memref<128x128xbf16, #tpu.memory_space<vmem>>, vector<128x128xbf16>
    %cst = arith.constant dense<0.000000e+00> : vector<512x128xf32>
    %6 = tpu.matmul %4, %5, %cst {dimension_numbers = #tpu.dot_dimension_numbers<[1], [0], [0], [1], [0, 0, 1, 1], [], []>} : vector<512x128xbf16>, vector<128x128xbf16>, vector<512x128xf32> -> vector<512x128xf32>
    %7 = arith.addf %3, %6 : vector<512x128xf32>
    %c0_6 = arith.constant 0 : index
    %c0_7 = arith.constant 0 : index
    %8 = vector.load %arg8[%c0_6, %c0_7] : memref<512x128xf32, #tpu.memory_space<vmem>>, vector<512x128xf32>
    tpu.vector_store %arg8[%c0_6, %c0_7], %7 {strides = array<i32>} : memref<512x128xf32, #tpu.memory_space<vmem>>, vector<512x128xf32>,
    %c0_i32_8 = arith.constant 0 : i32
    %9 = arith.cmpi eq, %arg2, %c0_i32_8 : i32
    %10 = arith.extui %9 : i1 to i32
    %c0_i32_9 = arith.constant 0 : i32
    %11 = arith.cmpi ne, %10, %c0_i32_9 : i32
    scf.if %11 {
      %c0_10 = arith.constant 0 : index
      %c0_11 = arith.constant 0 : index
      %12 = vector.load %arg8[%c0_10, %c0_11] : memref<512x128xf32, #tpu.memory_space<vmem>>, vector<512x128xf32>
      %c0_12 = arith.constant 0 : index
      %c0_13 = arith.constant 0 : index
      %13 = vector.load %arg5[%c0_12, %c0_13] : memref<1x128xf32, #tpu.memory_space<vmem>>, vector<1x128xf32>
      %14 = vector.broadcast %13 : vector<1x128xf32> to vector<512x128xf32>
      %15 = arith.addf %12, %14 : vector<512x128xf32>
      %16 = arith.negf %15 : vector<512x128xf32>
      %17 = math.exp %16 : vector<512x128xf32>
      %cst_14 = arith.constant 1.000000e+00 : f32
      %18 = vector.broadcast %cst_14 : f32 to vector<512x128xf32>
      %19 = arith.addf %18, %17 : vector<512x128xf32>
      %20 = arith.divf %18, %19 : vector<512x128xf32>
      %21 = arith.mulf %15, %20 : vector<512x128xf32>
      %c0_15 = arith.constant 0 : index
      %c0_16 = arith.constant 0 : index
      %22 = vector.load %arg6[%c0_15, %c0_16] : memref<512x128xbf16, #tpu.memory_space<vmem>>, vector<512x128xbf16>
      %23 = arith.extf %22 : vector<512x128xbf16> to vector<512x128xf32>
      %24 = arith.addf %21, %23 : vector<512x128xf32>
      %25 = arith.truncf %24 : vector<512x128xf32> to vector<512x128xbf16>
      %c0_17 = arith.constant 0 : index
      %c0_18 = arith.constant 0 : index
      %26 = vector.load %arg7[%c0_17, %c0_18] : memref<512x128xbf16, #tpu.memory_space<vmem>>, vector<512x128xbf16>
      tpu.vector_store %arg7[%c0_17, %c0_18], %25 {strides = array<i32>} : memref<512x128xbf16, #tpu.memory_space<vmem>>, vector<512x128xbf16>,
    } else {
    }
    return
  }
  func.func @transform_0(%arg0: i32, %arg1: i32, %arg2: i32) -> (i32, i32) {
    %c0_i32 = arith.constant 0 : i32
    return %arg0, %arg2 : i32, i32
  }
  func.func @transform_1(%arg0: i32, %arg1: i32, %arg2: i32) -> (i32, i32) {
    %c0_i32 = arith.constant 0 : i32
    return %arg2, %arg1 : i32, i32
  }
  func.func @transform_2(%arg0: i32, %arg1: i32, %arg2: i32) -> (i32, i32) {
    %c0_i32 = arith.constant 0 : i32
    %c0_i32_0 = arith.constant 0 : i32
    return %c0_i32, %arg1 : i32, i32
  }
  func.func @transform_3(%arg0: i32, %arg1: i32, %arg2: i32) -> (i32, i32) {
    %c0_i32 = arith.constant 0 : i32
    return %arg0, %arg1 : i32, i32
  }
  func.func @transform_4(%arg0: i32, %arg1: i32, %arg2: i32) -> (i32, i32) {
    %c0_i32 = arith.constant 0 : i32
    return %arg0, %arg1 : i32, i32
  }
}

module attributes {stable_mosaic.version = 11 : i64} {
  func.func @_fused_mm_kernel(%arg0: i32, %arg1: i32, %arg2: i32, %arg3: memref<512x128xbf16, #tpu.memory_space<vmem>>, %arg4: memref<128x128xbf16, #tpu.memory_space<vmem>>, %arg5: memref<1x128xf32, #tpu.memory_space<vmem>>, %arg6: memref<512x128xbf16, #tpu.memory_space<vmem>>, %arg7: memref<512x128xf32, #tpu.memory_space<vmem>>) attributes {dimension_semantics = [#tpu.dimension_semantics<parallel>, #tpu.dimension_semantics<parallel>, #tpu.dimension_semantics<arbitrary>], iteration_bounds = array<i64: 1, 1, 1>, scalar_prefetch = 0 : i64, scratch_operands = 1 : i64, tpu.core_type = #tpu.core_type<tc>, window_params = [{transform_indices = @transform_0, window_bounds = array<i64: 512, 128>}, {transform_indices = @transform_1, window_bounds = array<i64: 128, 128>}, {transform_indices = @transform_2, window_bounds = array<i64: 1, 128>}, {transform_indices = @transform_3, window_bounds = array<i64: 512, 128>}]} {
    %c0_i32 = arith.constant 0 : i32
    %0 = arith.cmpi eq, %arg2, %c0_i32 : i32
    %1 = arith.extui %0 : i1 to i32
    %c0_i32_0 = arith.constant 0 : i32
    %2 = arith.cmpi ne, %1, %c0_i32_0 : i32
    scf.if %2 {
      %cst_10 = arith.constant 0.000000e+00 : f32
      %12 = vector.broadcast %cst_10 : f32 to vector<512x128xf32>
      %c0_11 = arith.constant 0 : index
      %c0_12 = arith.constant 0 : index
      %13 = vector.load %arg7[%c0_11, %c0_12] : memref<512x128xf32, #tpu.memory_space<vmem>>, vector<512x128xf32>
      tpu.vector_store %arg7[%c0_11, %c0_12], %12 {strides = array<i32>} : memref<512x128xf32, #tpu.memory_space<vmem>>, vector<512x128xf32>,
    } else {
    }
    %c0 = arith.constant 0 : index
    %c0_1 = arith.constant 0 : index
    %3 = vector.load %arg7[%c0, %c0_1] : memref<512x128xf32, #tpu.memory_space<vmem>>, vector<512x128xf32>
    %c0_2 = arith.constant 0 : index
    %c0_3 = arith.constant 0 : index
    %4 = vector.load %arg3[%c0_2, %c0_3] : memref<512x128xbf16, #tpu.memory_space<vmem>>, vector<512x128xbf16>
    %c0_4 = arith.constant 0 : index
    %c0_5 = arith.constant 0 : index
    %5 = vector.load %arg4[%c0_4, %c0_5] : memref<128x128xbf16, #tpu.memory_space<vmem>>, vector<128x128xbf16>
    %cst = arith.constant dense<0.000000e+00> : vector<512x128xf32>
    %6 = tpu.matmul %4, %5, %cst {dimension_numbers = #tpu.dot_dimension_numbers<[1], [0], [0], [1], [0, 0, 1, 1], [], []>} : vector<512x128xbf16>, vector<128x128xbf16>, vector<512x128xf32> -> vector<512x128xf32>
    %7 = arith.addf %3, %6 : vector<512x128xf32>
    %c0_6 = arith.constant 0 : index
    %c0_7 = arith.constant 0 : index
    %8 = vector.load %arg7[%c0_6, %c0_7] : memref<512x128xf32, #tpu.memory_space<vmem>>, vector<512x128xf32>
    tpu.vector_store %arg7[%c0_6, %c0_7], %7 {strides = array<i32>} : memref<512x128xf32, #tpu.memory_space<vmem>>, vector<512x128xf32>,
    %c0_i32_8 = arith.constant 0 : i32
    %9 = arith.cmpi eq, %arg2, %c0_i32_8 : i32
    %10 = arith.extui %9 : i1 to i32
    %c0_i32_9 = arith.constant 0 : i32
    %11 = arith.cmpi ne, %10, %c0_i32_9 : i32
    scf.if %11 {
      %c0_10 = arith.constant 0 : index
      %c0_11 = arith.constant 0 : index
      %12 = vector.load %arg7[%c0_10, %c0_11] : memref<512x128xf32, #tpu.memory_space<vmem>>, vector<512x128xf32>
      %c0_12 = arith.constant 0 : index
      %c0_13 = arith.constant 0 : index
      %13 = vector.load %arg5[%c0_12, %c0_13] : memref<1x128xf32, #tpu.memory_space<vmem>>, vector<1x128xf32>
      %14 = vector.broadcast %13 : vector<1x128xf32> to vector<512x128xf32>
      %15 = arith.addf %12, %14 : vector<512x128xf32>
      %16 = arith.negf %15 : vector<512x128xf32>
      %17 = math.exp %16 : vector<512x128xf32>
      %cst_14 = arith.constant 1.000000e+00 : f32
      %18 = vector.broadcast %cst_14 : f32 to vector<512x128xf32>
      %19 = arith.addf %18, %17 : vector<512x128xf32>
      %20 = arith.divf %18, %19 : vector<512x128xf32>
      %21 = arith.mulf %15, %20 : vector<512x128xf32>
      %22 = arith.truncf %21 : vector<512x128xf32> to vector<512x128xbf16>
      %c0_15 = arith.constant 0 : index
      %c0_16 = arith.constant 0 : index
      %23 = vector.load %arg6[%c0_15, %c0_16] : memref<512x128xbf16, #tpu.memory_space<vmem>>, vector<512x128xbf16>
      tpu.vector_store %arg6[%c0_15, %c0_16], %22 {strides = array<i32>} : memref<512x128xbf16, #tpu.memory_space<vmem>>, vector<512x128xbf16>,
    } else {
    }
    return
  }
  func.func @transform_0(%arg0: i32, %arg1: i32, %arg2: i32) -> (i32, i32) {
    %c0_i32 = arith.constant 0 : i32
    return %arg0, %arg2 : i32, i32
  }
  func.func @transform_1(%arg0: i32, %arg1: i32, %arg2: i32) -> (i32, i32) {
    %c0_i32 = arith.constant 0 : i32
    return %arg2, %arg1 : i32, i32
  }
  func.func @transform_2(%arg0: i32, %arg1: i32, %arg2: i32) -> (i32, i32) {
    %c0_i32 = arith.constant 0 : i32
    %c0_i32_0 = arith.constant 0 : i32
    return %c0_i32, %arg1 : i32, i32
  }
  func.func @transform_3(%arg0: i32, %arg1: i32, %arg2: i32) -> (i32, i32) {
    %c0_i32 = arith.constant 0 : i32
    return %arg0, %arg1 : i32, i32
  }
}

module attributes {stable_mosaic.version = 11 : i64} {
  func.func @_fused_mm_kernel(%arg0: i32, %arg1: i32, %arg2: i32, %arg3: memref<512x128xbf16, #tpu.memory_space<vmem>>, %arg4: memref<128x128xbf16, #tpu.memory_space<vmem>>, %arg5: memref<1x128xf32, #tpu.memory_space<vmem>>, %arg6: memref<512x128xbf16, #tpu.memory_space<vmem>>, %arg7: memref<512x128xbf16, #tpu.memory_space<vmem>>, %arg8: memref<512x128xf32, #tpu.memory_space<vmem>>) attributes {dimension_semantics = [#tpu.dimension_semantics<parallel>, #tpu.dimension_semantics<parallel>, #tpu.dimension_semantics<arbitrary>], iteration_bounds = array<i64: 1, 1, 1>, scalar_prefetch = 0 : i64, scratch_operands = 1 : i64, tpu.core_type = #tpu.core_type<tc>, window_params = [{transform_indices = @transform_0, window_bounds = array<i64: 512, 128>}, {transform_indices = @transform_1, window_bounds = array<i64: 128, 128>}, {transform_indices = @transform_2, window_bounds = array<i64: 1, 128>}, {transform_indices = @transform_3, window_bounds = array<i64: 512, 128>}, {transform_indices = @transform_4, window_bounds = array<i64: 512, 128>}]} {
    %c0_i32 = arith.constant 0 : i32
    %0 = arith.cmpi eq, %arg2, %c0_i32 : i32
    %1 = arith.extui %0 : i1 to i32
    %c0_i32_0 = arith.constant 0 : i32
    %2 = arith.cmpi ne, %1, %c0_i32_0 : i32
    scf.if %2 {
      %cst_10 = arith.constant 0.000000e+00 : f32
      %12 = vector.broadcast %cst_10 : f32 to vector<512x128xf32>
      %c0_11 = arith.constant 0 : index
      %c0_12 = arith.constant 0 : index
      %13 = vector.load %arg8[%c0_11, %c0_12] : memref<512x128xf32, #tpu.memory_space<vmem>>, vector<512x128xf32>
      tpu.vector_store %arg8[%c0_11, %c0_12], %12 {strides = array<i32>} : memref<512x128xf32, #tpu.memory_space<vmem>>, vector<512x128xf32>,
    } else {
    }
    %c0 = arith.constant 0 : index
    %c0_1 = arith.constant 0 : index
    %3 = vector.load %arg8[%c0, %c0_1] : memref<512x128xf32, #tpu.memory_space<vmem>>, vector<512x128xf32>
    %c0_2 = arith.constant 0 : index
    %c0_3 = arith.constant 0 : index
    %4 = vector.load %arg3[%c0_2, %c0_3] : memref<512x128xbf16, #tpu.memory_space<vmem>>, vector<512x128xbf16>
    %c0_4 = arith.constant 0 : index
    %c0_5 = arith.constant 0 : index
    %5 = vector.load %arg4[%c0_4, %c0_5] : memref<128x128xbf16, #tpu.memory_space<vmem>>, vector<128x128xbf16>
    %cst = arith.constant dense<0.000000e+00> : vector<512x128xf32>
    %6 = tpu.matmul %4, %5, %cst {dimension_numbers = #tpu.dot_dimension_numbers<[1], [0], [0], [1], [0, 0, 1, 1], [], []>} : vector<512x128xbf16>, vector<128x128xbf16>, vector<512x128xf32> -> vector<512x128xf32>
    %7 = arith.addf %3, %6 : vector<512x128xf32>
    %c0_6 = arith.constant 0 : index
    %c0_7 = arith.constant 0 : index
    %8 = vector.load %arg8[%c0_6, %c0_7] : memref<512x128xf32, #tpu.memory_space<vmem>>, vector<512x128xf32>
    tpu.vector_store %arg8[%c0_6, %c0_7], %7 {strides = array<i32>} : memref<512x128xf32, #tpu.memory_space<vmem>>, vector<512x128xf32>,
    %c0_i32_8 = arith.constant 0 : i32
    %9 = arith.cmpi eq, %arg2, %c0_i32_8 : i32
    %10 = arith.extui %9 : i1 to i32
    %c0_i32_9 = arith.constant 0 : i32
    %11 = arith.cmpi ne, %10, %c0_i32_9 : i32
    scf.if %11 {
      %c0_10 = arith.constant 0 : index
      %c0_11 = arith.constant 0 : index
      %12 = vector.load %arg8[%c0_10, %c0_11] : memref<512x128xf32, #tpu.memory_space<vmem>>, vector<512x128xf32>
      %c0_12 = arith.constant 0 : index
      %c0_13 = arith.constant 0 : index
      %13 = vector.load %arg5[%c0_12, %c0_13] : memref<1x128xf32, #tpu.memory_space<vmem>>, vector<1x128xf32>
      %14 = vector.broadcast %13 : vector<1x128xf32> to vector<512x128xf32>
      %15 = arith.addf %12, %14 : vector<512x128xf32>
      %c0_14 = arith.constant 0 : index
      %c0_15 = arith.constant 0 : index
      %16 = vector.load %arg6[%c0_14, %c0_15] : memref<512x128xbf16, #tpu.memory_space<vmem>>, vector<512x128xbf16>
      %17 = arith.extf %16 : vector<512x128xbf16> to vector<512x128xf32>
      %18 = arith.addf %15, %17 : vector<512x128xf32>
      %19 = arith.truncf %18 : vector<512x128xf32> to vector<512x128xbf16>
      %c0_16 = arith.constant 0 : index
      %c0_17 = arith.constant 0 : index
      %20 = vector.load %arg7[%c0_16, %c0_17] : memref<512x128xbf16, #tpu.memory_space<vmem>>, vector<512x128xbf16>
      tpu.vector_store %arg7[%c0_16, %c0_17], %19 {strides = array<i32>} : memref<512x128xbf16, #tpu.memory_space<vmem>>, vector<512x128xbf16>,
    } else {
    }
    return
  }
  func.func @transform_0(%arg0: i32, %arg1: i32, %arg2: i32) -> (i32, i32) {
    %c0_i32 = arith.constant 0 : i32
    return %arg0, %arg2 : i32, i32
  }
  func.func @transform_1(%arg0: i32, %arg1: i32, %arg2: i32) -> (i32, i32) {
    %c0_i32 = arith.constant 0 : i32
    return %arg2, %arg1 : i32, i32
  }
  func.func @transform_2(%arg0: i32, %arg1: i32, %arg2: i32) -> (i32, i32) {
    %c0_i32 = arith.constant 0 : i32
    %c0_i32_0 = arith.constant 0 : i32
    return %c0_i32, %arg1 : i32, i32
  }
  func.func @transform_3(%arg0: i32, %arg1: i32, %arg2: i32) -> (i32, i32) {
    %c0_i32 = arith.constant 0 : i32
    return %arg0, %arg1 : i32, i32
  }
  func.func @transform_4(%arg0: i32, %arg1: i32, %arg2: i32) -> (i32, i32) {
    %c0_i32 = arith.constant 0 : i32
    return %arg0, %arg1 : i32, i32
  }
}

module attributes {stable_mosaic.version = 11 : i64} {
  func.func @_fused_mm_kernel(%arg0: i32, %arg1: i32, %arg2: i32, %arg3: memref<128x128xbf16, #tpu.memory_space<vmem>>, %arg4: memref<128x128xbf16, #tpu.memory_space<vmem>>, %arg5: memref<1x128xf32, #tpu.memory_space<vmem>>, %arg6: memref<128x128xbf16, #tpu.memory_space<vmem>>, %arg7: memref<128x128xf32, #tpu.memory_space<vmem>>) attributes {dimension_semantics = [#tpu.dimension_semantics<parallel>, #tpu.dimension_semantics<parallel>, #tpu.dimension_semantics<arbitrary>], iteration_bounds = array<i64: 1, 1, 1>, scalar_prefetch = 0 : i64, scratch_operands = 1 : i64, tpu.core_type = #tpu.core_type<tc>, window_params = [{transform_indices = @transform_0, window_bounds = array<i64: 128, 128>}, {transform_indices = @transform_1, window_bounds = array<i64: 128, 128>}, {transform_indices = @transform_2, window_bounds = array<i64: 1, 128>}, {transform_indices = @transform_3, window_bounds = array<i64: 128, 128>}]} {
    %c0_i32 = arith.constant 0 : i32
    %0 = arith.cmpi eq, %arg2, %c0_i32 : i32
    %1 = arith.extui %0 : i1 to i32
    %c0_i32_0 = arith.constant 0 : i32
    %2 = arith.cmpi ne, %1, %c0_i32_0 : i32
    scf.if %2 {
      %cst_10 = arith.constant 0.000000e+00 : f32
      %12 = vector.broadcast %cst_10 : f32 to vector<128x128xf32>
      %c0_11 = arith.constant 0 : index
      %c0_12 = arith.constant 0 : index
      %13 = vector.load %arg7[%c0_11, %c0_12] : memref<128x128xf32, #tpu.memory_space<vmem>>, vector<128x128xf32>
      tpu.vector_store %arg7[%c0_11, %c0_12], %12 {strides = array<i32>} : memref<128x128xf32, #tpu.memory_space<vmem>>, vector<128x128xf32>,
    } else {
    }
    %c0 = arith.constant 0 : index
    %c0_1 = arith.constant 0 : index
    %3 = vector.load %arg7[%c0, %c0_1] : memref<128x128xf32, #tpu.memory_space<vmem>>, vector<128x128xf32>
    %c0_2 = arith.constant 0 : index
    %c0_3 = arith.constant 0 : index
    %4 = vector.load %arg3[%c0_2, %c0_3] : memref<128x128xbf16, #tpu.memory_space<vmem>>, vector<128x128xbf16>
    %c0_4 = arith.constant 0 : index
    %c0_5 = arith.constant 0 : index
    %5 = vector.load %arg4[%c0_4, %c0_5] : memref<128x128xbf16, #tpu.memory_space<vmem>>, vector<128x128xbf16>
    %cst = arith.constant dense<0.000000e+00> : vector<128x128xf32>
    %6 = tpu.matmul %4, %5, %cst {dimension_numbers = #tpu.dot_dimension_numbers<[1], [0], [0], [1], [0, 0, 1, 1], [], []>} : vector<128x128xbf16>, vector<128x128xbf16>, vector<128x128xf32> -> vector<128x128xf32>
    %7 = arith.addf %3, %6 : vector<128x128xf32>
    %c0_6 = arith.constant 0 : index
    %c0_7 = arith.constant 0 : index
    %8 = vector.load %arg7[%c0_6, %c0_7] : memref<128x128xf32, #tpu.memory_space<vmem>>, vector<128x128xf32>
    tpu.vector_store %arg7[%c0_6, %c0_7], %7 {strides = array<i32>} : memref<128x128xf32, #tpu.memory_space<vmem>>, vector<128x128xf32>,
    %c0_i32_8 = arith.constant 0 : i32
    %9 = arith.cmpi eq, %arg2, %c0_i32_8 : i32
    %10 = arith.extui %9 : i1 to i32
    %c0_i32_9 = arith.constant 0 : i32
    %11 = arith.cmpi ne, %10, %c0_i32_9 : i32
    scf.if %11 {
      %c0_10 = arith.constant 0 : index
      %c0_11 = arith.constant 0 : index
      %12 = vector.load %arg7[%c0_10, %c0_11] : memref<128x128xf32, #tpu.memory_space<vmem>>, vector<128x128xf32>
      %c0_12 = arith.constant 0 : index
      %c0_13 = arith.constant 0 : index
      %13 = vector.load %arg5[%c0_12, %c0_13] : memref<1x128xf32, #tpu.memory_space<vmem>>, vector<1x128xf32>
      %14 = vector.broadcast %13 : vector<1x128xf32> to vector<128x128xf32>
      %15 = arith.addf %12, %14 : vector<128x128xf32>
      %16 = arith.negf %15 : vector<128x128xf32>
      %17 = math.exp %16 : vector<128x128xf32>
      %cst_14 = arith.constant 1.000000e+00 : f32
      %18 = vector.broadcast %cst_14 : f32 to vector<128x128xf32>
      %19 = arith.addf %18, %17 : vector<128x128xf32>
      %20 = arith.divf %18, %19 : vector<128x128xf32>
      %21 = arith.mulf %15, %20 : vector<128x128xf32>
      %22 = arith.truncf %21 : vector<128x128xf32> to vector<128x128xbf16>
      %c0_15 = arith.constant 0 : index
      %c0_16 = arith.constant 0 : index
      %23 = vector.load %arg6[%c0_15, %c0_16] : memref<128x128xbf16, #tpu.memory_space<vmem>>, vector<128x128xbf16>
      tpu.vector_store %arg6[%c0_15, %c0_16], %22 {strides = array<i32>} : memref<128x128xbf16, #tpu.memory_space<vmem>>, vector<128x128xbf16>,
    } else {
    }
    return
  }
  func.func @transform_0(%arg0: i32, %arg1: i32, %arg2: i32) -> (i32, i32) {
    %c0_i32 = arith.constant 0 : i32
    return %arg0, %arg2 : i32, i32
  }
  func.func @transform_1(%arg0: i32, %arg1: i32, %arg2: i32) -> (i32, i32) {
    %c0_i32 = arith.constant 0 : i32
    return %arg2, %arg1 : i32, i32
  }
  func.func @transform_2(%arg0: i32, %arg1: i32, %arg2: i32) -> (i32, i32) {
    %c0_i32 = arith.constant 0 : i32
    %c0_i32_0 = arith.constant 0 : i32
    return %c0_i32, %arg1 : i32, i32
  }
  func.func @transform_3(%arg0: i32, %arg1: i32, %arg2: i32) -> (i32, i32) {
    %c0_i32 = arith.constant 0 : i32
    return %arg0, %arg1 : i32, i32
  }
}

module attributes {stable_mosaic.version = 11 : i64} {
  func.func @_fused_mm_kernel(%arg0: i32, %arg1: i32, %arg2: i32, %arg3: memref<128x128xbf16, #tpu.memory_space<vmem>>, %arg4: memref<128x128xbf16, #tpu.memory_space<vmem>>, %arg5: memref<1x128xf32, #tpu.memory_space<vmem>>, %arg6: memref<128x128xbf16, #tpu.memory_space<vmem>>, %arg7: memref<128x128xf32, #tpu.memory_space<vmem>>) attributes {dimension_semantics = [#tpu.dimension_semantics<parallel>, #tpu.dimension_semantics<parallel>, #tpu.dimension_semantics<arbitrary>], iteration_bounds = array<i64: 1, 1, 1>, scalar_prefetch = 0 : i64, scratch_operands = 1 : i64, tpu.core_type = #tpu.core_type<tc>, window_params = [{transform_indices = @transform_0, window_bounds = array<i64: 128, 128>}, {transform_indices = @transform_1, window_bounds = array<i64: 128, 128>}, {transform_indices = @transform_2, window_bounds = array<i64: 1, 128>}, {transform_indices = @transform_3, window_bounds = array<i64: 128, 128>}]} {
    %c0_i32 = arith.constant 0 : i32
    %0 = arith.cmpi eq, %arg2, %c0_i32 : i32
    %1 = arith.extui %0 : i1 to i32
    %c0_i32_0 = arith.constant 0 : i32
    %2 = arith.cmpi ne, %1, %c0_i32_0 : i32
    scf.if %2 {
      %cst_10 = arith.constant 0.000000e+00 : f32
      %12 = vector.broadcast %cst_10 : f32 to vector<128x128xf32>
      %c0_11 = arith.constant 0 : index
      %c0_12 = arith.constant 0 : index
      %13 = vector.load %arg7[%c0_11, %c0_12] : memref<128x128xf32, #tpu.memory_space<vmem>>, vector<128x128xf32>
      tpu.vector_store %arg7[%c0_11, %c0_12], %12 {strides = array<i32>} : memref<128x128xf32, #tpu.memory_space<vmem>>, vector<128x128xf32>,
    } else {
    }
    %c0 = arith.constant 0 : index
    %c0_1 = arith.constant 0 : index
    %3 = vector.load %arg7[%c0, %c0_1] : memref<128x128xf32, #tpu.memory_space<vmem>>, vector<128x128xf32>
    %c0_2 = arith.constant 0 : index
    %c0_3 = arith.constant 0 : index
    %4 = vector.load %arg3[%c0_2, %c0_3] : memref<128x128xbf16, #tpu.memory_space<vmem>>, vector<128x128xbf16>
    %c0_4 = arith.constant 0 : index
    %c0_5 = arith.constant 0 : index
    %5 = vector.load %arg4[%c0_4, %c0_5] : memref<128x128xbf16, #tpu.memory_space<vmem>>, vector<128x128xbf16>
    %cst = arith.constant dense<0.000000e+00> : vector<128x128xf32>
    %6 = tpu.matmul %4, %5, %cst {dimension_numbers = #tpu.dot_dimension_numbers<[1], [0], [0], [1], [0, 0, 1, 1], [], []>} : vector<128x128xbf16>, vector<128x128xbf16>, vector<128x128xf32> -> vector<128x128xf32>
    %7 = arith.addf %3, %6 : vector<128x128xf32>
    %c0_6 = arith.constant 0 : index
    %c0_7 = arith.constant 0 : index
    %8 = vector.load %arg7[%c0_6, %c0_7] : memref<128x128xf32, #tpu.memory_space<vmem>>, vector<128x128xf32>
    tpu.vector_store %arg7[%c0_6, %c0_7], %7 {strides = array<i32>} : memref<128x128xf32, #tpu.memory_space<vmem>>, vector<128x128xf32>,
    %c0_i32_8 = arith.constant 0 : i32
    %9 = arith.cmpi eq, %arg2, %c0_i32_8 : i32
    %10 = arith.extui %9 : i1 to i32
    %c0_i32_9 = arith.constant 0 : i32
    %11 = arith.cmpi ne, %10, %c0_i32_9 : i32
    scf.if %11 {
      %c0_10 = arith.constant 0 : index
      %c0_11 = arith.constant 0 : index
      %12 = vector.load %arg7[%c0_10, %c0_11] : memref<128x128xf32, #tpu.memory_space<vmem>>, vector<128x128xf32>
      %c0_12 = arith.constant 0 : index
      %c0_13 = arith.constant 0 : index
      %13 = vector.load %arg5[%c0_12, %c0_13] : memref<1x128xf32, #tpu.memory_space<vmem>>, vector<1x128xf32>
      %14 = vector.broadcast %13 : vector<1x128xf32> to vector<128x128xf32>
      %15 = arith.addf %12, %14 : vector<128x128xf32>
      %16 = arith.truncf %15 : vector<128x128xf32> to vector<128x128xbf16>
      %c0_14 = arith.constant 0 : index
      %c0_15 = arith.constant 0 : index
      %17 = vector.load %arg6[%c0_14, %c0_15] : memref<128x128xbf16, #tpu.memory_space<vmem>>, vector<128x128xbf16>
      tpu.vector_store %arg6[%c0_14, %c0_15], %16 {strides = array<i32>} : memref<128x128xbf16, #tpu.memory_space<vmem>>, vector<128x128xbf16>,
    } else {
    }
    return
  }
  func.func @transform_0(%arg0: i32, %arg1: i32, %arg2: i32) -> (i32, i32) {
    %c0_i32 = arith.constant 0 : i32
    return %arg0, %arg2 : i32, i32
  }
  func.func @transform_1(%arg0: i32, %arg1: i32, %arg2: i32) -> (i32, i32) {
    %c0_i32 = arith.constant 0 : i32
    return %arg2, %arg1 : i32, i32
  }
  func.func @transform_2(%arg0: i32, %arg1: i32, %arg2: i32) -> (i32, i32) {
    %c0_i32 = arith.constant 0 : i32
    %c0_i32_0 = arith.constant 0 : i32
    return %c0_i32, %arg1 : i32, i32
  }
  func.func @transform_3(%arg0: i32, %arg1: i32, %arg2: i32) -> (i32, i32) {
    %c0_i32 = arith.constant 0 : i32
    return %arg0, %arg1 : i32, i32
  }
}

</mosaic_0001>

<bundles_post_ra>
// kernel: fused_mbconv_stack_forward.5
= control target key start
LH: loop header
LB: loop body
LE: loop exit
PB: predicated region body
PF: predicated region fallthrough
CT: control target
= control target key end

     0   :  { %s3991_s1 = inlined_call_operand.vmem [shape: bf16[128,128], index: 1, kind: input, shape index: {}]   ;;  %s3992_s0 = inlined_call_operand.vmem [shape: bf16[512,128], index: 0, kind: input, shape index: {}]   ;;  %s3993_s2 = inlined_call_operand.vmem [shape: f32[1,128], index: 2, kind: input, shape index: {}]   ;;  %s3994_s3 = inlined_call_operand.vmem [shape: bf16[512,128], index: 3, kind: input, shape index: {}]   ;;  %s3995_s4 = inlined_call_operand.vmem [shape: bf16[512,128], index: 4, kind: output, shape index: {}]  }
   0x1   :  { %v2708_v0 = vld [vmem:[%s3991_s1] sm:$0xff]   ;;  %v2709_v1 = vld [vmem:[%s3991_s1 + $0x8] sm:$0xff]   ;;  %v2710_v2 = vld [vmem:[%s3991_s1 + $0x10] sm:$0xff]  }
   0x2   :  { %2612 = vmatprep.subr.bf16.mxu0 %v2708_v0  ;;  %2692 = vmatprep.subr.bf16.mxu1 %v2708_v0  ;;  %v2711_v3 = vld [vmem:[%s3991_s1 + $0x18] sm:$0xff]   ;;  %v2716_v4 = vld [vmem:[%s3992_s0] sm:$0xff]   ;;  %v2713_v7 = vld [vmem:[%s3991_s1 + $0x28] sm:$0xff]  }
   0x3   :  { %2613 = vmatpush3.bf16.msra.mxu0 %v2708_v0  ;;  %2700 = vmatpush3.bf16.msra.mxu1 %v2708_v0  ;;  %v2717_v5 = vld [vmem:[%s3992_s0 + $0x80] sm:$0xff]   ;;  %v2714_v8 = vld [vmem:[%s3991_s1 + $0x30] sm:$0xff]   ;;  %v2715_v9 = vld [vmem:[%s3991_s1 + $0x38] sm:$0xff]  }
   0x4   :  { %2614 = vmatprep.subr.bf16.mxu0 %v2709_v1  ;;  %2693 = vmatprep.subr.bf16.mxu1 %v2709_v1  ;;  %v2712_v6 = vld [vmem:[%s3991_s1 + $0x20] sm:$0xff]   ;;  %v2718_v10 = vld [vmem:[%s3992_s0 + $0x8] sm:$0xff]   ;;  %v2720_v12 = vld [vmem:[%s3992_s0 + $0x10] sm:$0xff]  }
   0x5   :  { %2628 = vmatprep.mubr.bf16.mxu0 %v2716_v4  ;;  %2660 = vmatprep.mubr.bf16.mxu1 %v2717_v5  ;;  %v2719_v11 = vld [vmem:[%s3992_s0 + $0x88] sm:$0xff]   ;;  %v2721_v13 = vld [vmem:[%s3992_s0 + $0x90] sm:$0xff]   ;;  %v2722_v14 = vld [vmem:[%s3992_s0 + $0x18] sm:$0xff]  }
   0x6   :  { %v2723_v15 = vld [vmem:[%s3992_s0 + $0x98] sm:$0xff]   ;;  %v2724_v16 = vld [vmem:[%s3992_s0 + $0x20] sm:$0xff]   ;;  %v2726_v18 = vld [vmem:[%s3992_s0 + $0x28] sm:$0xff]  }
   0x7   :  { %2615 = vmatpush3.bf16.msra.mxu0 %v2709_v1  ;;  %2701 = vmatpush3.bf16.msra.mxu1 %v2709_v1  ;;  %v2725_v17 = vld [vmem:[%s3992_s0 + $0xa0] sm:$0xff]   ;;  %v2727_v19 = vld [vmem:[%s3992_s0 + $0xa8] sm:$0xff]   ;;  %v2728_v20 = vld [vmem:[%s3992_s0 + $0x30] sm:$0xff]  }
   0x8   :  { %2616 = vmatprep.subr.bf16.mxu0 %v2710_v2  ;;  %2694 = vmatprep.subr.bf16.mxu1 %v2710_v2  ;;  %v2729_v21 = vld [vmem:[%s3992_s0 + $0xb0] sm:$0xff]   ;;  %v2730_v22 = vld [vmem:[%s3992_s0 + $0x38] sm:$0xff]   ;;  %v2732_v24 = vld [vmem:[%s3992_s0 + $0x40] sm:$0xff]  }
   0x9   :  { %v2731_v23 = vld [vmem:[%s3992_s0 + $0xb8] sm:$0xff]   ;;  %v2733_v25 = vld [vmem:[%s3992_s0 + $0xc0] sm:$0xff]   ;;  %v2734_v26 = vld [vmem:[%s3992_s0 + $0x48] sm:$0xff]  }
   0xa   :  { %v2735_v27 = vld [vmem:[%s3992_s0 + $0xc8] sm:$0xff]   ;;  %v2736_v28 = vld [vmem:[%s3992_s0 + $0x50] sm:$0xff]   ;;  %v2738_v30 = vld [vmem:[%s3992_s0 + $0x58] sm:$0xff]  }
   0xb   :  { %2617 = vmatpush3.bf16.msra.mxu0 %v2710_v2  ;;  %2702 = vmatpush3.bf16.msra.mxu1 %v2710_v2  ;;  %v2737_v29 = vld [vmem:[%s3992_s0 + $0xd0] sm:$0xff]   ;;  %v2739_v31 = vld [vmem:[%s3992_s0 + $0xd8] sm:$0xff]   ;;  %v2740_v32 = vld [vmem:[%s3992_s0 + $0x60] sm:$0xff]  }
   0xc   :  { %2618 = vmatprep.subr.bf16.mxu0 %v2711_v3  ;;  %2695 = vmatprep.subr.bf16.mxu1 %v2711_v3  ;;  %v2741_v33 = vld [vmem:[%s3992_s0 + $0xe0] sm:$0xff]   ;;  %v2742_v34 = vld [vmem:[%s3992_s0 + $0x68] sm:$0xff]   ;;  %v2744_v36 = vld [vmem:[%s3992_s0 + $0x70] sm:$0xff]  }
   0xd   :  { %v2743_v35 = vld [vmem:[%s3992_s0 + $0xe8] sm:$0xff]   ;;  %v2745_v37 = vld [vmem:[%s3992_s0 + $0xf0] sm:$0xff]   ;;  %v2746_v38 = vld [vmem:[%s3992_s0 + $0x78] sm:$0xff]  }
   0xe   :  { %v2747_v39 = vld [vmem:[%s3992_s0 + $0xf8] sm:$0xff]   ;;  %v3153_v40 = vld [vmem:[%s3993_s2] ss:$0 sm:$0xff]  ;;  %v3186_v61 = vld [vmem:[%s3994_s3 + $0x8] sm:$0xff]  }
   0xf   :  { %2619 = vmatpush3.bf16.msra.mxu0 %v2711_v3  ;;  %2703 = vmatpush3.bf16.msra.mxu1 %v2711_v3  ;;  %v3191_v62 = vld [vmem:[%s3994_s3 + $0x88] sm:$0xff]   ;;  %v3197_v0 = vld [vmem:[%s3994_s3] sm:$0xff]  }
  0x10   :  { %2620 = vmatprep.subr.bf16.mxu0 %v2712_v6  ;;  %2696 = vmatprep.subr.bf16.mxu1 %v2712_v6  ;;  %v3203_v2 = vld [vmem:[%s3994_s3 + $0x80] sm:$0xff]  }
  0x13   :  { %2621 = vmatpush3.bf16.msra.mxu0 %v2712_v6  ;;  %2704 = vmatpush3.bf16.msra.mxu1 %v2712_v6 }
  0x14   :  { %2622 = vmatprep.subr.bf16.mxu0 %v2713_v7  ;;  %2697 = vmatprep.subr.bf16.mxu1 %v2713_v7 }
  0x17   :  { %2623 = vmatpush3.bf16.msra.mxu0 %v2713_v7  ;;  %2705 = vmatpush3.bf16.msra.mxu1 %v2713_v7 }
  0x18   :  { %2624 = vmatprep.subr.bf16.mxu0 %v2714_v8  ;;  %2698 = vmatprep.subr.bf16.mxu1 %v2714_v8 }
  0x1b   :  { %2625 = vmatpush3.bf16.msra.mxu0 %v2714_v8  ;;  %2706 = vmatpush3.bf16.msra.mxu1 %v2714_v8 }
  0x1c   :  { %2626 = vmatprep.subr.bf16.mxu0 %v2715_v9  ;;  %2699 = vmatprep.subr.bf16.mxu1 %v2715_v9 }
  0x1f   :  { %2627 = vmatpush3.bf16.msra.mxu0 %v2715_v9  ;;  %2707 = vmatpush3.bf16.msra.mxu1 %v2715_v9 }
  0x22   :  { %2629 = vmatmul.mubr.bf16.vlgmr.msra.gmra.mrb[0].mxu0 %v2718_v10  ;;  %2661 = vmatmul.mubr.bf16.vlgmr.msra.gmra.mrb[0].mxu1 %v2719_v11 }
  0x23   :  { %2632 = vmatprep.mubr.bf16.mxu0 %v2720_v12  ;;  %2664 = vmatprep.mubr.bf16.mxu1 %v2721_v13 }
  0x2a   :  { %2633 = vmatmul.mubr.bf16.gmra.mrb[4].mxu0 %v2722_v14  ;;  %2665 = vmatmul.mubr.bf16.gmra.mrb[4].mxu1 %v2723_v15  ;;  %v3220_v15 = vld [vmem:[%s3994_s3 + $0x18] sm:$0xff]  }
  0x2b   :  { %2636 = vmatprep.mubr.bf16.mxu0 %v2724_v16  ;;  %2668 = vmatprep.mubr.bf16.mxu1 %v2725_v17  ;;  %v3225_v16 = vld [vmem:[%s3994_s3 + $0x98] sm:$0xff]  }
  0x32   :  { %2637 = vmatmul.mubr.bf16.gmra.mrb[8].mxu0 %v2726_v18  ;;  %2669 = vmatmul.mubr.bf16.gmra.mrb[8].mxu1 %v2727_v19 }
  0x33   :  { %2640 = vmatprep.mubr.bf16.mxu0 %v2728_v20  ;;  %2672 = vmatprep.mubr.bf16.mxu1 %v2729_v21 }
  0x3a   :  { %2641 = vmatmul.mubr.bf16.gmra.mrb[12].mxu0 %v2730_v22  ;;  %2673 = vmatmul.mubr.bf16.gmra.mrb[12].mxu1 %v2731_v23 }
  0x3b   :  { %2644 = vmatprep.mubr.bf16.mxu0 %v2732_v24  ;;  %2676 = vmatprep.mubr.bf16.mxu1 %v2733_v25 }
  0x42   :  { %2645 = vmatmul.mubr.bf16.gmra.mrb[16].mxu0 %v2734_v26  ;;  %2677 = vmatmul.mubr.bf16.gmra.mrb[16].mxu1 %v2735_v27 }
  0x43   :  { %2648 = vmatprep.mubr.bf16.mxu0 %v2736_v28  ;;  %2680 = vmatprep.mubr.bf16.mxu1 %v2737_v29  ;;  %v3245_v28 = vld [vmem:[%s3994_s3 + $0x10] sm:$0xff]  }
  0x4a   :  { %2649 = vmatmul.mubr.bf16.gmra.mrb[20].mxu0 %v2738_v30  ;;  %2681 = vmatmul.mubr.bf16.gmra.mrb[20].mxu1 %v2739_v31  ;;  %v3251_v30 = vld [vmem:[%s3994_s3 + $0x90] sm:$0xff]  }
  0x4b   :  { %2652 = vmatprep.mubr.bf16.mxu0 %v2740_v32  ;;  %2684 = vmatprep.mubr.bf16.mxu1 %v2741_v33 }
  0x52   :  { %2653 = vmatmul.mubr.bf16.gmra.mrb[24].mxu0 %v2742_v34  ;;  %2685 = vmatmul.mubr.bf16.gmra.mrb[24].mxu1 %v2743_v35 }
  0x53   :  { %2656 = vmatprep.mubr.bf16.mxu0 %v2744_v36  ;;  %2688 = vmatprep.mubr.bf16.mxu1 %v2745_v37  ;;  %v3262_v37 = vld [vmem:[%s3994_s3 + $0x28] sm:$0xff]  }
  0x54   :  { %4013 = vst [vmem:[#allocation3_spill] sm:$0xff] %v3262_v37 }
  0x5a   :  { %2657 = vmatmul.mubr.bf16.gmra.mrb[28].mxu0 %v2746_v38  ;;  %2689 = vmatmul.mubr.bf16.gmra.mrb[28].mxu1 %v2747_v39 }
  0xf5   :  { %v2630_v41 = vpop.f32.mrb[0].mxu0  ;;  %v2662_v42 = vpop.f32.mrb[0].mxu1 }
  0xf6   :  { %v3156_v43 = vadd.f32 %v2630_v41, %v3153_v40  ;;  %v3159_v44 = vadd.f32 %v2662_v42, %v3153_v40  ;;  %v504_v45 = vpop.f32.mrb[1].mxu0  ;;  %v632_v46 = vpop.f32.mrb[1].mxu1 }
  0xf7   :  { %v3162_v47 = vadd.f32 %v3153_v40, %v504_v45  ;;  %v3165_v48 = vadd.f32 %v3153_v40, %v632_v46  ;;  %v2631_v49 = vpop.f32.mrb[2].mxu0  ;;  %v2663_v50 = vpop.f32.mrb[2].mxu1  ;;  %v3270_v45 = vld [vmem:[%s3994_s3 + $0xa8] sm:$0xff]   ;;  %v3275_v46 = vld [vmem:[%s3994_s3 + $0x20] sm:$0xff]  }
  0xf8   :  { %v2032_v51 = vmul.f32 -1.442695, %v3156_v43  ;;  %v2064_v52 = vmul.f32 -1.442695, %v3159_v44  ;;  %v3170_v53 = vadd.f32 %v2631_v49, %v3153_v40  ;;  %v3173_v54 = vadd.f32 %v2663_v50, %v3153_v40  ;;  %v507_v55 = vpop.f32.mrb[3].mxu0  ;;  %v635_v56 = vpop.f32.mrb[3].mxu1 }
  0xf9   :  { %v2030_v57 = vmul.f32 -1.442695, %v3162_v47  ;;  %v2062_v58 = vmul.f32 -1.442695, %v3165_v48  ;;  %v3178_v59 = vadd.f32 %v3153_v40, %v507_v55  ;;  %v3181_v60 = vadd.f32 %v3153_v40, %v635_v56  ;;  %4014 = vst [vmem:[#allocation4_spill] sm:$0xff] %v3270_v45  ;;  %4015 = vst [vmem:[#allocation5_spill] sm:$0xff] %v3275_v46 }
  0xfa   :  { %2748 = vpow2.f32 %v2032_v51  ;;  %v2033_v63 = vmul.f32 -1.442695, %v3170_v53  ;;  %v2065_v1 = vmul.f32 -1.442695, %v3173_v54 }
  0xfb   :  { %2750 = vpow2.f32 %v2064_v52  ;;  %v2031_v3 = vmul.f32 -1.442695, %v3178_v59  ;;  %v2063_v6 = vmul.f32 -1.442695, %v3181_v60 }
  0xfc   :  { %2752 = vpow2.f32 %v2030_v57  ;;  %v3282_v57 = vld [vmem:[%s3994_s3 + $0xa0] sm:$0xff]  }
  0xfd   :  { %2754 = vpow2.f32 %v2062_v58  ;;  %v2634_v7 = vpop.f32.mrb[4].mxu0  ;;  %v2666_v8 = vpop.f32.mrb[4].mxu1  ;;  %4016 = vst [vmem:[#allocation6_spill] sm:$0xff] %v3282_v57 }
  0xfe   :  { %2756 = vpow2.f32 %v2033_v63  ;;  %v3211_v10 = vadd.f32 %v2634_v7, %v3153_v40  ;;  %v3214_v11 = vadd.f32 %v2666_v8, %v3153_v40  ;;  %v520_v12 = vpop.f32.mrb[5].mxu0  ;;  %v648_v13 = vpop.f32.mrb[5].mxu1 }
  0xff   :  { %2758 = vpow2.f32 %v2065_v1  ;;  %v3228_v17 = vadd.f32 %v3153_v40, %v520_v12  ;;  %v3231_v18 = vadd.f32 %v3153_v40, %v648_v13  ;;  %v2635_v19 = vpop.f32.mrb[6].mxu0  ;;  %v2667_v20 = vpop.f32.mrb[6].mxu1 }
 0x100   :  { %2760 = vpow2.f32 %v2031_v3  ;;  %v2036_v21 = vmul.f32 -1.442695, %v3211_v10  ;;  %v2068_v22 = vmul.f32 -1.442695, %v3214_v11  ;;  %v3236_v23 = vadd.f32 %v2635_v19, %v3153_v40  ;;  %v523_v24 = vpop.f32.mrb[7].mxu0  ;;  %v3238_v25 = vpop.f32.mrb[7].mxu1 }
 0x101   :  { %2762 = vpow2.f32 %v2063_v6  ;;  %v2034_v27 = vmul.f32 -1.442695, %v3228_v17  ;;  %v2066_v29 = vmul.f32 -1.442695, %v3231_v18  ;;  %v3293_v3 = vld [vmem:[%s3994_s3 + $0x38] sm:$0xff]   ;;  %v3296_v19 = vadd.f32 %v2667_v20, %v3153_v40 }
 0x102   :  { %2764 = vpow2.f32 %v2036_v21  ;;  %v2037_v33 = vmul.f32 -1.442695, %v3236_v23  ;;  %v3299_v13 = vadd.f32 %v3153_v40, %v523_v24  ;;  %v3312_v39 = vadd.f32 %v3153_v40, %v3238_v25 }
 0x103   :  { %2766 = vpow2.f32 %v2068_v22 }
 0x104   :  { %v2749_v38 = vpop.eup %2748  ;;  %2768 = vpow2.f32 %v2034_v27 }
 0x105   :  { %v2751_v49 = vpop.eup %2750  ;;  %v1219_v50 = vadd.f32 1.0, %v2749_v38  ;;  %2770 = vpow2.f32 %v2066_v29  ;;  %v2638_v55 = vpop.f32.mrb[8].mxu0 }
 0x106   :  { %v2670_v56 = vpop.f32.mrb[8].mxu1  ;;  %v2753_v58 = vpop.eup %2752  ;;  %v1251_v63 = vadd.f32 1.0, %v2751_v49  ;;  %2772 = vpow2.f32 %v2037_v33 }
 0x107   :  { %v536_v6 = vpop.f32.mrb[9].mxu0  ;;  %v664_v7 = vpop.f32.mrb[9].mxu1  ;;  %2774 = vrcp.f32 %v1219_v50  ;;  %v1217_v12 = vadd.f32 1.0, %v2753_v58 }
 0x108   :  { %v2755_v8 = vpop.eup %2754  ;;  %v2639_v21 = vpop.f32.mrb[10].mxu0  ;;  %2776 = vrcp.f32 %v1251_v63  ;;  %v3329_v42 = vadd.f32 %v3153_v40, %v664_v7 }
 0x109   :  { %v2671_v22 = vpop.f32.mrb[10].mxu1  ;;  %v2757_v27 = vpop.eup %2756  ;;  %v1249_v29 = vadd.f32 1.0, %v2755_v8  ;;  %2778 = vrcp.f32 %v1217_v12  ;;  %v3304_v8 = vld [vmem:[%s3994_s3 + $0xb8] sm:$0xff]   ;;  %v2069_v12 = vmul.f32 -1.442695, %v3296_v19  ;;  %v3336_v35 = vadd.f32 %v2639_v21, %v3153_v40 }
 0x10a   :  { %v539_v49 = vpop.f32.mrb[11].mxu0  ;;  %v2759_v50 = vpop.eup %2758  ;;  %v1220_v58 = vadd.f32 1.0, %v2757_v27  ;;  %4019 = vst [vmem:[#allocation9_spill] sm:$0xff] %v3329_v42  ;;  %v3339_v34 = vadd.f32 %v2671_v22, %v3153_v40  ;;  %v2067_v22 = vmul.f32 -1.442695, %v3312_v39 }
 0x10b   :  { %v667_v63 = vpop.f32.mrb[11].mxu1  ;;  %v2761_v33 = vpop.eup %2760  ;;  %2780 = vrcp.f32 %v1249_v29  ;;  %v1252_v38 = vadd.f32 1.0, %v2759_v50  ;;  %4020 = vst [vmem:[#allocation10_spill] sm:$0xff] %v3336_v35  ;;  %v3346_v14 = vadd.f32 %v3153_v40, %v539_v49  ;;  %v2070_v49 = vmul.f32 -1.442695, %v3329_v42 }
 0x10c   :  { %v2763_v27 = vpop.eup %2762  ;;  %2782 = vrcp.f32 %v1220_v58  ;;  %v1218_v20 = vadd.f32 1.0, %v2761_v33  ;;  %v2035_v33 = vmul.f32 -1.442695, %v3299_v13  ;;  %4021 = vst [vmem:[#allocation11_spill] sm:$0xff] %v3339_v34  ;;  %v3349_v32 = vadd.f32 %v3153_v40, %v667_v63 }
 0x10d   :  { %v2765_v51 = vpop.eup %2764  ;;  %2784 = vrcp.f32 %v1252_v38  ;;  %v1250_v41 = vadd.f32 1.0, %v2763_v27  ;;  %v2642_v58 = vpop.f32.mrb[12].mxu0  ;;  %v3318_v38 = vadd.f32 %v2638_v55, %v3153_v40  ;;  %v3321_v27 = vadd.f32 %v2670_v56, %v3153_v40  ;;  %4022 = vst [vmem:[#allocation12_spill] sm:$0xff] %v3346_v14 }
 0x10e   :  { %v2767_v50 = vpop.eup %2766  ;;  %2786 = vrcp.f32 %v1218_v20  ;;  %v1223_v1 = vadd.f32 1.0, %v2765_v51  ;;  %v2674_v25 = vpop.f32.mrb[12].mxu1  ;;  %v3326_v20 = vadd.f32 %v3153_v40, %v536_v6  ;;  %4023 = vst [vmem:[#allocation13_spill] sm:$0xff] %v3349_v32  ;;  %v2073_v26 = vmul.f32 -1.442695, %v3339_v34 }
 0x10f   :  { %v2769_v52 = vpop.eup %2768  ;;  %2788 = vrcp.f32 %v1250_v41  ;;  %v1255_v24 = vadd.f32 1.0, %v2767_v50  ;;  %4017 = vst [vmem:[#allocation7_spill] sm:$0xff] %v3321_v27  ;;  %v3323_v36 = vpop.f32.mrb[13].mxu0  ;;  %v2072_v9 = vmul.f32 -1.442695, %v3321_v27 }
 0x110   :  { %v2771_v29 = vpop.eup %2770  ;;  %2790 = vrcp.f32 %v1223_v1  ;;  %v1221_v51 = vadd.f32 1.0, %v2769_v52  ;;  %4018 = vst [vmem:[#allocation8_spill] sm:$0xff] %v3326_v20  ;;  %v3331_v41 = vpop.f32.mrb[13].mxu1  ;;  %v2071_v46 = vmul.f32 -1.442695, %v3349_v32 }
 0x111   :  { %v3333_v50 = vpop.f32.mrb[14].mxu0  ;;  %v2773_v55 = vpop.eup %2772  ;;  %2792 = vrcp.f32 %v1255_v24  ;;  %v1253_v56 = vadd.f32 1.0, %v2771_v29  ;;  %v2040_v29 = vmul.f32 -1.442695, %v3318_v38 }
 0x112   :  { %v3341_v52 = vpop.f32.mrb[14].mxu1  ;;  %v3343_v1 = vpop.f32.mrb[15].mxu0  ;;  %2794 = vrcp.f32 %v1221_v51  ;;  %v1224_v7 = vadd.f32 1.0, %v2773_v55  ;;  %v2038_v51 = vmul.f32 -1.442695, %v3326_v20  ;;  %v3359_v55 = vadd.f32 %v2642_v58, %v3153_v40 }
 0x113   :  { %v2775_v6 = vpop.eup %2774  ;;  %v3351_v24 = vpop.f32.mrb[15].mxu1  ;;  %2796 = vrcp.f32 %v1253_v56  ;;  %v2041_v56 = vmul.f32 -1.442695, %v3336_v35 }
 0x114   :  { %v2777_v21 = vpop.eup %2776  ;;  %2798 = vrcp.f32 %v1224_v7  ;;  %4024 = vst [vmem:[#allocation14_spill] sm:$0xff] %v3359_v55  ;;  %v1411_v5 = vmul.f32 %v2775_v6, %v3156_v43  ;;  %v2039_v7 = vmul.f32 -1.442695, %v3346_v14  ;;  %v3374_v6 = vadd.f32 %v2674_v25, %v3153_v40 }
 0x115   :  { %v2779_v31 = vpop.eup %2778  ;;  %2800 = vpow2.f32 %v2069_v12  ;;  %v1443_v57 = vmul.f32 %v2777_v21, %v3159_v44  ;;  %v3367_v45 = vpop.f32.mrb[16].mxu0  ;;  %v2044_v14 = vmul.f32 -1.442695, %v3359_v55  ;;  %v4026_v25 = vunpack.c.h.bf16 %v3186_v61 }
 0x116   :  { %v2781_v63 = vpop.eup %2780  ;;  %2802 = vpow2.f32 %v2035_v33  ;;  %v3369_v58 = vpop.f32.mrb[16].mxu1  ;;  %v1409_v43 = vmul.f32 %v2779_v31, %v3162_v47  ;;  %v4028_v55 = vunpack.c.h.bf16 %v3191_v62 }
 0x117   :  { %v2783_v4 = vpop.eup %2782  ;;  %2804 = vpow2.f32 %v2067_v22  ;;  %v3376_v34 = vpop.f32.mrb[17].mxu0  ;;  %v1441_v21 = vmul.f32 %v2781_v63, %v3165_v48 }
 0x118   :  { %v2785_v37 = vpop.eup %2784  ;;  %v1412_v12 = vmul.f32 %v2783_v4, %v3170_v53  ;;  %v3378_v44 = vpop.f32.mrb[17].mxu1  ;;  %2806 = vpow2.f32 %v2040_v29  ;;  %v4025_v4 = vunpack.c.l.bf16 %v3186_v61  ;;  %v4027_v29 = vunpack.c.l.bf16 %v3191_v62 }
 0x119   :  { %v2787_v33 = vpop.eup %2786  ;;  %v1444_v32 = vmul.f32 %v2785_v37, %v3173_v54  ;;  %v3383_v42 = vpop.f32.mrb[18].mxu0  ;;  %2808 = vpow2.f32 %v2072_v9  ;;  %v4029_v61 = vunpack.c.l.bf16 %v3197_v0 }
 0x11a   :  { %v3385_v47 = vpop.f32.mrb[18].mxu1  ;;  %v2789_v53 = vpop.eup %2788  ;;  %v1603_v31 = vadd.f32 %v4025_v4, %v1411_v5  ;;  %v1604_v22 = vadd.f32 %v4026_v25, %v1412_v12  ;;  %v1410_v35 = vmul.f32 %v2787_v33, %v3178_v59  ;;  %v1635_v63 = vadd.f32 %v4027_v29, %v1443_v57  ;;  %v3410_v57 = vld [vmem:[%s3994_s3 + $0x30] sm:$0xff]  }
 0x11b   :  { %v3392_v48 = vpop.f32.mrb[19].mxu0  ;;  %v3394_v54 = vpop.f32.mrb[19].mxu1  ;;  %v1636_v20 = vadd.f32 %v4028_v55, %v1444_v32  ;;  %v1442_v27 = vmul.f32 %v2789_v53, %v3181_v60  ;;  %2810 = vpow2.f32 %v2038_v51  ;;  %v1601_v59 = vadd.f32 %v4029_v61, %v1409_v43  ;;  %v3415_v60 = vld [vmem:[%s3994_s3 + $0xb0] sm:$0xff]  }
 0x11c   :  { %v2791_v37 = vpop.eup %2790  ;;  %v2358_v9 = vpack.c.bf16 %v1604_v22, %v1603_v31  ;;  %v4030_v12 = vunpack.c.h.bf16 %v3197_v0  ;;  %2812 = vpow2.f32 %v2070_v49  ;;  %v4031_v32 = vunpack.c.l.bf16 %v3203_v2 }
 0x11d   :  { %v3401_v5 = vpop.eup %2792  ;;  %v2438_v55 = vpack.c.bf16 %v1636_v20, %v1635_v63  ;;  %v4032_v0 = vunpack.c.h.bf16 %v3203_v2  ;;  %2814 = vpow2.f32 %v2041_v56  ;;  %v1415_v53 = vmul.f32 %v2791_v37, %v3211_v10  ;;  %v3435_v56 = vpop.f32.mrb[20].mxu0 }
 0x11e   :  { %v1602_v33 = vadd.f32 %v4030_v12, %v1410_v35  ;;  %v3417_v62 = vpop.eup %2794  ;;  %v1633_v51 = vadd.f32 %v4031_v32, %v1441_v21  ;;  %2541 = vst [vmem:[%s3995_s4 + $0x8] sm:$0xff] %v2358_v9   ;;  %2816 = vpow2.f32 %v2073_v26  ;;  %v2076_v4 = vmul.f32 -1.442695, %v3374_v6  ;;  %v3437_v21 = vpop.f32.mrb[20].mxu1 }
 0x11f   :  { %v1634_v35 = vadd.f32 %v4032_v0, %v1442_v27  ;;  %v3423_v49 = vpop.eup %2796  ;;  %2557 = vst [vmem:[%s3995_s4 + $0x88] sm:$0xff] %v2438_v55   ;;  %2818 = vpow2.f32 %v2039_v7  ;;  %v3445_v22 = vpop.f32.mrb[21].mxu0  ;;  %v3454_v61 = vadd.f32 %v3153_v40, %v3323_v36  ;;  %v4033_v12 = vunpack.c.l.bf16 %v3220_v15  ;;  %v3471_v36 = vld [vmem:[%s3994_s3 + $0x48] sm:$0xff]  }
 0x120   :  { %v2353_v43 = vpack.c.bf16 %v1602_v33, %v1601_v59  ;;  %v2799_v31 = vpop.eup %2798  ;;  %2820 = vpow2.f32 %v2071_v46  ;;  %v3447_v37 = vpop.f32.mrb[21].mxu1  ;;  %v4034_v32 = vunpack.c.h.bf16 %v3220_v15  ;;  %v3534_v7 = vadd.f32 %v3369_v58, %v3153_v40 }
 0x121   :  { %v2433_v2 = vpack.c.bf16 %v1634_v35, %v1633_v51  ;;  %v2801_v25 = vpop.eup %2800  ;;  %v1416_v10 = vmul.f32 %v2799_v31, %v3236_v23  ;;  %2822 = vpow2.f32 %v2044_v14  ;;  %v3458_v23 = vadd.f32 %v3153_v40, %v3331_v41  ;;  %v3460_v46 = vpop.f32.mrb[22].mxu0 }
 0x122   :  { %2354 = vst [vmem:[%s3995_s4] sm:$0xff] %v2353_v43   ;;  %v2803_v29 = vpop.eup %2802  ;;  %v1256_v63 = vadd.f32 1.0, %v2801_v25  ;;  %v3462_v59 = vpop.f32.mrb[22].mxu1  ;;  %v1607_v33 = vadd.f32 %v4033_v12, %v1415_v53  ;;  %2824 = vpow2.f32 %v2076_v4  ;;  %v3479_v43 = vadd.f32 %v3333_v50, %v3153_v40 }
 0x123   :  { %2556 = vst [vmem:[%s3995_s4 + $0x80] sm:$0xff] %v2433_v2   ;;  %v2805_v9 = vpop.eup %2804  ;;  %v1608_v51 = vadd.f32 %v4034_v32, %v1416_v10  ;;  %v1222_v14 = vadd.f32 1.0, %v2803_v29  ;;  %v3473_v41 = vpop.f32.mrb[23].mxu0  ;;  %v3485_v29 = vadd.f32 %v3341_v52, %v3153_v40  ;;  %v2042_v12 = vmul.f32 -1.442695, %v3454_v61 }
 0x124   :  { %v3475_v55 = vpop.f32.mrb[23].mxu1  ;;  %v2807_v0 = vpop.eup %2806  ;;  %2826 = vrcp.f32 %v1256_v63  ;;  %v1254_v35 = vadd.f32 1.0, %v2805_v9  ;;  %v3496_v52 = vmul.f32 -1.442695, %v3479_v43  ;;  %v3545_v58 = vadd.f32 %v3153_v40, %v3376_v34 }
 0x125   :  { %v2809_v53 = vpop.eup %2808  ;;  %v2368_v4 = vpack.c.bf16 %v1608_v51, %v1607_v33  ;;  %2828 = vrcp.f32 %v1222_v14  ;;  %v1227_v31 = vadd.f32 1.0, %v2807_v0  ;;  %v3493_v33 = vmul.f32 -1.442695, %v3458_v23  ;;  %v3502_v0 = vpop.f32.mrb[24].mxu0 }
 0x126   :  { %v2811_v25 = vpop.eup %2810  ;;  %2830 = vrcp.f32 %v1254_v35  ;;  %v1259_v10 = vadd.f32 1.0, %v2809_v53  ;;  %v3500_v14 = vadd.f32 %v3153_v40, %v3343_v1  ;;  %v3504_v35 = vpop.f32.mrb[24].mxu1  ;;  %v1413_v1 = vmul.f32 %v3417_v62, %v3228_v17 }
 0x127   :  { %v2813_v9 = vpop.eup %2812  ;;  %2543 = vst [vmem:[%s3995_s4 + $0x18] sm:$0xff] %v2368_v4   ;;  %2832 = vrcp.f32 %v1227_v31  ;;  %v1225_v50 = vadd.f32 1.0, %v2811_v25  ;;  %v1447_v4 = vmul.f32 %v3401_v5, %v3214_v11  ;;  %v3510_v25 = vadd.f32 %v3153_v40, %v3351_v24  ;;  %v3517_v15 = vpop.f32.mrb[25].mxu1 }
 0x128   :  { %v2815_v32 = vpop.eup %2814  ;;  %2834 = vrcp.f32 %v1259_v10  ;;  %v1257_v51 = vadd.f32 1.0, %v2813_v9  ;;  %v3512_v10 = vpop.f32.mrb[25].mxu0  ;;  %v2077_v2 = vmul.f32 -1.442695, %v3485_v29  ;;  %v1445_v5 = vmul.f32 %v3423_v49, %v3231_v18 }
 0x129   :  { %v2817_v53 = vpop.eup %2816  ;;  %2836 = vrcp.f32 %v1225_v50  ;;  %v1228_v31 = vadd.f32 1.0, %v2815_v32  ;;  %v3519_v20 = vpop.f32.mrb[26].mxu0  ;;  %v3525_v50 = vadd.f32 %v3367_v45, %v3153_v40  ;;  %v2075_v27 = vmul.f32 -1.442695, %v3510_v25 }
 0x12a   :  { %v2819_v9 = vpop.eup %2818  ;;  %2838 = vrcp.f32 %v1257_v51  ;;  %v1260_v63 = vadd.f32 1.0, %v2817_v53  ;;  %4035 = vst [vmem:[#allocation15_spill] sm:$0xff] %v3519_v20  ;;  %v3527_v32 = vpop.f32.mrb[26].mxu1  ;;  %v2043_v53 = vmul.f32 -1.442695, %v3500_v14 }
 0x12b   :  { %v2821_v11 = vpop.eup %2820  ;;  %2840 = vrcp.f32 %v1228_v31  ;;  %v1226_v24 = vadd.f32 1.0, %v2819_v9  ;;  %4036 = vst [vmem:[#allocation16_spill] sm:$0xff] %v3527_v32  ;;  %v3529_v17 = vpop.f32.mrb[27].mxu0  ;;  %v4039_v31 = vunpack.c.l.bf16 %v3225_v16 }
 0x12c   :  { %4037 = vst [vmem:[#allocation17_spill] sm:$0xff] %v3529_v17  ;;  %v2823_v62 = vpop.eup %2822  ;;  %2842 = vrcp.f32 %v1260_v63  ;;  %v1258_v51 = vadd.f32 1.0, %v2821_v11  ;;  %v3536_v18 = vpop.f32.mrb[27].mxu1  ;;  %v4040_v63 = vunpack.c.l.bf16 %v3245_v28 }
 0x12d   :  { %4038 = vst [vmem:[#allocation18_spill] sm:$0xff] %v3536_v18  ;;  %v2825_v49 = vpop.eup %2824  ;;  %v1639_v45 = vadd.f32 %v4039_v31, %v1447_v4  ;;  %2844 = vrcp.f32 %v1226_v24  ;;  %v1231_v9 = vadd.f32 1.0, %v2823_v62  ;;  %v4041_v18 = vunpack.c.l.bf16 %v3251_v30  ;;  %v3557_v34 = vpop.f32.mrb[28].mxu0 }
 0x12e   :  { %v2827_v26 = vpop.eup %2826  ;;  %v1605_v11 = vadd.f32 %v4040_v63, %v1413_v1  ;;  %2846 = vrcp.f32 %v1258_v51  ;;  %v1263_v17 = vadd.f32 1.0, %v2825_v49  ;;  %v2048_v24 = vmul.f32 -1.442695, %v3525_v50  ;;  %v3559_v49 = vpop.f32.mrb[28].mxu1 }
 0x12f   :  { %v2829_v32 = vpop.eup %2828  ;;  %v1637_v20 = vadd.f32 %v4041_v18, %v1445_v5  ;;  %v1448_v4 = vmul.f32 %v2827_v26, %v3296_v19  ;;  %2848 = vrcp.f32 %v1231_v9  ;;  %v2080_v1 = vmul.f32 -1.442695, %v3534_v7 }
 0x130   :  { %v2831_v62 = vpop.eup %2830  ;;  %v1414_v31 = vmul.f32 %v2829_v32, %v3299_v13  ;;  %2850 = vrcp.f32 %v1263_v17  ;;  %v3555_v51 = vadd.f32 %v3153_v40, %v3378_v44  ;;  %v4043_v19 = vunpack.c.h.bf16 %v3225_v16  ;;  %v3568_v32 = vpop.f32.mrb[29].mxu0 }
 0x131   :  { %v2833_v5 = vpop.eup %2832  ;;  %v1446_v18 = vmul.f32 %v2831_v62, %v3312_v39  ;;  %2852 = vpow2.f32 %v2042_v12  ;;  %v3566_v13 = vadd.f32 %v3383_v42, %v3153_v40  ;;  %v3570_v17 = vpop.f32.mrb[29].mxu1  ;;  %v4045_v9 = vunpack.c.h.bf16 %v3245_v28 }
 0x132   :  { %4042 = vst [vmem:[#allocation19_spill] sm:$0xff] %v3555_v51  ;;  %v1640_v26 = vadd.f32 %v4043_v19, %v1448_v4  ;;  %4044 = vst [vmem:[#allocation20_spill] sm:$0xff] %v3570_v17  ;;  %v2835_v44 = vpop.eup %2834  ;;  %2854 = vpow2.f32 %v3493_v33  ;;  %v2046_v16 = vmul.f32 -1.442695, %v3545_v58  ;;  %v3578_v39 = vadd.f32 %v3385_v47, %v3153_v40  ;;  %v3580_v12 = vpop.f32.mrb[30].mxu0 }
 0x133   :  { %v1606_v63 = vadd.f32 %v4045_v9, %v1414_v31  ;;  %4046 = vst [vmem:[#allocation21_spill] sm:$0xff] %v3580_v12  ;;  %v3582_v42 = vpop.f32.mrb[30].mxu1  ;;  %v2837_v4 = vpop.eup %2836  ;;  %v4048_v19 = vunpack.c.h.bf16 %v3251_v30  ;;  %2856 = vpow2.f32 %v3496_v52  ;;  %v3589_v28 = vadd.f32 %v3153_v40, %v3392_v48  ;;  %v4051_v52 = vld [vmem:[#allocation7_spill] sm:$0xff] }
 0x134   :  { %4047 = vst [vmem:[#allocation22_spill] sm:$0xff] %v3582_v42  ;;  %v2448_v62 = vpack.c.bf16 %v1640_v26, %v1639_v45  ;;  %v3591_v33 = vpop.f32.mrb[31].mxu0  ;;  %v3593_v31 = vpop.f32.mrb[31].mxu1  ;;  %v1419_v12 = vmul.f32 %v2833_v5, %v3318_v38  ;;  %2858 = vpow2.f32 %v2077_v2  ;;  %v2078_v45 = vmul.f32 -1.442695, %v3555_v51  ;;  %v4052_v38 = vld [vmem:[#allocation8_spill] sm:$0xff] }
 0x135   :  { %v1638_v17 = vadd.f32 %v4048_v19, %v1446_v18  ;;  %4049 = vst [vmem:[#allocation23_spill] sm:$0xff] %v3591_v33  ;;  %4050 = vst [vmem:[#allocation24_spill] sm:$0xff] %v3593_v31  ;;  %v2839_v47 = vpop.eup %2838  ;;  %v2363_v9 = vpack.c.bf16 %v1606_v63, %v1605_v11  ;;  %v1451_v48 = vmul.f32 %v2835_v44, %v4051_v52  ;;  %2860 = vpow2.f32 %v2043_v53  ;;  %v4053_v11 = vld [vmem:[#allocation10_spill] sm:$0xff]  ;;  %v4056_v52 = vld [vmem:[#allocation3_spill] sm:$0xff] }
 0x136   :  { %v2841_v26 = vpop.eup %2840  ;;  %2559 = vst [vmem:[%s3995_s4 + $0x98] sm:$0xff] %v2448_v62   ;;  %v2049_v18 = vmul.f32 -1.442695, %v3566_v13  ;;  %v1417_v2 = vmul.f32 %v2837_v4, %v4052_v38  ;;  %2862 = vpow2.f32 %v2075_v27  ;;  %v2081_v63 = vmul.f32 -1.442695, %v3578_v39 }
 0x137   :  { %v2443_v30 = vpack.c.bf16 %v1638_v17, %v1637_v20  ;;  %v2843_v19 = vpop.eup %2842  ;;  %2542 = vst [vmem:[%s3995_s4 + $0x10] sm:$0xff] %v2363_v9   ;;  %v1420_v5 = vmul.f32 %v2841_v26, %v4053_v11  ;;  %v4054_v20 = vld [vmem:[#allocation9_spill] sm:$0xff]  ;;  %v4055_v17 = vld [vmem:[#allocation11_spill] sm:$0xff]  ;;  %2864 = vpow2.f32 %v2048_v24  ;;  %v2047_v62 = vmul.f32 -1.442695, %v3589_v28  ;;  %v4059_v11 = vld [vmem:[#allocation12_spill] sm:$0xff] }
 0x138   :  { %v2845_v31 = vpop.eup %2844  ;;  %v1449_v53 = vmul.f32 %v2839_v47, %v4054_v20  ;;  %v1452_v44 = vmul.f32 %v2843_v19, %v4055_v17  ;;  %v4057_v4 = vunpack.c.l.bf16 %v4056_v52  ;;  %v4058_v27 = vunpack.c.h.bf16 %v4056_v52  ;;  %v4063_v20 = vld [vmem:[#allocation13_spill] sm:$0xff] }
 0x139   :  { %2558 = vst [vmem:[%s3995_s4 + $0x90] sm:$0xff] %v2443_v30   ;;  %v2847_v9 = vpop.eup %2846  ;;  %v1418_v33 = vmul.f32 %v2845_v31, %v4059_v11  ;;  %2866 = vpow2.f32 %v2080_v1  ;;  %v4060_v30 = vld [vmem:[#allocation4_spill] sm:$0xff]  ;;  %v4064_v31 = vld [vmem:[#allocation5_spill] sm:$0xff] }
 0x13a   :  { %v1611_v38 = vadd.f32 %v4057_v4, %v1419_v12  ;;  %v1612_v26 = vadd.f32 %v4058_v27, %v1420_v5  ;;  %v3619_v42 = vpop.eup %2848  ;;  %v4061_v51 = vunpack.c.l.bf16 %v4060_v30  ;;  %v4062_v19 = vunpack.c.h.bf16 %v4060_v30  ;;  %v3629_v12 = vld [vmem:[%s3994_s3 + $0xc8] sm:$0xff]  }
 0x13b   :  { %v1450_v17 = vmul.f32 %v2847_v9, %v4063_v20  ;;  %2868 = vpow2.f32 %v2046_v16  ;;  %v3631_v5 = vpop.eup %2850  ;;  %v4065_v1 = vunpack.c.l.bf16 %v4064_v31  ;;  %v4066_v27 = vunpack.c.h.bf16 %v4064_v31  ;;  %v3644_v16 = vld [vmem:[%s3994_s3 + $0x40] sm:$0xff]  }
 0x13c   :  { %v1643_v47 = vadd.f32 %v4061_v51, %v1451_v48  ;;  %v1644_v24 = vadd.f32 %v4062_v19, %v1452_v44  ;;  %v2378_v4 = vpack.c.bf16 %v1612_v26, %v1611_v38  ;;  %2870 = vpow2.f32 %v2078_v45  ;;  %v2853_v48 = vpop.eup %2852  ;;  %v4067_v44 = vld [vmem:[#allocation6_spill] sm:$0xff] }
 0x13d   :  { %v1609_v52 = vadd.f32 %v4065_v1, %v1417_v2  ;;  %v1610_v51 = vadd.f32 %v4066_v27, %v1418_v33  ;;  %v4068_v11 = vunpack.c.l.bf16 %v4067_v44  ;;  %v4069_v19 = vunpack.c.h.bf16 %v4067_v44  ;;  %v2855_v2 = vpop.eup %2854 }
 0x13e   :  { %v2458_v30 = vpack.c.bf16 %v1644_v24, %v1643_v47  ;;  %2872 = vpow2.f32 %v2049_v18  ;;  %2545 = vst [vmem:[%s3995_s4 + $0x28] sm:$0xff] %v2378_v4   ;;  %v1229_v45 = vadd.f32 1.0, %v2853_v48  ;;  %v2324_v38 = vunpack.c.l.bf16 %v3629_v12  ;;  %v2857_v26 = vpop.eup %2856 }
 0x13f   :  { %v1641_v9 = vadd.f32 %v4068_v11, %v1449_v53  ;;  %v1642_v20 = vadd.f32 %v4069_v19, %v1450_v17  ;;  %v2373_v33 = vpack.c.bf16 %v1610_v51, %v1609_v52  ;;  %v3653_v53 = vld [vmem:[%s3994_s3 + $0xc0] sm:$0xff]   ;;  %2874 = vpow2.f32 %v2081_v63  ;;  %v2859_v17 = vpop.eup %2858 }
 0x140   :  { %2561 = vst [vmem:[%s3995_s4 + $0xa8] sm:$0xff] %v2458_v30   ;;  %v1261_v47 = vadd.f32 1.0, %v2855_v2  ;;  %2876 = vpow2.f32 %v2047_v62  ;;  %v3660_v24 = vadd.f32 %v3153_v40, %v3394_v54  ;;  %v1232_v31 = vadd.f32 1.0, %v2857_v26  ;;  %v2861_v52 = vpop.eup %2860 }
 0x141   :  { %v2453_v18 = vpack.c.bf16 %v1642_v20, %v1641_v9  ;;  %2544 = vst [vmem:[%s3995_s4 + $0x20] sm:$0xff] %v2373_v33   ;;  %2878 = vrcp.f32 %v1229_v45  ;;  %v3668_v1 = vadd.f32 %v3435_v56, %v3153_v40  ;;  %v1264_v54 = vadd.f32 1.0, %v2859_v17  ;;  %v2863_v27 = vpop.eup %2862 }
 0x142   :  { %2880 = vrcp.f32 %v1261_v47  ;;  %v3676_v4 = vadd.f32 %v3437_v21, %v3153_v40  ;;  %v1230_v51 = vadd.f32 1.0, %v2861_v52  ;;  %v2865_v44 = vpop.eup %2864  ;;  %v1262_v11 = vadd.f32 1.0, %v2863_v27 }
 0x143   :  { %2560 = vst [vmem:[%s3995_s4 + $0xa0] sm:$0xff] %v2453_v18   ;;  %2882 = vrcp.f32 %v1232_v31  ;;  %v2079_v30 = vmul.f32 -1.442695, %v3660_v24  ;;  %v2867_v19 = vpop.eup %2866  ;;  %v1235_v20 = vadd.f32 1.0, %v2865_v44  ;;  %v2052_v21 = vmul.f32 -1.442695, %v3668_v1 }
 0x144   :  { %2884 = vrcp.f32 %v1264_v54  ;;  %v3685_v2 = vadd.f32 %v3153_v40, %v3445_v22  ;;  %v1267_v45 = vadd.f32 1.0, %v2867_v19  ;;  %v2084_v26 = vmul.f32 -1.442695, %v3676_v4  ;;  %v4070_v19 = vld [vmem:[#allocation14_spill] sm:$0xff] }
 0x145   :  { %2886 = vrcp.f32 %v1230_v51  ;;  %v2869_v33 = vpop.eup %2868  ;;  %v3690_v18 = vadd.f32 %v3153_v40, %v3447_v37  ;;  %v3694_v31 = vadd.f32 %v3460_v46, %v3153_v40  ;;  %v3698_v22 = vadd.f32 %v3462_v59, %v3153_v40 }
 0x146   :  { %2888 = vrcp.f32 %v1262_v11  ;;  %v2871_v47 = vpop.eup %2870  ;;  %v1233_v17 = vadd.f32 1.0, %v2869_v33  ;;  %v3702_v27 = vadd.f32 %v3153_v40, %v3473_v41  ;;  %v3706_v37 = vadd.f32 %v3153_v40, %v3475_v55 }
 0x147   :  { %2890 = vrcp.f32 %v1235_v20  ;;  %v1265_v54 = vadd.f32 1.0, %v2871_v47  ;;  %v2050_v46 = vmul.f32 -1.442695, %v3685_v2  ;;  %v3711_v59 = vadd.f32 %v3502_v0, %v3153_v40 }
 0x148   :  { %v2873_v52 = vpop.eup %2872  ;;  %2892 = vrcp.f32 %v1267_v45  ;;  %v1423_v20 = vmul.f32 %v3619_v42, %v4070_v19  ;;  %v2082_v33 = vmul.f32 -1.442695, %v3690_v18  ;;  %v1455_v55 = vmul.f32 %v3631_v5, %v3374_v6 }
 0x149   :  { %v2875_v51 = vpop.eup %2874  ;;  %2894 = vrcp.f32 %v1233_v17  ;;  %v1236_v44 = vadd.f32 1.0, %v2873_v52  ;;  %v2053_v17 = vmul.f32 -1.442695, %v3694_v31  ;;  %v2085_v0 = vmul.f32 -1.442695, %v3698_v22 }
 0x14a   :  { %v2877_v11 = vpop.eup %2876  ;;  %2896 = vrcp.f32 %v1265_v54  ;;  %v1268_v41 = vadd.f32 1.0, %v2875_v51  ;;  %v2051_v62 = vmul.f32 -1.442695, %v3702_v27  ;;  %v2083_v42 = vmul.f32 -1.442695, %v3706_v37 }
 0x14b   :  { %v2879_v45 = vpop.eup %2878  ;;  %2898 = vrcp.f32 %v1236_v44  ;;  %v1234_v47 = vadd.f32 1.0, %v2877_v11  ;;  %v2056_v19 = vmul.f32 -1.442695, %v3711_v59  ;;  %v3726_v6 = vadd.f32 %v3504_v35, %v3153_v40 }
 0x14c   :  { %v2881_v52 = vpop.eup %2880  ;;  %2900 = vrcp.f32 %v1268_v41  ;;  %v1421_v51 = vmul.f32 %v2879_v45, %v3454_v61  ;;  %v4071_v44 = vunpack.c.l.bf16 %v3293_v3  ;;  %v4072_v63 = vunpack.c.l.bf16 %v3304_v8 }
 0x14d   :  { %v2883_v54 = vpop.eup %2882  ;;  %2902 = vrcp.f32 %v1234_v47  ;;  %v1453_v41 = vmul.f32 %v2881_v52, %v3458_v23  ;;  %v3737_v35 = vadd.f32 %v3153_v40, %v3512_v10  ;;  %v4073_v48 = vunpack.c.h.bf16 %v3293_v3 }
 0x14e   :  { %v2885_v5 = vpop.eup %2884  ;;  %v1615_v11 = vadd.f32 %v4071_v44, %v1423_v20  ;;  %v1424_v9 = vmul.f32 %v2883_v54, %v3479_v43  ;;  %2904 = vpow2.f32 %v2079_v30  ;;  %v1647_v61 = vadd.f32 %v4072_v63, %v1455_v55 }
 0x14f   :  { %v2887_v56 = vpop.eup %2886  ;;  %v1456_v45 = vmul.f32 %v2885_v5, %v3485_v29  ;;  %2906 = vpow2.f32 %v2052_v21  ;;  %v3744_v43 = vadd.f32 %v3153_v40, %v3517_v15  ;;  %v4074_v63 = vunpack.c.l.bf16 %v3410_v57 }
 0x150   :  { %v2889_v47 = vpop.eup %2888  ;;  %v1616_v20 = vadd.f32 %v4073_v48, %v1424_v9  ;;  %v1422_v23 = vmul.f32 %v2887_v56, %v3500_v14  ;;  %2908 = vpow2.f32 %v2084_v26  ;;  %v4075_v21 = vunpack.c.h.bf16 %v3304_v8 }
 0x151   :  { %v2891_v30 = vpop.eup %2890  ;;  %v1613_v29 = vadd.f32 %v4074_v63, %v1421_v51  ;;  %v1454_v10 = vmul.f32 %v2889_v47, %v3510_v25  ;;  %2910 = vpow2.f32 %v2050_v46  ;;  %v4076_v3 = vunpack.c.l.bf16 %v3415_v60 }
 0x152   :  { %v1648_v55 = vadd.f32 %v4075_v21, %v1456_v45  ;;  %v2893_v52 = vpop.eup %2892  ;;  %v2388_v14 = vpack.c.bf16 %v1616_v20, %v1615_v11  ;;  %v4077_v56 = vunpack.c.h.bf16 %v3410_v57  ;;  %2912 = vpow2.f32 %v2082_v33  ;;  %v3767_v57 = vld [vmem:[%s3994_s3 + $0x58] sm:$0xff]  }
 0x153   :  { %v1645_v48 = vadd.f32 %v4076_v3, %v1453_v41  ;;  %v2895_v40 = vpop.eup %2894  ;;  %v4078_v26 = vunpack.c.h.bf16 %v3415_v60  ;;  %v1427_v8 = vmul.f32 %v2891_v30, %v3525_v50  ;;  %2914 = vpow2.f32 %v2053_v17  ;;  %v3796_v30 = vld [vmem:[%s3994_s3 + $0xd8] sm:$0xff]  }
 0x154   :  { %v1614_v9 = vadd.f32 %v4077_v56, %v1422_v23  ;;  %v2468_v15 = vpack.c.bf16 %v1648_v55, %v1647_v61  ;;  %v3758_v51 = vpop.eup %2896  ;;  %2547 = vst [vmem:[%s3995_s4 + $0x38] sm:$0xff] %v2388_v14   ;;  %v1459_v46 = vmul.f32 %v2893_v52, %v3534_v7  ;;  %2916 = vpow2.f32 %v2085_v0 }
 0x155   :  { %v1646_v54 = vadd.f32 %v4078_v26, %v1454_v10  ;;  %v2088_v60 = vmul.f32 -1.442695, %v3726_v6  ;;  %v2899_v33 = vpop.eup %2898  ;;  %v1425_v17 = vmul.f32 %v2895_v40, %v3545_v58  ;;  %2918 = vpow2.f32 %v2051_v62 }
 0x156   :  { %v2383_v25 = vpack.c.bf16 %v1614_v9, %v1613_v29  ;;  %2563 = vst [vmem:[%s3995_s4 + $0xb8] sm:$0xff] %v2468_v15   ;;  %v2054_v5 = vmul.f32 -1.442695, %v3737_v35  ;;  %v2901_v7 = vpop.eup %2900  ;;  %v1428_v0 = vmul.f32 %v2899_v33, %v3566_v13  ;;  %v2321_v44 = vunpack.c.h.bf16 %v3653_v53 }
 0x157   :  { %v2463_v50 = vpack.c.bf16 %v1646_v54, %v1645_v48  ;;  %2920 = vpow2.f32 %v2083_v42  ;;  %v2086_v11 = vmul.f32 -1.442695, %v3744_v43  ;;  %v2903_v41 = vpop.eup %2902  ;;  %v4079_v58 = vunpack.c.l.bf16 %v3471_v36  ;;  %v3812_v48 = vld [vmem:[%s3994_s3 + $0xd0] sm:$0xff]  }
 0x158   :  { %2546 = vst [vmem:[%s3995_s4 + $0x30] sm:$0xff] %v2383_v25   ;;  %v1460_v61 = vmul.f32 %v2901_v7, %v3578_v39  ;;  %v2268_v45 = vunpack.c.l.bf16 %v3767_v57  ;;  %2922 = vpow2.f32 %v2056_v19  ;;  %v2905_v47 = vpop.eup %2904  ;;  %v1651_v13 = vadd.f32 %v2324_v38, %v1459_v46  ;;  %v3004_v46 = vld [vmem:[%s3993_s2] ss:$0 sm:$0xff]  ;;  %v4085_v7 = vld [vmem:[#allocation16_spill] sm:$0xff] }
 0x159   :  { %2562 = vst [vmem:[%s3995_s4 + $0xb0] sm:$0xff] %v2463_v50   ;;  %v1619_v62 = vadd.f32 %v4079_v58, %v1427_v8  ;;  %v4080_v42 = vunpack.c.h.bf16 %v3471_v36  ;;  %v1426_v23 = vmul.f32 %v2903_v41, %v3589_v28  ;;  %2924 = vpow2.f32 %v2088_v60  ;;  %v2907_v63 = vpop.eup %2906  ;;  %v3805_v36 = vld [vmem:[%s3994_s3 + $0x50] sm:$0xff]   ;;  %v4084_v60 = vld [vmem:[#allocation15_spill] sm:$0xff] }
 0x15a   :  { %v4081_v39 = vunpack.c.l.bf16 %v3644_v16  ;;  %v4082_v19 = vunpack.c.h.bf16 %v3629_v12  ;;  %v1266_v55 = vadd.f32 1.0, %v2905_v47  ;;  %2926 = vpow2.f32 %v2054_v5  ;;  %v2909_v28 = vpop.eup %2908 }
 0x15b   :  { %v1620_v20 = vadd.f32 %v4080_v42, %v1428_v0  ;;  %v4083_v10 = vunpack.c.h.bf16 %v3644_v16  ;;  %v1239_v3 = vadd.f32 1.0, %v2907_v63  ;;  %2928 = vpow2.f32 %v2086_v11  ;;  %v2911_v12 = vpop.eup %2910  ;;  %v4086_v42 = vld [vmem:[#allocation17_spill] sm:$0xff] }
 0x15c   :  { %v1617_v29 = vadd.f32 %v4081_v39, %v1425_v17  ;;  %v1652_v21 = vadd.f32 %v4082_v19, %v1460_v61  ;;  %2930 = vrcp.f32 %v1266_v55  ;;  %v1271_v56 = vadd.f32 1.0, %v2909_v28  ;;  %v2913_v40 = vpop.eup %2912 }
 0x15d   :  { %v2398_v38 = vpack.c.bf16 %v1620_v20, %v1619_v62  ;;  %v1618_v52 = vadd.f32 %v4083_v10, %v1426_v23  ;;  %v2332_v9 = vunpack.c.l.bf16 %v3796_v30  ;;  %2932 = vrcp.f32 %v1239_v3  ;;  %v2915_v54 = vpop.eup %2914 }
 0x15e   :  { %v2478_v14 = vpack.c.bf16 %v1652_v21, %v1651_v13  ;;  %v1237_v15 = vadd.f32 1.0, %v2911_v12  ;;  %v2264_v26 = vunpack.c.l.bf16 %v3805_v36  ;;  %2934 = vrcp.f32 %v1271_v56  ;;  %v2917_v50 = vpop.eup %2916  ;;  %v4088_v56 = vld [vmem:[#allocation19_spill] sm:$0xff] }
 0x15f   :  { %2549 = vst [vmem:[%s3995_s4 + $0x48] sm:$0xff] %v2398_v38   ;;  %v2393_v16 = vpack.c.bf16 %v1618_v52, %v1617_v29  ;;  %v1269_v8 = vadd.f32 1.0, %v2913_v40  ;;  %v2328_v25 = vunpack.c.l.bf16 %v3812_v48  ;;  %v3827_v33 = vadd.f32 %v3004_v46, %v4084_v60  ;;  %v2919_v11 = vpop.eup %2918  ;;  %v4087_v29 = vld [vmem:[#allocation18_spill] sm:$0xff] }
 0x160   :  { %2565 = vst [vmem:[%s3995_s4 + $0xc8] sm:$0xff] %v2478_v14   ;;  %2936 = vrcp.f32 %v1237_v15  ;;  %v1240_v17 = vadd.f32 1.0, %v2915_v54  ;;  %v2269_v5 = vunpack.c.h.bf16 %v3767_v57  ;;  %v3834_v0 = vadd.f32 %v3004_v46, %v4085_v7  ;;  %v4089_v54 = vld [vmem:[#allocation20_spill] sm:$0xff] }
 0x161   :  { %2548 = vst [vmem:[%s3995_s4 + $0x40] sm:$0xff] %v2393_v16   ;;  %2938 = vrcp.f32 %v1269_v8  ;;  %v1272_v41 = vadd.f32 1.0, %v2917_v50  ;;  %v2333_v58 = vunpack.c.h.bf16 %v3796_v30  ;;  %v2265_v62 = vunpack.c.h.bf16 %v3805_v36  ;;  %v2921_v61 = vpop.eup %2920  ;;  %v4090_v50 = vld [vmem:[#allocation21_spill] sm:$0xff] }
 0x162   :  { %2940 = vrcp.f32 %v1240_v17  ;;  %v1238_v47 = vadd.f32 1.0, %v2919_v11  ;;  %v2329_v13 = vunpack.c.h.bf16 %v3812_v48  ;;  %v3840_v20 = vadd.f32 %v3004_v46, %v4086_v42  ;;  %v2923_v23 = vpop.eup %2922  ;;  %v4091_v17 = vld [vmem:[#allocation22_spill] sm:$0xff] }
 0x163   :  { %2942 = vrcp.f32 %v1272_v41  ;;  %v1270_v63 = vadd.f32 1.0, %v2921_v61  ;;  %v2057_v39 = vmul.f32 -1.442695, %v3827_v33  ;;  %v3844_v19 = vadd.f32 %v3004_v46, %v4087_v29  ;;  %v2925_v21 = vpop.eup %2924  ;;  %v4092_v41 = vld [vmem:[#allocation23_spill] sm:$0xff] }
 0x164   :  { %2944 = vrcp.f32 %v1238_v47  ;;  %v1243_v55 = vadd.f32 1.0, %v2923_v23  ;;  %v2089_v28 = vmul.f32 -1.442695, %v3834_v0  ;;  %v3848_v38 = vadd.f32 %v3004_v46, %v3557_v34  ;;  %v2927_v10 = vpop.eup %2926 }
 0x165   :  { %2946 = vrcp.f32 %v1270_v63  ;;  %v1275_v52 = vadd.f32 1.0, %v2925_v21  ;;  %v3851_v3 = vadd.f32 %v3004_v46, %v3559_v49  ;;  %v3854_v12 = vadd.f32 %v3004_v46, %v3568_v32  ;;  %v2929_v14 = vpop.eup %2928  ;;  %v4093_v63 = vld [vmem:[#allocation24_spill] sm:$0xff] }
 0x166   :  { %v1457_v40 = vmul.f32 %v3758_v51, %v4088_v56  ;;  %v1241_v16 = vadd.f32 1.0, %v2927_v10  ;;  %v2055_v15 = vmul.f32 -1.442695, %v3840_v20  ;;  %v3860_v8 = vadd.f32 %v3004_v46, %v4089_v54  ;;  %v2931_v34 = vpop.eup %2930 }
 0x167   :  { %2948 = vrcp.f32 %v1243_v55  ;;  %v2087_v60 = vmul.f32 -1.442695, %v3844_v19  ;;  %v3864_v49 = vadd.f32 %v3004_v46, %v4090_v50  ;;  %v3867_v32 = vadd.f32 %v3004_v46, %v4091_v17  ;;  %v2933_v7 = vpop.eup %2932 }
 0x168   :  { %v1458_v11 = vmul.f32 %v2931_v34, %v3660_v24  ;;  %2950 = vrcp.f32 %v1275_v52  ;;  %v2060_v51 = vmul.f32 -1.442695, %v3848_v38  ;;  %v3872_v61 = vadd.f32 %v3004_v46, %v4092_v41  ;;  %v2935_v47 = vpop.eup %2934 }
 0x169   :  { %2952 = vrcp.f32 %v1241_v16  ;;  %v2092_v42 = vmul.f32 -1.442695, %v3851_v3  ;;  %v2058_v23 = vmul.f32 -1.442695, %v3854_v12  ;;  %v3877_v29 = vadd.f32 %v3004_v46, %v4093_v63 }
 0x16a   :  { %v2937_v21 = vpop.eup %2936  ;;  %v4094_v55 = vunpack.c.l.bf16 %v3653_v53  ;;  %v1650_v24 = vadd.f32 %v2321_v44, %v1458_v11  ;;  %2954 = vpow2.f32 %v2057_v39  ;;  %v2090_v52 = vmul.f32 -1.442695, %v3860_v8 }
 0x16b   :  { %v2939_v56 = vpop.eup %2938  ;;  %v1431_v16 = vmul.f32 %v2933_v7, %v3668_v1  ;;  %2956 = vpow2.f32 %v2089_v28  ;;  %v2061_v54 = vmul.f32 -1.442695, %v3864_v49  ;;  %v2093_v34 = vmul.f32 -1.442695, %v3867_v32 }
 0x16c   :  { %v1649_v10 = vadd.f32 %v4094_v55, %v1457_v40  ;;  %v2941_v46 = vpop.eup %2940  ;;  %v1463_v17 = vmul.f32 %v2935_v47, %v3676_v4  ;;  %2958 = vpow2.f32 %v2055_v15  ;;  %v2059_v40 = vmul.f32 -1.442695, %v3872_v61 }
 0x16d   :  { %v2943_v53 = vpop.eup %2942  ;;  %v1429_v44 = vmul.f32 %v2937_v21, %v3685_v2  ;;  %v1432_v39 = vmul.f32 %v2941_v46, %v3694_v31  ;;  %2960 = vpow2.f32 %v2087_v60  ;;  %v2091_v1 = vmul.f32 -1.442695, %v3877_v29 }
 0x16e   :  { %v2473_v50 = vpack.c.bf16 %v1650_v24, %v1649_v10  ;;  %v2945_v28 = vpop.eup %2944  ;;  %v1461_v7 = vmul.f32 %v2939_v56, %v3690_v18  ;;  %v1464_v4 = vmul.f32 %v2943_v53, %v3698_v22  ;;  %v1273_v15 = vadd.f32 1.0, %v2929_v14  ;;  %v2521_v53 = vld [vmem:[%s3994_s3 + $0x60] sm:$0xff]  }
 0x16f   :  { %2962 = vpow2.f32 %v2060_v51  ;;  %v2947_v11 = vpop.eup %2946  ;;  %v1623_v2 = vadd.f32 %v2268_v45, %v1431_v16  ;;  %v1624_v31 = vadd.f32 %v2269_v5, %v1432_v39  ;;  %v1430_v60 = vmul.f32 %v2945_v28, %v3702_v27 }
 0x170   :  { %2564 = vst [vmem:[%s3995_s4 + $0xc0] sm:$0xff] %v2473_v50   ;;  %2964 = vpow2.f32 %v2092_v42  ;;  %v1655_v41 = vadd.f32 %v2332_v9, %v1463_v17  ;;  %v1656_v18 = vadd.f32 %v2333_v58, %v1464_v4  ;;  %v1462_v22 = vmul.f32 %v2947_v11, %v3706_v37  ;;  %v2537_v11 = vld [vmem:[%s3994_s3 + $0xe0] sm:$0xff]  }
 0x171   :  { %2966 = vpow2.f32 %v2058_v23  ;;  %v2949_v14 = vpop.eup %2948  ;;  %v1621_v51 = vadd.f32 %v2264_v26, %v1429_v44  ;;  %v2408_v45 = vpack.c.bf16 %v1624_v31, %v1623_v2  ;;  %v1622_v57 = vadd.f32 %v2265_v62, %v1430_v60 }
 0x172   :  { %2968 = vpow2.f32 %v2090_v52  ;;  %v2951_v27 = vpop.eup %2950  ;;  %v1653_v5 = vadd.f32 %v2328_v25, %v1461_v7  ;;  %v2488_v9 = vpack.c.bf16 %v1656_v18, %v1655_v41  ;;  %v1654_v30 = vadd.f32 %v2329_v13, %v1462_v22 }
 0x173   :  { %2970 = vpow2.f32 %v2061_v54  ;;  %v2953_v37 = vpop.eup %2952  ;;  %2551 = vst [vmem:[%s3995_s4 + $0x58] sm:$0xff] %v2408_v45   ;;  %v2403_v26 = vpack.c.bf16 %v1622_v57, %v1621_v51  ;;  %v2522_v54 = vld [vmem:[%s3994_s3 + $0x68] sm:$0xff]   ;;  %v1467_v41 = vmul.f32 %v2951_v27, %v3726_v6  ;;  %v2272_v18 = vunpack.c.l.bf16 %v2521_v53 }
 0x174   :  { %2972 = vpow2.f32 %v2093_v34  ;;  %v2955_v58 = vpop.eup %2954  ;;  %2567 = vst [vmem:[%s3995_s4 + $0xd8] sm:$0xff] %v2488_v9   ;;  %v2483_v36 = vpack.c.bf16 %v1654_v30, %v1653_v5  ;;  %v2538_v34 = vld [vmem:[%s3994_s3 + $0xe8] sm:$0xff]   ;;  %v2277_v2 = vunpack.c.h.bf16 %v2522_v54  ;;  %v1433_v45 = vmul.f32 %v2953_v37, %v3737_v35 }
 0x175   :  { %2974 = vpow2.f32 %v2059_v40  ;;  %v2957_v25 = vpop.eup %2956  ;;  %2550 = vst [vmem:[%s3995_s4 + $0x50] sm:$0xff] %v2403_v26   ;;  %v1244_v48 = vadd.f32 1.0, %v2955_v58  ;;  %v2340_v28 = vunpack.c.l.bf16 %v2538_v34  ;;  %v2341_v22 = vunpack.c.h.bf16 %v2538_v34 }
 0x176   :  { %2976 = vpow2.f32 %v2091_v1  ;;  %v2959_v62 = vpop.eup %2958  ;;  %2566 = vst [vmem:[%s3995_s4 + $0xd0] sm:$0xff] %v2483_v36   ;;  %v1276_v13 = vadd.f32 1.0, %v2957_v25  ;;  %v2276_v1 = vunpack.c.l.bf16 %v2522_v54  ;;  %v2273_v5 = vunpack.c.h.bf16 %v2521_v53 }
 0x177   :  { %2978 = vrcp.f32 %v1273_v15  ;;  %v2961_v47 = vpop.eup %2960  ;;  %v1242_v42 = vadd.f32 1.0, %v2959_v62  ;;  %v1435_v15 = vmul.f32 %v2949_v14, %v3711_v59  ;;  %v2336_v9 = vunpack.c.l.bf16 %v2537_v11 }
 0x178   :  { %2980 = vrcp.f32 %v1244_v48  ;;  %v1274_v63 = vadd.f32 1.0, %v2961_v47  ;;  %v2337_v26 = vunpack.c.h.bf16 %v2537_v11  ;;  %v1659_v48 = vadd.f32 %v2340_v28, %v1467_v41 }
 0x179   :  { %v2963_v23 = vpop.eup %2962  ;;  %2982 = vrcp.f32 %v1276_v13  ;;  %v1627_v36 = vadd.f32 %v2276_v1, %v1435_v15 }
 0x17a   :  { %v2965_v21 = vpop.eup %2964  ;;  %2984 = vrcp.f32 %v1242_v42  ;;  %v1247_v55 = vadd.f32 1.0, %v2963_v23 }
 0x17b   :  { %v2967_v10 = vpop.eup %2966  ;;  %2986 = vrcp.f32 %v1274_v63  ;;  %v1279_v24 = vadd.f32 1.0, %v2965_v21 }
 0x17c   :  { %v2969_v52 = vpop.eup %2968  ;;  %2988 = vrcp.f32 %v1247_v55  ;;  %v1245_v56 = vadd.f32 1.0, %v2967_v10 }
 0x17d   :  { %v2971_v16 = vpop.eup %2970  ;;  %2990 = vrcp.f32 %v1279_v24  ;;  %v1277_v46 = vadd.f32 1.0, %v2969_v52  ;;  %v2539_v52 = vld [vmem:[%s3994_s3 + $0xf0] sm:$0xff]  }
 0x17e   :  { %v2973_v50 = vpop.eup %2972  ;;  %2992 = vrcp.f32 %v1245_v56  ;;  %v1248_v17 = vadd.f32 1.0, %v2971_v16  ;;  %v2344_v1 = vunpack.c.l.bf16 %v2539_v52 }
 0x17f   :  { %v2975_v40 = vpop.eup %2974  ;;  %2994 = vrcp.f32 %v1277_v46  ;;  %v1280_v44 = vadd.f32 1.0, %v2973_v50 }
 0x180   :  { %v2977_v39 = vpop.eup %2976  ;;  %2996 = vrcp.f32 %v1248_v17  ;;  %v1246_v7 = vadd.f32 1.0, %v2975_v40 }
 0x181   :  { %v2979_v4 = vpop.eup %2978  ;;  %2998 = vrcp.f32 %v1280_v44  ;;  %v1278_v31 = vadd.f32 1.0, %v2977_v39 }
 0x182   :  { %v2981_v60 = vpop.eup %2980  ;;  %3000 = vrcp.f32 %v1246_v7  ;;  %v1465_v14 = vmul.f32 %v2979_v4, %v3744_v43  ;;  %v1625_v43 = vadd.f32 %v2272_v18, %v1433_v45  ;;  %v2345_v7 = vunpack.c.h.bf16 %v2539_v52 }
 0x183   :  { %v2983_v51 = vpop.eup %2982  ;;  %v1436_v57 = vmul.f32 %v2981_v60, %v3827_v33  ;;  %3002 = vrcp.f32 %v1278_v31  ;;  %v2524_v33 = vld [vmem:[%s3994_s3 + $0x78] sm:$0xff]  }
 0x184   :  { %v2985_v59 = vpop.eup %2984  ;;  %v1468_v30 = vmul.f32 %v2983_v51, %v3834_v0  ;;  %v2540_v0 = vld [vmem:[%s3994_s3 + $0xf8] sm:$0xff]   ;;  %v1657_v23 = vadd.f32 %v2336_v9, %v1465_v14  ;;  %v2284_v24 = vunpack.c.l.bf16 %v2524_v33  ;;  %v2285_v56 = vunpack.c.h.bf16 %v2524_v33 }
 0x185   :  { %v2987_v58 = vpop.eup %2986  ;;  %v1628_v6 = vadd.f32 %v2277_v2, %v1436_v57  ;;  %v1434_v27 = vmul.f32 %v2985_v59, %v3840_v20  ;;  %v2348_v46 = vunpack.c.l.bf16 %v2540_v0  ;;  %v2349_v50 = vunpack.c.h.bf16 %v2540_v0 }
 0x186   :  { %v2989_v25 = vpop.eup %2988  ;;  %v1660_v62 = vadd.f32 %v2341_v22, %v1468_v30  ;;  %v1466_v35 = vmul.f32 %v2987_v58, %v3844_v19  ;;  %v2523_v19 = vld [vmem:[%s3994_s3 + $0x70] sm:$0xff]  }
 0x187   :  { %v2991_v37 = vpop.eup %2990  ;;  %v2418_v13 = vpack.c.bf16 %v1628_v6, %v1627_v36  ;;  %v1626_v47 = vadd.f32 %v2273_v5, %v1434_v27  ;;  %v1439_v10 = vmul.f32 %v2989_v25, %v3848_v38  ;;  %v2280_v40 = vunpack.c.l.bf16 %v2523_v19 }
 0x188   :  { %v2993_v42 = vpop.eup %2992  ;;  %v2498_v20 = vpack.c.bf16 %v1660_v62, %v1659_v48  ;;  %v1658_v63 = vadd.f32 %v2337_v26, %v1466_v35  ;;  %v1471_v34 = vmul.f32 %v2991_v37, %v3851_v3  ;;  %v2281_v44 = vunpack.c.h.bf16 %v2523_v19 }
 0x189   :  { %v2995_v21 = vpop.eup %2994  ;;  %2553 = vst [vmem:[%s3995_s4 + $0x68] sm:$0xff] %v2418_v13   ;;  %v2413_v55 = vpack.c.bf16 %v1626_v47, %v1625_v43  ;;  %v1437_v38 = vmul.f32 %v2993_v42, %v3854_v12  ;;  %v1631_v15 = vadd.f32 %v2284_v24, %v1439_v10 }
 0x18a   :  { %v2997_v16 = vpop.eup %2996  ;;  %2569 = vst [vmem:[%s3995_s4 + $0xe8] sm:$0xff] %v2498_v20   ;;  %v2493_v54 = vpack.c.bf16 %v1658_v63, %v1657_v23  ;;  %v1469_v3 = vmul.f32 %v2995_v21, %v3860_v8  ;;  %v1663_v2 = vadd.f32 %v2348_v46, %v1471_v34 }
 0x18b   :  { %v2999_v17 = vpop.eup %2998  ;;  %2552 = vst [vmem:[%s3995_s4 + $0x60] sm:$0xff] %v2413_v55   ;;  %v1440_v53 = vmul.f32 %v2997_v16, %v3864_v49  ;;  %v1629_v60 = vadd.f32 %v2280_v40, %v1437_v38 }
 0x18c   :  { %v3001_v39 = vpop.eup %3000  ;;  %2568 = vst [vmem:[%s3995_s4 + $0xe0] sm:$0xff] %v2493_v54   ;;  %v1472_v28 = vmul.f32 %v2999_v17, %v3867_v32  ;;  %v1661_v22 = vadd.f32 %v2344_v1, %v1469_v3 }
 0x18d   :  { %v3003_v4 = vpop.eup %3002  ;;  %v1632_v11 = vadd.f32 %v2285_v56, %v1440_v53  ;;  %v1438_v12 = vmul.f32 %v3001_v39, %v3872_v61 }
 0x18e   :  { %v1664_v31 = vadd.f32 %v2349_v50, %v1472_v28  ;;  %v1470_v49 = vmul.f32 %v3003_v4, %v3877_v29 }
 0x18f   :  { %v2428_v41 = vpack.c.bf16 %v1632_v11, %v1631_v15  ;;  %v1630_v18 = vadd.f32 %v2281_v44, %v1438_v12 }
 0x190   :  { %v2508_v51 = vpack.c.bf16 %v1664_v31, %v1663_v2  ;;  %v1662_v45 = vadd.f32 %v2345_v7, %v1470_v49 }
 0x191   :  { %2555 = vst [vmem:[%s3995_s4 + $0x78] sm:$0xff] %v2428_v41   ;;  %v2423_v8 = vpack.c.bf16 %v1630_v18, %v1629_v60 }
 0x192   :  { %2571 = vst [vmem:[%s3995_s4 + $0xf8] sm:$0xff] %v2508_v51   ;;  %v2503_v32 = vpack.c.bf16 %v1662_v45, %v1661_v22 }
 0x193   :  { %2554 = vst [vmem:[%s3995_s4 + $0x70] sm:$0xff] %v2423_v8  }
 0x194   :  { %2570 = vst [vmem:[%s3995_s4 + $0xf0] sm:$0xff] %v2503_v32  }

// kernel: fused_mbconv_stack_forward.6
= control target key start
LH: loop header
LB: loop body
LE: loop exit
PB: predicated region body
PF: predicated region fallthrough
CT: control target
= control target key end

     0   :  { %s3345_s1 = inlined_call_operand.vmem [shape: bf16[128,128], index: 1, kind: input, shape index: {}]   ;;  %s3346_s0 = inlined_call_operand.vmem [shape: bf16[512,128], index: 0, kind: input, shape index: {}]   ;;  %s3347_s2 = inlined_call_operand.vmem [shape: f32[1,128], index: 2, kind: input, shape index: {}]   ;;  %s3348_s3 = inlined_call_operand.vmem [shape: bf16[512,128], index: 3, kind: output, shape index: {}]  }
   0x1   :  { %v2354_v0 = vld [vmem:[%s3345_s1] sm:$0xff]   ;;  %v2355_v1 = vld [vmem:[%s3345_s1 + $0x8] sm:$0xff]   ;;  %v2356_v2 = vld [vmem:[%s3345_s1 + $0x10] sm:$0xff]  }
   0x2   :  { %2258 = vmatprep.subr.bf16.mxu0 %v2354_v0  ;;  %2338 = vmatprep.subr.bf16.mxu1 %v2354_v0  ;;  %v2357_v3 = vld [vmem:[%s3345_s1 + $0x18] sm:$0xff]   ;;  %v2362_v4 = vld [vmem:[%s3346_s0] sm:$0xff]   ;;  %v2359_v7 = vld [vmem:[%s3345_s1 + $0x28] sm:$0xff]  }
   0x3   :  { %2259 = vmatpush3.bf16.msra.mxu0 %v2354_v0  ;;  %2346 = vmatpush3.bf16.msra.mxu1 %v2354_v0  ;;  %v2363_v5 = vld [vmem:[%s3346_s0 + $0x80] sm:$0xff]   ;;  %v2360_v8 = vld [vmem:[%s3345_s1 + $0x30] sm:$0xff]   ;;  %v2361_v9 = vld [vmem:[%s3345_s1 + $0x38] sm:$0xff]  }
   0x4   :  { %2260 = vmatprep.subr.bf16.mxu0 %v2355_v1  ;;  %2339 = vmatprep.subr.bf16.mxu1 %v2355_v1  ;;  %v2358_v6 = vld [vmem:[%s3345_s1 + $0x20] sm:$0xff]   ;;  %v2364_v10 = vld [vmem:[%s3346_s0 + $0x8] sm:$0xff]   ;;  %v2366_v12 = vld [vmem:[%s3346_s0 + $0x10] sm:$0xff]  }
   0x5   :  { %2274 = vmatprep.mubr.bf16.mxu0 %v2362_v4  ;;  %2306 = vmatprep.mubr.bf16.mxu1 %v2363_v5  ;;  %v2365_v11 = vld [vmem:[%s3346_s0 + $0x88] sm:$0xff]   ;;  %v2367_v13 = vld [vmem:[%s3346_s0 + $0x90] sm:$0xff]   ;;  %v2368_v14 = vld [vmem:[%s3346_s0 + $0x18] sm:$0xff]  }
   0x6   :  { %v2369_v15 = vld [vmem:[%s3346_s0 + $0x98] sm:$0xff]   ;;  %v2370_v16 = vld [vmem:[%s3346_s0 + $0x20] sm:$0xff]   ;;  %v2372_v18 = vld [vmem:[%s3346_s0 + $0x28] sm:$0xff]  }
   0x7   :  { %2261 = vmatpush3.bf16.msra.mxu0 %v2355_v1  ;;  %2347 = vmatpush3.bf16.msra.mxu1 %v2355_v1  ;;  %v2371_v17 = vld [vmem:[%s3346_s0 + $0xa0] sm:$0xff]   ;;  %v2373_v19 = vld [vmem:[%s3346_s0 + $0xa8] sm:$0xff]   ;;  %v2374_v20 = vld [vmem:[%s3346_s0 + $0x30] sm:$0xff]  }
   0x8   :  { %2262 = vmatprep.subr.bf16.mxu0 %v2356_v2  ;;  %2340 = vmatprep.subr.bf16.mxu1 %v2356_v2  ;;  %v2375_v21 = vld [vmem:[%s3346_s0 + $0xb0] sm:$0xff]   ;;  %v2376_v22 = vld [vmem:[%s3346_s0 + $0x38] sm:$0xff]   ;;  %v2378_v24 = vld [vmem:[%s3346_s0 + $0x40] sm:$0xff]  }
   0x9   :  { %v2377_v23 = vld [vmem:[%s3346_s0 + $0xb8] sm:$0xff]   ;;  %v2379_v25 = vld [vmem:[%s3346_s0 + $0xc0] sm:$0xff]   ;;  %v2380_v26 = vld [vmem:[%s3346_s0 + $0x48] sm:$0xff]  }
   0xa   :  { %v2381_v27 = vld [vmem:[%s3346_s0 + $0xc8] sm:$0xff]   ;;  %v2382_v28 = vld [vmem:[%s3346_s0 + $0x50] sm:$0xff]   ;;  %v2384_v30 = vld [vmem:[%s3346_s0 + $0x58] sm:$0xff]  }
   0xb   :  { %2263 = vmatpush3.bf16.msra.mxu0 %v2356_v2  ;;  %2348 = vmatpush3.bf16.msra.mxu1 %v2356_v2  ;;  %v2383_v29 = vld [vmem:[%s3346_s0 + $0xd0] sm:$0xff]   ;;  %v2385_v31 = vld [vmem:[%s3346_s0 + $0xd8] sm:$0xff]   ;;  %v2386_v32 = vld [vmem:[%s3346_s0 + $0x60] sm:$0xff]  }
   0xc   :  { %2264 = vmatprep.subr.bf16.mxu0 %v2357_v3  ;;  %2341 = vmatprep.subr.bf16.mxu1 %v2357_v3  ;;  %v2387_v33 = vld [vmem:[%s3346_s0 + $0xe0] sm:$0xff]   ;;  %v2388_v34 = vld [vmem:[%s3346_s0 + $0x68] sm:$0xff]   ;;  %v2390_v36 = vld [vmem:[%s3346_s0 + $0x70] sm:$0xff]  }
   0xd   :  { %v2389_v35 = vld [vmem:[%s3346_s0 + $0xe8] sm:$0xff]   ;;  %v2391_v37 = vld [vmem:[%s3346_s0 + $0xf0] sm:$0xff]   ;;  %v2392_v38 = vld [vmem:[%s3346_s0 + $0x78] sm:$0xff]  }
   0xe   :  { %v2393_v39 = vld [vmem:[%s3346_s0 + $0xf8] sm:$0xff]   ;;  %v2794_v40 = vld [vmem:[%s3347_s2] ss:$0 sm:$0xff] }
   0xf   :  { %2265 = vmatpush3.bf16.msra.mxu0 %v2357_v3  ;;  %2349 = vmatpush3.bf16.msra.mxu1 %v2357_v3 }
  0x10   :  { %2266 = vmatprep.subr.bf16.mxu0 %v2358_v6  ;;  %2342 = vmatprep.subr.bf16.mxu1 %v2358_v6 }
  0x13   :  { %2267 = vmatpush3.bf16.msra.mxu0 %v2358_v6  ;;  %2350 = vmatpush3.bf16.msra.mxu1 %v2358_v6 }
  0x14   :  { %2268 = vmatprep.subr.bf16.mxu0 %v2359_v7  ;;  %2343 = vmatprep.subr.bf16.mxu1 %v2359_v7 }
  0x17   :  { %2269 = vmatpush3.bf16.msra.mxu0 %v2359_v7  ;;  %2351 = vmatpush3.bf16.msra.mxu1 %v2359_v7 }
  0x18   :  { %2270 = vmatprep.subr.bf16.mxu0 %v2360_v8  ;;  %2344 = vmatprep.subr.bf16.mxu1 %v2360_v8 }
  0x1b   :  { %2271 = vmatpush3.bf16.msra.mxu0 %v2360_v8  ;;  %2352 = vmatpush3.bf16.msra.mxu1 %v2360_v8 }
  0x1c   :  { %2272 = vmatprep.subr.bf16.mxu0 %v2361_v9  ;;  %2345 = vmatprep.subr.bf16.mxu1 %v2361_v9 }
  0x1f   :  { %2273 = vmatpush3.bf16.msra.mxu0 %v2361_v9  ;;  %2353 = vmatpush3.bf16.msra.mxu1 %v2361_v9 }
  0x22   :  { %2275 = vmatmul.mubr.bf16.vlgmr.msra.gmra.mrb[0].mxu0 %v2364_v10  ;;  %2307 = vmatmul.mubr.bf16.vlgmr.msra.gmra.mrb[0].mxu1 %v2365_v11 }
  0x23   :  { %2278 = vmatprep.mubr.bf16.mxu0 %v2366_v12  ;;  %2310 = vmatprep.mubr.bf16.mxu1 %v2367_v13 }
  0x2a   :  { %2279 = vmatmul.mubr.bf16.gmra.mrb[4].mxu0 %v2368_v14  ;;  %2311 = vmatmul.mubr.bf16.gmra.mrb[4].mxu1 %v2369_v15 }
  0x2b   :  { %2282 = vmatprep.mubr.bf16.mxu0 %v2370_v16  ;;  %2314 = vmatprep.mubr.bf16.mxu1 %v2371_v17 }
  0x32   :  { %2283 = vmatmul.mubr.bf16.gmra.mrb[8].mxu0 %v2372_v18  ;;  %2315 = vmatmul.mubr.bf16.gmra.mrb[8].mxu1 %v2373_v19 }
  0x33   :  { %2286 = vmatprep.mubr.bf16.mxu0 %v2374_v20  ;;  %2318 = vmatprep.mubr.bf16.mxu1 %v2375_v21 }
  0x3a   :  { %2287 = vmatmul.mubr.bf16.gmra.mrb[12].mxu0 %v2376_v22  ;;  %2319 = vmatmul.mubr.bf16.gmra.mrb[12].mxu1 %v2377_v23 }
  0x3b   :  { %2290 = vmatprep.mubr.bf16.mxu0 %v2378_v24  ;;  %2322 = vmatprep.mubr.bf16.mxu1 %v2379_v25 }
  0x42   :  { %2291 = vmatmul.mubr.bf16.gmra.mrb[16].mxu0 %v2380_v26  ;;  %2323 = vmatmul.mubr.bf16.gmra.mrb[16].mxu1 %v2381_v27 }
  0x43   :  { %2294 = vmatprep.mubr.bf16.mxu0 %v2382_v28  ;;  %2326 = vmatprep.mubr.bf16.mxu1 %v2383_v29 }
  0x4a   :  { %2295 = vmatmul.mubr.bf16.gmra.mrb[20].mxu0 %v2384_v30  ;;  %2327 = vmatmul.mubr.bf16.gmra.mrb[20].mxu1 %v2385_v31 }
  0x4b   :  { %2298 = vmatprep.mubr.bf16.mxu0 %v2386_v32  ;;  %2330 = vmatprep.mubr.bf16.mxu1 %v2387_v33 }
  0x52   :  { %2299 = vmatmul.mubr.bf16.gmra.mrb[24].mxu0 %v2388_v34  ;;  %2331 = vmatmul.mubr.bf16.gmra.mrb[24].mxu1 %v2389_v35 }
  0x53   :  { %2302 = vmatprep.mubr.bf16.mxu0 %v2390_v36  ;;  %2334 = vmatprep.mubr.bf16.mxu1 %v2391_v37 }
  0x5a   :  { %2303 = vmatmul.mubr.bf16.gmra.mrb[28].mxu0 %v2392_v38  ;;  %2335 = vmatmul.mubr.bf16.gmra.mrb[28].mxu1 %v2393_v39 }
  0xf5   :  { %v2276_v41 = vpop.f32.mrb[0].mxu0  ;;  %v2308_v42 = vpop.f32.mrb[0].mxu1 }
  0xf6   :  { %v2797_v43 = vadd.f32 %v2276_v41, %v2794_v40  ;;  %v2800_v44 = vadd.f32 %v2308_v42, %v2794_v40  ;;  %v501_v45 = vpop.f32.mrb[1].mxu0  ;;  %v629_v46 = vpop.f32.mrb[1].mxu1 }
  0xf7   :  { %v2803_v47 = vadd.f32 %v2794_v40, %v501_v45  ;;  %v2806_v48 = vadd.f32 %v2794_v40, %v629_v46  ;;  %v2277_v49 = vpop.f32.mrb[2].mxu0  ;;  %v2309_v50 = vpop.f32.mrb[2].mxu1 }
  0xf8   :  { %v1837_v51 = vmul.f32 -1.442695, %v2797_v43  ;;  %v1869_v52 = vmul.f32 -1.442695, %v2800_v44  ;;  %v2811_v53 = vadd.f32 %v2277_v49, %v2794_v40  ;;  %v2814_v54 = vadd.f32 %v2309_v50, %v2794_v40  ;;  %v504_v55 = vpop.f32.mrb[3].mxu0  ;;  %v632_v56 = vpop.f32.mrb[3].mxu1 }
  0xf9   :  { %v1835_v57 = vmul.f32 -1.442695, %v2803_v47  ;;  %v1867_v58 = vmul.f32 -1.442695, %v2806_v48  ;;  %v2819_v59 = vadd.f32 %v2794_v40, %v504_v55  ;;  %v2822_v60 = vadd.f32 %v2794_v40, %v632_v56 }
  0xfa   :  { %2394 = vpow2.f32 %v1837_v51  ;;  %v1838_v61 = vmul.f32 -1.442695, %v2811_v53  ;;  %v1870_v62 = vmul.f32 -1.442695, %v2814_v54 }
  0xfb   :  { %2396 = vpow2.f32 %v1869_v52  ;;  %v1836_v63 = vmul.f32 -1.442695, %v2819_v59  ;;  %v1868_v0 = vmul.f32 -1.442695, %v2822_v60 }
  0xfc   :  { %2398 = vpow2.f32 %v1835_v57 }
  0xfd   :  { %2400 = vpow2.f32 %v1867_v58  ;;  %v2280_v1 = vpop.f32.mrb[4].mxu0  ;;  %v2312_v2 = vpop.f32.mrb[4].mxu1 }
  0xfe   :  { %2402 = vpow2.f32 %v1838_v61  ;;  %v2829_v3 = vadd.f32 %v2280_v1, %v2794_v40  ;;  %v2832_v4 = vadd.f32 %v2312_v2, %v2794_v40  ;;  %v517_v5 = vpop.f32.mrb[5].mxu0  ;;  %v645_v6 = vpop.f32.mrb[5].mxu1 }
  0xff   :  { %2404 = vpow2.f32 %v1870_v62  ;;  %v2835_v7 = vadd.f32 %v2794_v40, %v517_v5  ;;  %v2838_v8 = vadd.f32 %v2794_v40, %v645_v6  ;;  %v2281_v9 = vpop.f32.mrb[6].mxu0  ;;  %v2313_v10 = vpop.f32.mrb[6].mxu1 }
 0x100   :  { %2406 = vpow2.f32 %v1836_v63  ;;  %v1841_v11 = vmul.f32 -1.442695, %v2829_v3  ;;  %v1873_v12 = vmul.f32 -1.442695, %v2832_v4  ;;  %v2843_v13 = vadd.f32 %v2281_v9, %v2794_v40  ;;  %v520_v14 = vpop.f32.mrb[7].mxu0  ;;  %v648_v15 = vpop.f32.mrb[7].mxu1 }
 0x101   :  { %2408 = vpow2.f32 %v1868_v0  ;;  %v1839_v16 = vmul.f32 -1.442695, %v2835_v7  ;;  %v1871_v17 = vmul.f32 -1.442695, %v2838_v8  ;;  %v2849_v37 = vadd.f32 %v2313_v10, %v2794_v40 }
 0x102   :  { %2410 = vpow2.f32 %v1841_v11  ;;  %v1842_v18 = vmul.f32 -1.442695, %v2843_v13  ;;  %v2852_v42 = vadd.f32 %v2794_v40, %v520_v14  ;;  %v2856_v56 = vadd.f32 %v2794_v40, %v648_v15 }
 0x103   :  { %2412 = vpow2.f32 %v1873_v12  ;;  %v1874_v55 = vmul.f32 -1.442695, %v2849_v37 }
 0x104   :  { %v2395_v19 = vpop.eup %2394  ;;  %2414 = vpow2.f32 %v1839_v16  ;;  %v1840_v62 = vmul.f32 -1.442695, %v2852_v42 }
 0x105   :  { %v2397_v20 = vpop.eup %2396  ;;  %v1216_v21 = vadd.f32 1.0, %v2395_v19  ;;  %2416 = vpow2.f32 %v1871_v17  ;;  %v2284_v22 = vpop.f32.mrb[8].mxu0 }
 0x106   :  { %v2316_v23 = vpop.f32.mrb[8].mxu1  ;;  %v2399_v24 = vpop.eup %2398  ;;  %v1248_v25 = vadd.f32 1.0, %v2397_v20  ;;  %2418 = vpow2.f32 %v1842_v18  ;;  %v2860_v63 = vadd.f32 %v2284_v22, %v2794_v40 }
 0x107   :  { %v533_v26 = vpop.f32.mrb[9].mxu0  ;;  %v661_v27 = vpop.f32.mrb[9].mxu1  ;;  %2420 = vrcp.f32 %v1216_v21  ;;  %v1214_v29 = vadd.f32 1.0, %v2399_v24  ;;  %v2865_v6 = vadd.f32 %v2316_v23, %v2794_v40 }
 0x108   :  { %v2401_v28 = vpop.eup %2400  ;;  %v2285_v30 = vpop.f32.mrb[10].mxu0  ;;  %2422 = vrcp.f32 %v1248_v25  ;;  %v2868_v9 = vadd.f32 %v2794_v40, %v533_v26  ;;  %v2875_v15 = vadd.f32 %v2794_v40, %v661_v27  ;;  %v1872_v25 = vmul.f32 -1.442695, %v2856_v56 }
 0x109   :  { %v2317_v31 = vpop.f32.mrb[10].mxu1  ;;  %v2403_v32 = vpop.eup %2402  ;;  %v1246_v33 = vadd.f32 1.0, %v2401_v28  ;;  %2424 = vrcp.f32 %v1214_v29  ;;  %v2878_v16 = vadd.f32 %v2285_v30, %v2794_v40  ;;  %v1845_v27 = vmul.f32 -1.442695, %v2860_v63 }
 0x10a   :  { %v536_v34 = vpop.f32.mrb[11].mxu0  ;;  %v2405_v35 = vpop.eup %2404  ;;  %v1217_v36 = vadd.f32 1.0, %v2403_v32  ;;  %v2885_v21 = vadd.f32 %v2317_v31, %v2794_v40  ;;  %v1877_v28 = vmul.f32 -1.442695, %v2865_v6  ;;  %v1843_v30 = vmul.f32 -1.442695, %v2868_v9 }
 0x10b   :  { %v664_v38 = vpop.f32.mrb[11].mxu1  ;;  %v2407_v39 = vpop.eup %2406  ;;  %2426 = vrcp.f32 %v1246_v33  ;;  %v1249_v41 = vadd.f32 1.0, %v2405_v35  ;;  %v2888_v22 = vadd.f32 %v2794_v40, %v536_v34  ;;  %v1875_v31 = vmul.f32 -1.442695, %v2875_v15 }
 0x10c   :  { %v2409_v45 = vpop.eup %2408  ;;  %2428 = vrcp.f32 %v1217_v36  ;;  %v1215_v46 = vadd.f32 1.0, %v2407_v39  ;;  %v1846_v32 = vmul.f32 -1.442695, %v2878_v16  ;;  %v1878_v34 = vmul.f32 -1.442695, %v2885_v21 }
 0x10d   :  { %v2411_v49 = vpop.eup %2410  ;;  %2430 = vrcp.f32 %v1249_v41  ;;  %v1247_v50 = vadd.f32 1.0, %v2409_v45  ;;  %v2288_v57 = vpop.f32.mrb[12].mxu0  ;;  %v1844_v35 = vmul.f32 -1.442695, %v2888_v22  ;;  %v2901_v36 = vadd.f32 %v2794_v40, %v664_v38 }
 0x10e   :  { %v2413_v51 = vpop.eup %2412  ;;  %2432 = vrcp.f32 %v1215_v46  ;;  %v1220_v52 = vadd.f32 1.0, %v2411_v49  ;;  %v2320_v0 = vpop.f32.mrb[12].mxu1 }
 0x10f   :  { %v2415_v58 = vpop.eup %2414  ;;  %2434 = vrcp.f32 %v1247_v50  ;;  %v1252_v61 = vadd.f32 1.0, %v2413_v51  ;;  %v2862_v1 = vpop.f32.mrb[13].mxu0  ;;  %v2910_v50 = vadd.f32 %v2288_v57, %v2794_v40 }
 0x110   :  { %v2417_v2 = vpop.eup %2416  ;;  %2436 = vrcp.f32 %v1220_v52  ;;  %v1218_v5 = vadd.f32 1.0, %v2415_v58  ;;  %v2870_v10 = vpop.f32.mrb[13].mxu1 }
 0x111   :  { %v2872_v11 = vpop.f32.mrb[14].mxu0  ;;  %v2419_v12 = vpop.eup %2418  ;;  %2438 = vrcp.f32 %v1252_v61  ;;  %v1250_v14 = vadd.f32 1.0, %v2417_v2  ;;  %v2919_v61 = vadd.f32 %v2320_v0, %v2794_v40 }
 0x112   :  { %v2880_v17 = vpop.f32.mrb[14].mxu1  ;;  %v2882_v18 = vpop.f32.mrb[15].mxu0  ;;  %2440 = vrcp.f32 %v1218_v5  ;;  %v1221_v20 = vadd.f32 1.0, %v2419_v12 }
 0x113   :  { %v2421_v19 = vpop.eup %2420  ;;  %v2890_v23 = vpop.f32.mrb[15].mxu1  ;;  %2442 = vrcp.f32 %v1250_v14 }
 0x114   :  { %v2423_v24 = vpop.eup %2422  ;;  %2444 = vrcp.f32 %v1221_v20  ;;  %v1408_v46 = vmul.f32 %v2421_v19, %v2797_v43 }
 0x115   :  { %v2425_v26 = vpop.eup %2424  ;;  %2446 = vpow2.f32 %v1874_v55  ;;  %v2903_v39 = vpop.f32.mrb[16].mxu0  ;;  %v1440_v38 = vmul.f32 %v2423_v24, %v2800_v44 }
 0x116   :  { %v2427_v29 = vpop.eup %2426  ;;  %2448 = vpow2.f32 %v1840_v62  ;;  %v2905_v41 = vpop.f32.mrb[16].mxu1  ;;  %v1406_v57 = vmul.f32 %v2425_v26, %v2803_v47  ;;  %v1881_v26 = vmul.f32 -1.442695, %v2919_v61 }
 0x117   :  { %v2429_v33 = vpop.eup %2428  ;;  %2450 = vpow2.f32 %v1872_v25  ;;  %v2912_v51 = vpop.f32.mrb[17].mxu0  ;;  %v1438_v14 = vmul.f32 %v2427_v29, %v2806_v48 }
 0x118   :  { %v2431_v45 = vpop.eup %2430  ;;  %v1409_v49 = vmul.f32 %v2429_v33, %v2811_v53  ;;  %v2914_v52 = vpop.f32.mrb[17].mxu1  ;;  %2452 = vpow2.f32 %v1845_v27 }
 0x119   :  { %v2433_v55 = vpop.eup %2432  ;;  %v1441_v58 = vmul.f32 %v2431_v45, %v2814_v54  ;;  %v2921_v43 = vpop.f32.mrb[18].mxu0  ;;  %2454 = vpow2.f32 %v1877_v28 }
 0x11a   :  { %v2923_v53 = vpop.f32.mrb[18].mxu1  ;;  %v2435_v62 = vpop.eup %2434  ;;  %v2035_v2 = vpack.c.bf16 %v1409_v49, %v1408_v46  ;;  %v1407_v5 = vmul.f32 %v2433_v55, %v2819_v59  ;;  %2456 = vpow2.f32 %v1843_v30  ;;  %v1876_v59 = vmul.f32 -1.442695, %v2901_v36 }
 0x11b   :  { %v2927_v12 = vpop.f32.mrb[19].mxu0  ;;  %v2929_v44 = vpop.f32.mrb[19].mxu1  ;;  %v2115_v0 = vpack.c.bf16 %v1441_v58, %v1440_v38  ;;  %v1439_v19 = vmul.f32 %v2435_v62, %v2822_v60  ;;  %2458 = vpow2.f32 %v1875_v31  ;;  %v1849_v60 = vmul.f32 -1.442695, %v2910_v50 }
 0x11c   :  { %v2437_v54 = vpop.eup %2436  ;;  %2187 = vst [vmem:[%s3348_s3 + $0x8] sm:$0xff] %v2035_v2   ;;  %v2030_v47 = vpack.c.bf16 %v1407_v5, %v1406_v57  ;;  %2460 = vpow2.f32 %v1846_v32 }
 0x11d   :  { %v2933_v20 = vpop.eup %2438  ;;  %2203 = vst [vmem:[%s3348_s3 + $0x88] sm:$0xff] %v2115_v0   ;;  %v2110_v48 = vpack.c.bf16 %v1439_v19, %v1438_v14  ;;  %2462 = vpow2.f32 %v1878_v34  ;;  %v2954_v28 = vpop.f32.mrb[20].mxu0  ;;  %v1412_v31 = vmul.f32 %v2437_v54, %v2829_v3  ;;  %v2977_v54 = vadd.f32 %v2794_v40, %v2862_v1 }
 0x11e   :  { %v2939_v24 = vpop.eup %2440  ;;  %2031 = vst [vmem:[%s3348_s3] sm:$0xff] %v2030_v47   ;;  %2464 = vpow2.f32 %v1844_v35  ;;  %v2956_v29 = vpop.f32.mrb[20].mxu1  ;;  %v2981_v19 = vadd.f32 %v2794_v40, %v2870_v10  ;;  %v2989_v1 = vadd.f32 %v2880_v17, %v2794_v40 }
 0x11f   :  { %v2945_v25 = vpop.eup %2442  ;;  %2202 = vst [vmem:[%s3348_s3 + $0x80] sm:$0xff] %v2110_v48   ;;  %2466 = vpow2.f32 %v1876_v59  ;;  %v2960_v33 = vpop.f32.mrb[21].mxu0  ;;  %v2985_v48 = vadd.f32 %v2872_v11, %v2794_v40  ;;  %v2998_v11 = vadd.f32 %v2794_v40, %v2882_v18 }
 0x120   :  { %v2445_v27 = vpop.eup %2444  ;;  %v2962_v34 = vpop.f32.mrb[21].mxu1  ;;  %2468 = vpow2.f32 %v1849_v60 }
 0x121   :  { %v2447_v30 = vpop.eup %2446  ;;  %v1413_v32 = vmul.f32 %v2445_v27, %v2843_v13  ;;  %v2964_v49 = vpop.f32.mrb[22].mxu0  ;;  %2470 = vpow2.f32 %v1881_v26 }
 0x122   :  { %v2449_v45 = vpop.eup %2448  ;;  %v1253_v46 = vadd.f32 1.0, %v2447_v30  ;;  %v2966_v35 = vpop.f32.mrb[22].mxu1 }
 0x123   :  { %v2451_v55 = vpop.eup %2450  ;;  %v2045_v38 = vpack.c.bf16 %v1413_v32, %v1412_v31  ;;  %v1219_v58 = vadd.f32 1.0, %v2449_v45  ;;  %v2968_v62 = vpop.f32.mrb[23].mxu0  ;;  %v1847_v32 = vmul.f32 -1.442695, %v2977_v54 }
 0x124   :  { %v2970_v3 = vpop.f32.mrb[23].mxu1  ;;  %v2453_v13 = vpop.eup %2452  ;;  %2472 = vrcp.f32 %v1253_v46  ;;  %v1251_v57 = vadd.f32 1.0, %v2451_v55 }
 0x125   :  { %v2455_v2 = vpop.eup %2454  ;;  %2189 = vst [vmem:[%s3348_s3 + $0x18] sm:$0xff] %v2045_v38   ;;  %2474 = vrcp.f32 %v1219_v58  ;;  %v1224_v5 = vadd.f32 1.0, %v2453_v13  ;;  %v2991_v27 = vpop.f32.mrb[24].mxu0  ;;  %v1879_v38 = vmul.f32 -1.442695, %v2981_v19 }
 0x126   :  { %v2457_v14 = vpop.eup %2456  ;;  %2476 = vrcp.f32 %v1251_v57  ;;  %v1256_v0 = vadd.f32 1.0, %v2455_v2  ;;  %v2993_v30 = vpop.f32.mrb[24].mxu1 }
 0x127   :  { %v2459_v47 = vpop.eup %2458  ;;  %2478 = vrcp.f32 %v1224_v5  ;;  %v1222_v59 = vadd.f32 1.0, %v2457_v14  ;;  %v3000_v45 = vpop.f32.mrb[25].mxu0  ;;  %v1850_v5 = vmul.f32 -1.442695, %v2985_v48 }
 0x128   :  { %v2461_v60 = vpop.eup %2460  ;;  %2480 = vrcp.f32 %v1256_v0  ;;  %v1254_v26 = vadd.f32 1.0, %v2459_v47  ;;  %v3002_v46 = vpop.f32.mrb[25].mxu1 }
 0x129   :  { %v2463_v10 = vpop.eup %2462  ;;  %2482 = vrcp.f32 %v1222_v59  ;;  %v1225_v31 = vadd.f32 1.0, %v2461_v60  ;;  %v3005_v58 = vpop.f32.mrb[26].mxu0  ;;  %v1882_v59 = vmul.f32 -1.442695, %v2989_v1  ;;  %v3017_v60 = vadd.f32 %v2794_v40, %v2890_v23 }
 0x12a   :  { %v2465_v55 = vpop.eup %2464  ;;  %2484 = vrcp.f32 %v1254_v26  ;;  %v1257_v17 = vadd.f32 1.0, %v2463_v10  ;;  %v3007_v13 = vpop.f32.mrb[26].mxu1  ;;  %v3030_v23 = vadd.f32 %v2794_v40, %v2912_v51  ;;  %v3044_v51 = vadd.f32 %v2921_v43, %v2794_v40 }
 0x12b   :  { %3350 = vst [vmem:[#allocation3_spill] sm:$0xff] %v3007_v13  ;;  %v2467_v57 = vpop.eup %2466  ;;  %2486 = vrcp.f32 %v1225_v31  ;;  %v1223_v2 = vadd.f32 1.0, %v2465_v55  ;;  %v3010_v18 = vpop.f32.mrb[27].mxu0  ;;  %v1848_v31 = vmul.f32 -1.442695, %v2998_v11  ;;  %v3022_v55 = vadd.f32 %v2903_v39, %v2794_v40 }
 0x12c   :  { %3351 = vst [vmem:[#allocation4_spill] sm:$0xff] %v3010_v18  ;;  %v3012_v14 = vpop.f32.mrb[27].mxu1  ;;  %v2469_v0 = vpop.eup %2468  ;;  %2488 = vrcp.f32 %v1257_v17  ;;  %v1255_v47 = vadd.f32 1.0, %v2467_v57  ;;  %v3026_v17 = vadd.f32 %v2905_v41, %v2794_v40  ;;  %v3037_v39 = vadd.f32 %v2794_v40, %v2914_v52 }
 0x12d   :  { %3352 = vst [vmem:[#allocation5_spill] sm:$0xff] %v3012_v14  ;;  %v2471_v26 = vpop.eup %2470  ;;  %2490 = vrcp.f32 %v1223_v2  ;;  %v1228_v10 = vadd.f32 1.0, %v2469_v0  ;;  %v1444_v2 = vmul.f32 %v2933_v20, %v2832_v4  ;;  %v1410_v41 = vmul.f32 %v2939_v24, %v2835_v7  ;;  %v3046_v13 = vpop.f32.mrb[28].mxu0 }
 0x12e   :  { %v2473_v18 = vpop.eup %2472  ;;  %2492 = vrcp.f32 %v1255_v47  ;;  %v1260_v14 = vadd.f32 1.0, %v2471_v26  ;;  %3353 = vst [vmem:[#allocation6_spill] sm:$0xff] %v3037_v39  ;;  %v3048_v4 = vpop.f32.mrb[28].mxu1  ;;  %v1442_v52 = vmul.f32 %v2945_v25, %v2838_v8  ;;  %v1880_v43 = vmul.f32 -1.442695, %v3017_v60 }
 0x12f   :  { %v2475_v57 = vpop.eup %2474  ;;  %v1445_v0 = vmul.f32 %v2473_v18, %v2849_v37  ;;  %2494 = vrcp.f32 %v1228_v10  ;;  %v3053_v7 = vpop.f32.mrb[29].mxu0  ;;  %v3060_v10 = vadd.f32 %v2923_v53, %v2794_v40 }
 0x130   :  { %v2477_v47 = vpop.eup %2476  ;;  %v1411_v26 = vmul.f32 %v2475_v57, %v2852_v42  ;;  %2496 = vrcp.f32 %v1260_v14  ;;  %v3055_v42 = vpop.f32.mrb[29].mxu1 }
 0x131   :  { %v2479_v37 = vpop.eup %2478  ;;  %v2125_v20 = vpack.c.bf16 %v1445_v0, %v1444_v2  ;;  %v1443_v18 = vmul.f32 %v2477_v47, %v2856_v56  ;;  %2498 = vpow2.f32 %v1847_v32  ;;  %v3062_v57 = vpop.f32.mrb[30].mxu0  ;;  %v1853_v32 = vmul.f32 -1.442695, %v3022_v55 }
 0x132   :  { %v2481_v24 = vpop.eup %2480  ;;  %v2040_v14 = vpack.c.bf16 %v1411_v26, %v1410_v41  ;;  %2500 = vpow2.f32 %v1879_v38  ;;  %3354 = vst [vmem:[#allocation7_spill] sm:$0xff] %v3062_v57  ;;  %v3064_v8 = vpop.f32.mrb[30].mxu1  ;;  %v3072_v38 = vadd.f32 %v2794_v40, %v2927_v12  ;;  %v1885_v47 = vmul.f32 -1.442695, %v3026_v17 }
 0x133   :  { %3355 = vst [vmem:[#allocation8_spill] sm:$0xff] %v3064_v8  ;;  %v2483_v25 = vpop.eup %2482  ;;  %2205 = vst [vmem:[%s3348_s3 + $0x98] sm:$0xff] %v2125_v20   ;;  %v2120_v56 = vpack.c.bf16 %v1443_v18, %v1442_v52  ;;  %2502 = vpow2.f32 %v1850_v5  ;;  %v3074_v2 = vpop.f32.mrb[31].mxu0  ;;  %v1851_v12 = vmul.f32 -1.442695, %v3030_v23  ;;  %v1416_v20 = vmul.f32 %v2479_v37, %v2860_v63 }
 0x134   :  { %3356 = vst [vmem:[#allocation9_spill] sm:$0xff] %v3074_v2  ;;  %v3076_v53 = vpop.f32.mrb[31].mxu1  ;;  %v2485_v0 = vpop.eup %2484  ;;  %2188 = vst [vmem:[%s3348_s3 + $0x10] sm:$0xff] %v2040_v14   ;;  %2504 = vpow2.f32 %v1882_v59  ;;  %v1883_v5 = vmul.f32 -1.442695, %v3037_v39  ;;  %v1414_v8 = vmul.f32 %v2483_v25, %v2868_v9 }
 0x135   :  { %3357 = vst [vmem:[#allocation10_spill] sm:$0xff] %v3076_v53  ;;  %v2487_v41 = vpop.eup %2486  ;;  %2204 = vst [vmem:[%s3348_s3 + $0x90] sm:$0xff] %v2120_v56   ;;  %2506 = vpow2.f32 %v1848_v31  ;;  %v1854_v26 = vmul.f32 -1.442695, %v3044_v51  ;;  %v1886_v59 = vmul.f32 -1.442695, %v3060_v10  ;;  %v1448_v53 = vmul.f32 %v2481_v24, %v2865_v6 }
 0x136   :  { %v2489_v52 = vpop.eup %2488  ;;  %v1417_v18 = vmul.f32 %v2487_v41, %v2878_v16  ;;  %2508 = vpow2.f32 %v1880_v43  ;;  %v1852_v31 = vmul.f32 -1.442695, %v3072_v38  ;;  %v1446_v16 = vmul.f32 %v2485_v0, %v2875_v15 }
 0x137   :  { %v2491_v14 = vpop.eup %2490  ;;  %v1449_v56 = vmul.f32 %v2489_v52, %v2885_v21  ;;  %2510 = vpow2.f32 %v1853_v32 }
 0x138   :  { %v2493_v2 = vpop.eup %2492  ;;  %v2055_v57 = vpack.c.bf16 %v1417_v18, %v1416_v20  ;;  %v1415_v39 = vmul.f32 %v2491_v14, %v2888_v22  ;;  %2512 = vpow2.f32 %v1885_v47  ;;  %v3120_v20 = vadd.f32 %v2954_v28, %v2794_v40 }
 0x139   :  { %v3096_v63 = vpop.eup %2494  ;;  %v2135_v37 = vpack.c.bf16 %v1449_v56, %v1448_v53  ;;  %v1447_v43 = vmul.f32 %v2493_v2, %v2901_v36  ;;  %2514 = vpow2.f32 %v1851_v12  ;;  %v3124_v18 = vadd.f32 %v2956_v29, %v2794_v40 }
 0x13a   :  { %v3100_v6 = vpop.eup %2496  ;;  %2191 = vst [vmem:[%s3348_s3 + $0x28] sm:$0xff] %v2055_v57   ;;  %v2050_v21 = vpack.c.bf16 %v1415_v39, %v1414_v8  ;;  %2516 = vpow2.f32 %v1883_v5  ;;  %v3116_v5 = vadd.f32 %v2794_v40, %v2929_v44  ;;  %v3128_v56 = vadd.f32 %v2794_v40, %v2960_v33 }
 0x13b   :  { %v2499_v9 = vpop.eup %2498  ;;  %2207 = vst [vmem:[%s3348_s3 + $0xa8] sm:$0xff] %v2135_v37   ;;  %v2130_v22 = vpack.c.bf16 %v1447_v43, %v1446_v16  ;;  %2518 = vpow2.f32 %v1854_v26  ;;  %v3132_v44 = vadd.f32 %v2794_v40, %v2962_v34  ;;  %v3136_v28 = vadd.f32 %v2964_v49, %v2794_v40 }
 0x13c   :  { %v2501_v15 = vpop.eup %2500  ;;  %2190 = vst [vmem:[%s3348_s3 + $0x20] sm:$0xff] %v2050_v21   ;;  %v1226_v36 = vadd.f32 1.0, %v2499_v9  ;;  %2520 = vpow2.f32 %v1886_v59  ;;  %v3140_v29 = vadd.f32 %v2966_v35, %v2794_v40  ;;  %v3144_v33 = vadd.f32 %v2794_v40, %v2968_v62 }
 0x13d   :  { %v2503_v24 = vpop.eup %2502  ;;  %2206 = vst [vmem:[%s3348_s3 + $0xa0] sm:$0xff] %v2130_v22   ;;  %v1258_v39 = vadd.f32 1.0, %v2501_v15  ;;  %2522 = vpow2.f32 %v1852_v31  ;;  %v1884_v9 = vmul.f32 -1.442695, %v3116_v5  ;;  %v1857_v22 = vmul.f32 -1.442695, %v3120_v20 }
 0x13e   :  { %v2505_v57 = vpop.eup %2504  ;;  %2524 = vrcp.f32 %v1226_v36  ;;  %v1229_v8 = vadd.f32 1.0, %v2503_v24  ;;  %v1889_v35 = vmul.f32 -1.442695, %v3124_v18  ;;  %v1855_v36 = vmul.f32 -1.442695, %v3128_v56 }
 0x13f   :  { %v2507_v25 = vpop.eup %2506  ;;  %2526 = vrcp.f32 %v1258_v39  ;;  %v1261_v32 = vadd.f32 1.0, %v2505_v57  ;;  %v1887_v39 = vmul.f32 -1.442695, %v3132_v44  ;;  %v1858_v62 = vmul.f32 -1.442695, %v3136_v28 }
 0x140   :  { %v2509_v2 = vpop.eup %2508  ;;  %2528 = vrcp.f32 %v1229_v8  ;;  %v1227_v53 = vadd.f32 1.0, %v2507_v25  ;;  %v1890_v57 = vmul.f32 -1.442695, %v3140_v29  ;;  %v1856_v25 = vmul.f32 -1.442695, %v3144_v33 }
 0x141   :  { %v2511_v0 = vpop.eup %2510  ;;  %2530 = vrcp.f32 %v1261_v32  ;;  %v1259_v47 = vadd.f32 1.0, %v2509_v2  ;;  %v3156_v32 = vadd.f32 %v2794_v40, %v2970_v3  ;;  %v3160_v2 = vadd.f32 %v2991_v27, %v2794_v40 }
 0x142   :  { %v2513_v41 = vpop.eup %2512  ;;  %2532 = vrcp.f32 %v1227_v53  ;;  %v1232_v12 = vadd.f32 1.0, %v2511_v0  ;;  %v1420_v0 = vmul.f32 %v3096_v63, %v2910_v50  ;;  %v1452_v3 = vmul.f32 %v3100_v6, %v2919_v61 }
 0x143   :  { %v2515_v26 = vpop.eup %2514  ;;  %2534 = vrcp.f32 %v1259_v47  ;;  %v1264_v52 = vadd.f32 1.0, %v2513_v41  ;;  %v3167_v41 = vadd.f32 %v2993_v30, %v2794_v40  ;;  %v3174_v27 = vadd.f32 %v2794_v40, %v3000_v45 }
 0x144   :  { %v2517_v59 = vpop.eup %2516  ;;  %2536 = vrcp.f32 %v1232_v12  ;;  %v1230_v14 = vadd.f32 1.0, %v2515_v26 }
 0x145   :  { %v2519_v31 = vpop.eup %2518  ;;  %2538 = vrcp.f32 %v1264_v52  ;;  %v1262_v16 = vadd.f32 1.0, %v2517_v59 }
 0x146   :  { %v2521_v37 = vpop.eup %2520  ;;  %2540 = vrcp.f32 %v1230_v14  ;;  %v1233_v43 = vadd.f32 1.0, %v2519_v31 }
 0x147   :  { %v2523_v34 = vpop.eup %2522  ;;  %2542 = vrcp.f32 %v1262_v16  ;;  %v1265_v21 = vadd.f32 1.0, %v2521_v37  ;;  %v1893_v16 = vmul.f32 -1.442695, %v3167_v41  ;;  %v1859_v37 = vmul.f32 -1.442695, %v3174_v27 }
 0x148   :  { %v2525_v49 = vpop.eup %2524  ;;  %2544 = vrcp.f32 %v1233_v43  ;;  %v1231_v15 = vadd.f32 1.0, %v2523_v34 }
 0x149   :  { %v2527_v24 = vpop.eup %2526  ;;  %2546 = vrcp.f32 %v1265_v21  ;;  %v1418_v50 = vmul.f32 %v2525_v49, %v2977_v54  ;;  %v1888_v54 = vmul.f32 -1.442695, %v3156_v32 }
 0x14a   :  { %v2529_v8 = vpop.eup %2528  ;;  %2548 = vrcp.f32 %v1231_v15  ;;  %v1450_v59 = vmul.f32 %v2527_v24, %v2981_v19 }
 0x14b   :  { %v2531_v53 = vpop.eup %2530  ;;  %v1421_v47 = vmul.f32 %v2529_v8, %v2985_v48  ;;  %2550 = vpow2.f32 %v1884_v9 }
 0x14c   :  { %v2533_v12 = vpop.eup %2532  ;;  %v1453_v26 = vmul.f32 %v2531_v53, %v2989_v1  ;;  %2552 = vpow2.f32 %v1857_v22 }
 0x14d   :  { %v2535_v52 = vpop.eup %2534  ;;  %v2065_v48 = vpack.c.bf16 %v1421_v47, %v1420_v0  ;;  %v1419_v63 = vmul.f32 %v2533_v12, %v2998_v11  ;;  %2554 = vpow2.f32 %v1889_v35  ;;  %v3186_v11 = vadd.f32 %v2794_v40, %v3002_v46 }
 0x14e   :  { %v2537_v30 = vpop.eup %2536  ;;  %v2145_v14 = vpack.c.bf16 %v1453_v26, %v1452_v3  ;;  %v1451_v61 = vmul.f32 %v2535_v52, %v3017_v60  ;;  %2556 = vpow2.f32 %v1855_v36  ;;  %v1861_v60 = vmul.f32 -1.442695, %v3160_v2 }
 0x14f   :  { %v2539_v1 = vpop.eup %2538  ;;  %2193 = vst [vmem:[%s3348_s3 + $0x38] sm:$0xff] %v2065_v48   ;;  %v2060_v45 = vpack.c.bf16 %v1419_v63, %v1418_v50  ;;  %2558 = vpow2.f32 %v1887_v39  ;;  %v1424_v34 = vmul.f32 %v2537_v30, %v3022_v55  ;;  %v1891_v9 = vmul.f32 -1.442695, %v3186_v11  ;;  %v3358_v63 = vld [vmem:[#allocation3_spill] sm:$0xff] }
 0x150   :  { %v2541_v6 = vpop.eup %2540  ;;  %2209 = vst [vmem:[%s3348_s3 + $0xb8] sm:$0xff] %v2145_v14   ;;  %v2140_v19 = vpack.c.bf16 %v1451_v61, %v1450_v59  ;;  %2560 = vpow2.f32 %v1858_v62  ;;  %v1456_v49 = vmul.f32 %v2539_v1, %v3026_v17  ;;  %v3220_v52 = vadd.f32 %v3005_v58, %v2794_v40  ;;  %v3359_v59 = vld [vmem:[#allocation4_spill] sm:$0xff] }
 0x151   :  { %v3192_v31 = vpop.eup %2542  ;;  %2192 = vst [vmem:[%s3348_s3 + $0x30] sm:$0xff] %v2060_v45   ;;  %2562 = vpow2.f32 %v1890_v57  ;;  %v1422_v36 = vmul.f32 %v2541_v6, %v3030_v23  ;;  %v3224_v30 = vadd.f32 %v3358_v63, %v2794_v40  ;;  %v3228_v14 = vadd.f32 %v2794_v40, %v3359_v59 }
 0x152   :  { %v2545_v46 = vpop.eup %2544  ;;  %2208 = vst [vmem:[%s3348_s3 + $0xb0] sm:$0xff] %v2140_v19   ;;  %2564 = vpow2.f32 %v1856_v25  ;;  %v1862_v19 = vmul.f32 -1.442695, %v3220_v52 }
 0x153   :  { %v2547_v43 = vpop.eup %2546  ;;  %v1425_v21 = vmul.f32 %v2545_v46, %v3044_v51  ;;  %2566 = vpow2.f32 %v1888_v54 }
 0x154   :  { %v2549_v22 = vpop.eup %2548  ;;  %v1457_v15 = vmul.f32 %v2547_v43, %v3060_v10  ;;  %2568 = vpow2.f32 %v1861_v60  ;;  %v3360_v60 = vld [vmem:[#allocation5_spill] sm:$0xff]  ;;  %v1894_v43 = vmul.f32 -1.442695, %v3224_v30 }
 0x155   :  { %v2551_v35 = vpop.eup %2550  ;;  %v2075_v24 = vpack.c.bf16 %v1425_v21, %v1424_v34  ;;  %v1423_v39 = vmul.f32 %v2549_v22, %v3072_v38  ;;  %2570 = vpow2.f32 %v1893_v16  ;;  %v3233_v16 = vadd.f32 %v2794_v40, %v3360_v60 }
 0x156   :  { %v2553_v62 = vpop.eup %2552  ;;  %v2155_v55 = vpack.c.bf16 %v1457_v15, %v1456_v49  ;;  %v1263_v57 = vadd.f32 1.0, %v2551_v35  ;;  %2572 = vpow2.f32 %v1859_v37  ;;  %v1860_v34 = vmul.f32 -1.442695, %v3228_v14 }
 0x157   :  { %v2555_v51 = vpop.eup %2554  ;;  %2195 = vst [vmem:[%s3348_s3 + $0x48] sm:$0xff] %v2075_v24   ;;  %v2070_v17 = vpack.c.bf16 %v1423_v39, %v1422_v36  ;;  %v1236_v8 = vadd.f32 1.0, %v2553_v62  ;;  %2574 = vpow2.f32 %v1891_v9  ;;  %v3239_v21 = vadd.f32 %v3046_v13, %v2794_v40  ;;  %v3361_v36 = vld [vmem:[#allocation6_spill] sm:$0xff]  ;;  %v3362_v39 = vld [vmem:[#allocation7_spill] sm:$0xff] }
 0x158   :  { %v2557_v10 = vpop.eup %2556  ;;  %2211 = vst [vmem:[%s3348_s3 + $0xc8] sm:$0xff] %v2155_v55   ;;  %2576 = vrcp.f32 %v1263_v57  ;;  %v1268_v23 = vadd.f32 1.0, %v2555_v51  ;;  %v3243_v22 = vadd.f32 %v3048_v4, %v2794_v40  ;;  %v3247_v49 = vadd.f32 %v2794_v40, %v3053_v7  ;;  %v3363_v55 = vld [vmem:[#allocation8_spill] sm:$0xff] }
 0x159   :  { %v2559_v38 = vpop.eup %2558  ;;  %2194 = vst [vmem:[%s3348_s3 + $0x40] sm:$0xff] %v2070_v17   ;;  %2578 = vrcp.f32 %v1236_v8  ;;  %v1234_v25 = vadd.f32 1.0, %v2557_v10  ;;  %v3251_v15 = vadd.f32 %v2794_v40, %v3055_v42  ;;  %v1454_v24 = vmul.f32 %v3192_v31, %v3361_v36  ;;  %v3364_v17 = vld [vmem:[#allocation9_spill] sm:$0xff] }
 0x15a   :  { %v2561_v53 = vpop.eup %2560  ;;  %2580 = vrcp.f32 %v1268_v23  ;;  %v1266_v0 = vadd.f32 1.0, %v2559_v38  ;;  %v3258_v62 = vadd.f32 %v3362_v39, %v2794_v40  ;;  %v1892_v7 = vmul.f32 -1.442695, %v3233_v16 }
 0x15b   :  { %v2563_v47 = vpop.eup %2562  ;;  %2582 = vrcp.f32 %v1234_v25  ;;  %v1237_v12 = vadd.f32 1.0, %v2561_v53  ;;  %v3263_v57 = vadd.f32 %v3363_v55, %v2794_v40  ;;  %v1865_v31 = vmul.f32 -1.442695, %v3239_v21 }
 0x15c   :  { %v2565_v3 = vpop.eup %2564  ;;  %2584 = vrcp.f32 %v1266_v0  ;;  %v1269_v26 = vadd.f32 1.0, %v2563_v47  ;;  %v1897_v23 = vmul.f32 -1.442695, %v3243_v22  ;;  %v1863_v38 = vmul.f32 -1.442695, %v3247_v49  ;;  %v3365_v0 = vld [vmem:[#allocation10_spill] sm:$0xff] }
 0x15d   :  { %v2567_v50 = vpop.eup %2566  ;;  %2586 = vrcp.f32 %v1237_v12  ;;  %v1235_v48 = vadd.f32 1.0, %v2565_v3  ;;  %v1895_v25 = vmul.f32 -1.442695, %v3251_v15  ;;  %v1866_v53 = vmul.f32 -1.442695, %v3258_v62 }
 0x15e   :  { %v2569_v61 = vpop.eup %2568  ;;  %2588 = vrcp.f32 %v1269_v26  ;;  %v1267_v1 = vadd.f32 1.0, %v2567_v50  ;;  %v1898_v50 = vmul.f32 -1.442695, %v3263_v57 }
 0x15f   :  { %v2571_v45 = vpop.eup %2570  ;;  %2590 = vrcp.f32 %v1235_v48  ;;  %v1240_v54 = vadd.f32 1.0, %v2569_v61 }
 0x160   :  { %v2573_v6 = vpop.eup %2572  ;;  %2592 = vrcp.f32 %v1267_v1  ;;  %v1272_v58 = vadd.f32 1.0, %v2571_v45 }
 0x161   :  { %v2575_v46 = vpop.eup %2574  ;;  %v1238_v37 = vadd.f32 1.0, %v2573_v6  ;;  %2594 = vrcp.f32 %v1240_v54 }
 0x162   :  { %v2577_v9 = vpop.eup %2576  ;;  %2596 = vrcp.f32 %v1272_v58 }
 0x163   :  { %v2579_v35 = vpop.eup %2578  ;;  %v1455_v13 = vmul.f32 %v2577_v9, %v3116_v5  ;;  %2598 = vrcp.f32 %v1238_v37  ;;  %v2650_v5 = vld [vmem:[%s3347_s2] ss:$0 sm:$0xff] }
 0x164   :  { %v2581_v4 = vpop.eup %2580  ;;  %2600 = vpow2.f32 %v1862_v19  ;;  %v3270_v8 = vadd.f32 %v2650_v5, %v3364_v17  ;;  %v3280_v47 = vadd.f32 %v2650_v5, %v3365_v0  ;;  %v1428_v3 = vmul.f32 %v2579_v35, %v3120_v20 }
 0x165   :  { %v2583_v42 = vpop.eup %2582  ;;  %v2150_v51 = vpack.c.bf16 %v1455_v13, %v1454_v24  ;;  %2602 = vpow2.f32 %v1894_v43  ;;  %v1460_v63 = vmul.f32 %v2581_v4, %v3124_v18 }
 0x166   :  { %v2585_v10 = vpop.eup %2584  ;;  %2604 = vpow2.f32 %v1860_v34  ;;  %v1864_v61 = vmul.f32 -1.442695, %v3270_v8  ;;  %v1426_v45 = vmul.f32 %v2583_v42, %v3128_v56 }
 0x167   :  { %v2587_v40 = vpop.eup %2586  ;;  %2210 = vst [vmem:[%s3348_s3 + $0xc0] sm:$0xff] %v2150_v51   ;;  %2606 = vpow2.f32 %v1892_v7  ;;  %v1458_v20 = vmul.f32 %v2585_v10, %v3132_v44  ;;  %v1270_v44 = vadd.f32 1.0, %v2575_v46 }
 0x168   :  { %v2589_v12 = vpop.eup %2588  ;;  %v1429_v26 = vmul.f32 %v2587_v40, %v3136_v28  ;;  %2608 = vpow2.f32 %v1865_v31 }
 0x169   :  { %v2591_v48 = vpop.eup %2590  ;;  %v1461_v59 = vmul.f32 %v2589_v12, %v3140_v29  ;;  %2610 = vpow2.f32 %v1897_v23  ;;  %v1896_v29 = vmul.f32 -1.442695, %v3280_v47 }
 0x16a   :  { %v2593_v1 = vpop.eup %2592  ;;  %v2085_v54 = vpack.c.bf16 %v1429_v26, %v1428_v3  ;;  %v1427_v6 = vmul.f32 %v2591_v48, %v3144_v33  ;;  %2612 = vpow2.f32 %v1863_v38 }
 0x16b   :  { %v2165_v28 = vpack.c.bf16 %v1461_v59, %v1460_v63  ;;  %v1459_v58 = vmul.f32 %v2593_v1, %v3156_v32  ;;  %v2595_v19 = vpop.eup %2594  ;;  %2614 = vpow2.f32 %v1895_v25 }
 0x16c   :  { %2197 = vst [vmem:[%s3348_s3 + $0x58] sm:$0xff] %v2085_v54   ;;  %v2080_v18 = vpack.c.bf16 %v1427_v6, %v1426_v45  ;;  %v2597_v56 = vpop.eup %2596  ;;  %2616 = vpow2.f32 %v1866_v53  ;;  %v1432_v3 = vmul.f32 %v2595_v19, %v3160_v2 }
 0x16d   :  { %2213 = vst [vmem:[%s3348_s3 + $0xd8] sm:$0xff] %v2165_v28   ;;  %v2160_v33 = vpack.c.bf16 %v1459_v58, %v1458_v20  ;;  %v2599_v60 = vpop.eup %2598  ;;  %2618 = vpow2.f32 %v1898_v50  ;;  %v1464_v48 = vmul.f32 %v2597_v56, %v3167_v41 }
 0x16e   :  { %2196 = vst [vmem:[%s3348_s3 + $0x50] sm:$0xff] %v2080_v18   ;;  %v2601_v32 = vpop.eup %2600  ;;  %2620 = vpow2.f32 %v1864_v61  ;;  %v1430_v61 = vmul.f32 %v2599_v60, %v3174_v27 }
 0x16f   :  { %2212 = vst [vmem:[%s3348_s3 + $0xd0] sm:$0xff] %v2160_v33   ;;  %v2603_v37 = vpop.eup %2602  ;;  %v1241_v43 = vadd.f32 1.0, %v2601_v32  ;;  %2622 = vpow2.f32 %v1896_v29 }
 0x170   :  { %v2605_v34 = vpop.eup %2604  ;;  %2624 = vrcp.f32 %v1270_v44  ;;  %v1273_v9 = vadd.f32 1.0, %v2603_v37 }
 0x171   :  { %v2607_v46 = vpop.eup %2606  ;;  %2626 = vrcp.f32 %v1241_v43  ;;  %v1239_v35 = vadd.f32 1.0, %v2605_v34 }
 0x172   :  { %v2609_v36 = vpop.eup %2608  ;;  %2628 = vrcp.f32 %v1273_v9  ;;  %v1271_v24 = vadd.f32 1.0, %v2607_v46 }
 0x173   :  { %v2611_v13 = vpop.eup %2610  ;;  %2630 = vrcp.f32 %v1239_v35  ;;  %v1244_v39 = vadd.f32 1.0, %v2609_v36 }
 0x174   :  { %v2613_v4 = vpop.eup %2612  ;;  %2632 = vrcp.f32 %v1271_v24  ;;  %v1276_v7 = vadd.f32 1.0, %v2611_v13 }
 0x175   :  { %v2615_v55 = vpop.eup %2614  ;;  %2634 = vrcp.f32 %v1244_v39  ;;  %v1242_v42 = vadd.f32 1.0, %v2613_v4 }
 0x176   :  { %v2617_v51 = vpop.eup %2616  ;;  %2636 = vrcp.f32 %v1276_v7  ;;  %v1274_v31 = vadd.f32 1.0, %v2615_v55 }
 0x177   :  { %v2619_v5 = vpop.eup %2618  ;;  %2638 = vrcp.f32 %v1242_v42  ;;  %v1245_v17 = vadd.f32 1.0, %v2617_v51 }
 0x178   :  { %v2621_v10 = vpop.eup %2620  ;;  %2640 = vrcp.f32 %v1274_v31  ;;  %v1277_v23 = vadd.f32 1.0, %v2619_v5 }
 0x179   :  { %v2623_v38 = vpop.eup %2622  ;;  %2642 = vrcp.f32 %v1245_v17  ;;  %v1243_v40 = vadd.f32 1.0, %v2621_v10 }
 0x17a   :  { %v2625_v25 = vpop.eup %2624  ;;  %2644 = vrcp.f32 %v1277_v23  ;;  %v1275_v53 = vadd.f32 1.0, %v2623_v38 }
 0x17b   :  { %v2627_v0 = vpop.eup %2626  ;;  %2646 = vrcp.f32 %v1243_v40  ;;  %v1462_v6 = vmul.f32 %v2625_v25, %v3186_v11 }
 0x17c   :  { %v2629_v12 = vpop.eup %2628  ;;  %v1433_v26 = vmul.f32 %v2627_v0, %v3220_v52  ;;  %2648 = vrcp.f32 %v1275_v53 }
 0x17d   :  { %v2631_v50 = vpop.eup %2630  ;;  %v1465_v63 = vmul.f32 %v2629_v12, %v3224_v30 }
 0x17e   :  { %v2633_v59 = vpop.eup %2632  ;;  %v2095_v1 = vpack.c.bf16 %v1433_v26, %v1432_v3  ;;  %v1431_v45 = vmul.f32 %v2631_v50, %v3228_v14 }
 0x17f   :  { %v2635_v54 = vpop.eup %2634  ;;  %v2175_v20 = vpack.c.bf16 %v1465_v63, %v1464_v48  ;;  %v1463_v2 = vmul.f32 %v2633_v59, %v3233_v16 }
 0x180   :  { %v2637_v28 = vpop.eup %2636  ;;  %2199 = vst [vmem:[%s3348_s3 + $0x68] sm:$0xff] %v2095_v1   ;;  %v2090_v41 = vpack.c.bf16 %v1431_v45, %v1430_v61  ;;  %v1436_v16 = vmul.f32 %v2635_v54, %v3239_v21 }
 0x181   :  { %v2639_v52 = vpop.eup %2638  ;;  %2215 = vst [vmem:[%s3348_s3 + $0xe8] sm:$0xff] %v2175_v20   ;;  %v2170_v27 = vpack.c.bf16 %v1463_v2, %v1462_v6  ;;  %v1468_v18 = vmul.f32 %v2637_v28, %v3243_v22 }
 0x182   :  { %v2641_v30 = vpop.eup %2640  ;;  %2198 = vst [vmem:[%s3348_s3 + $0x60] sm:$0xff] %v2090_v41   ;;  %v1434_v33 = vmul.f32 %v2639_v52, %v3247_v49 }
 0x183   :  { %v2643_v11 = vpop.eup %2642  ;;  %2214 = vst [vmem:[%s3348_s3 + $0xe0] sm:$0xff] %v2170_v27   ;;  %v1466_v32 = vmul.f32 %v2641_v30, %v3251_v15 }
 0x184   :  { %v2645_v14 = vpop.eup %2644  ;;  %v1437_v58 = vmul.f32 %v2643_v11, %v3258_v62 }
 0x185   :  { %v2647_v19 = vpop.eup %2646  ;;  %v1469_v29 = vmul.f32 %v2645_v14, %v3263_v57 }
 0x186   :  { %v2649_v56 = vpop.eup %2648  ;;  %v2105_v44 = vpack.c.bf16 %v1437_v58, %v1436_v16  ;;  %v1435_v60 = vmul.f32 %v2647_v19, %v3270_v8 }
 0x187   :  { %v2185_v37 = vpack.c.bf16 %v1469_v29, %v1468_v18  ;;  %v1467_v43 = vmul.f32 %v2649_v56, %v3280_v47 }
 0x188   :  { %2201 = vst [vmem:[%s3348_s3 + $0x78] sm:$0xff] %v2105_v44   ;;  %v2100_v21 = vpack.c.bf16 %v1435_v60, %v1434_v33 }
 0x189   :  { %2217 = vst [vmem:[%s3348_s3 + $0xf8] sm:$0xff] %v2185_v37   ;;  %v2180_v22 = vpack.c.bf16 %v1467_v43, %v1466_v32 }
 0x18a   :  { %2200 = vst [vmem:[%s3348_s3 + $0x70] sm:$0xff] %v2100_v21  }
 0x18b   :  { %2216 = vst [vmem:[%s3348_s3 + $0xf0] sm:$0xff] %v2180_v22  }

// kernel: fused_mbconv_stack_forward.8
= control target key start
LH: loop header
LB: loop body
LE: loop exit
PB: predicated region body
PF: predicated region fallthrough
CT: control target
= control target key end

     0   :  { %s979_s1 = inlined_call_operand.vmem [shape: bf16[128,128], index: 1, kind: input, shape index: {}]   ;;  %s980_s0 = inlined_call_operand.vmem [shape: bf16[128,128], index: 0, kind: input, shape index: {}]   ;;  %s981_s2 = inlined_call_operand.vmem [shape: f32[1,128], index: 2, kind: input, shape index: {}]   ;;  %s982_s3 = inlined_call_operand.vmem [shape: bf16[128,128], index: 3, kind: output, shape index: {}]  }
   0x1   :  { %v722_v0 = vld [vmem:[%s979_s1] sm:$0xff]   ;;  %v723_v1 = vld [vmem:[%s979_s1 + $0x8] sm:$0xff]   ;;  %v724_v2 = vld [vmem:[%s979_s1 + $0x10] sm:$0xff]  }
   0x2   :  { %674 = vmatprep.subr.bf16.mxu0 %v722_v0  ;;  %706 = vmatprep.subr.bf16.mxu1 %v722_v0  ;;  %v725_v3 = vld [vmem:[%s979_s1 + $0x18] sm:$0xff]   ;;  %v730_v4 = vld [vmem:[%s980_s0] sm:$0xff]   ;;  %v727_v7 = vld [vmem:[%s979_s1 + $0x28] sm:$0xff]  }
   0x3   :  { %675 = vmatpush3.bf16.msra.mxu0 %v722_v0  ;;  %714 = vmatpush3.bf16.msra.mxu1 %v722_v0  ;;  %v731_v5 = vld [vmem:[%s980_s0 + $0x20] sm:$0xff]   ;;  %v728_v8 = vld [vmem:[%s979_s1 + $0x30] sm:$0xff]   ;;  %v729_v9 = vld [vmem:[%s979_s1 + $0x38] sm:$0xff]  }
   0x4   :  { %676 = vmatprep.subr.bf16.mxu0 %v723_v1  ;;  %707 = vmatprep.subr.bf16.mxu1 %v723_v1  ;;  %v726_v6 = vld [vmem:[%s979_s1 + $0x20] sm:$0xff]   ;;  %v732_v10 = vld [vmem:[%s980_s0 + $0x8] sm:$0xff]   ;;  %v734_v12 = vld [vmem:[%s980_s0 + $0x10] sm:$0xff]  }
   0x5   :  { %690 = vmatprep.mubr.bf16.mxu0 %v730_v4  ;;  %698 = vmatprep.mubr.bf16.mxu1 %v731_v5  ;;  %v733_v11 = vld [vmem:[%s980_s0 + $0x28] sm:$0xff]   ;;  %v735_v13 = vld [vmem:[%s980_s0 + $0x30] sm:$0xff]   ;;  %v736_v14 = vld [vmem:[%s980_s0 + $0x18] sm:$0xff]  }
   0x6   :  { %v737_v15 = vld [vmem:[%s980_s0 + $0x38] sm:$0xff]   ;;  %v873_v16 = vld [vmem:[%s981_s2] ss:$0 sm:$0xff] }
   0x7   :  { %677 = vmatpush3.bf16.msra.mxu0 %v723_v1  ;;  %715 = vmatpush3.bf16.msra.mxu1 %v723_v1 }
   0x8   :  { %678 = vmatprep.subr.bf16.mxu0 %v724_v2  ;;  %708 = vmatprep.subr.bf16.mxu1 %v724_v2 }
   0xb   :  { %679 = vmatpush3.bf16.msra.mxu0 %v724_v2  ;;  %716 = vmatpush3.bf16.msra.mxu1 %v724_v2 }
   0xc   :  { %680 = vmatprep.subr.bf16.mxu0 %v725_v3  ;;  %709 = vmatprep.subr.bf16.mxu1 %v725_v3 }
   0xf   :  { %681 = vmatpush3.bf16.msra.mxu0 %v725_v3  ;;  %717 = vmatpush3.bf16.msra.mxu1 %v725_v3 }
  0x10   :  { %682 = vmatprep.subr.bf16.mxu0 %v726_v6  ;;  %710 = vmatprep.subr.bf16.mxu1 %v726_v6 }
  0x13   :  { %683 = vmatpush3.bf16.msra.mxu0 %v726_v6  ;;  %718 = vmatpush3.bf16.msra.mxu1 %v726_v6 }
  0x14   :  { %684 = vmatprep.subr.bf16.mxu0 %v727_v7  ;;  %711 = vmatprep.subr.bf16.mxu1 %v727_v7 }
  0x17   :  { %685 = vmatpush3.bf16.msra.mxu0 %v727_v7  ;;  %719 = vmatpush3.bf16.msra.mxu1 %v727_v7 }
  0x18   :  { %686 = vmatprep.subr.bf16.mxu0 %v728_v8  ;;  %712 = vmatprep.subr.bf16.mxu1 %v728_v8 }
  0x1b   :  { %687 = vmatpush3.bf16.msra.mxu0 %v728_v8  ;;  %720 = vmatpush3.bf16.msra.mxu1 %v728_v8 }
  0x1c   :  { %688 = vmatprep.subr.bf16.mxu0 %v729_v9  ;;  %713 = vmatprep.subr.bf16.mxu1 %v729_v9 }
  0x1f   :  { %689 = vmatpush3.bf16.msra.mxu0 %v729_v9  ;;  %721 = vmatpush3.bf16.msra.mxu1 %v729_v9 }
  0x22   :  { %691 = vmatmul.mubr.bf16.vlgmr.msra.gmra.mrb[0].mxu0 %v732_v10  ;;  %699 = vmatmul.mubr.bf16.vlgmr.msra.gmra.mrb[0].mxu1 %v733_v11 }
  0x23   :  { %694 = vmatprep.mubr.bf16.mxu0 %v734_v12  ;;  %702 = vmatprep.mubr.bf16.mxu1 %v735_v13 }
  0x2a   :  { %695 = vmatmul.mubr.bf16.gmra.mrb[4].mxu0 %v736_v14  ;;  %703 = vmatmul.mubr.bf16.gmra.mrb[4].mxu1 %v737_v15 }
  0xf5   :  { %v692_v17 = vpop.f32.mrb[0].mxu0  ;;  %v700_v18 = vpop.f32.mrb[0].mxu1 }
  0xf6   :  { %v876_v19 = vadd.f32 %v692_v17, %v873_v16  ;;  %v879_v20 = vadd.f32 %v700_v18, %v873_v16  ;;  %v213_v21 = vpop.f32.mrb[1].mxu0  ;;  %v245_v22 = vpop.f32.mrb[1].mxu1 }
  0xf7   :  { %v882_v23 = vadd.f32 %v873_v16, %v213_v21  ;;  %v885_v24 = vadd.f32 %v873_v16, %v245_v22  ;;  %v693_v25 = vpop.f32.mrb[2].mxu0  ;;  %v701_v26 = vpop.f32.mrb[2].mxu1 }
  0xf8   :  { %v565_v27 = vmul.f32 -1.442695, %v876_v19  ;;  %v573_v28 = vmul.f32 -1.442695, %v879_v20  ;;  %v890_v29 = vadd.f32 %v693_v25, %v873_v16  ;;  %v893_v30 = vadd.f32 %v701_v26, %v873_v16  ;;  %v216_v31 = vpop.f32.mrb[3].mxu0  ;;  %v248_v32 = vpop.f32.mrb[3].mxu1 }
  0xf9   :  { %v563_v33 = vmul.f32 -1.442695, %v882_v23  ;;  %v571_v34 = vmul.f32 -1.442695, %v885_v24  ;;  %v898_v35 = vadd.f32 %v873_v16, %v216_v31  ;;  %v901_v36 = vadd.f32 %v873_v16, %v248_v32 }
  0xfa   :  { %738 = vpow2.f32 %v565_v27  ;;  %v566_v37 = vmul.f32 -1.442695, %v890_v29  ;;  %v574_v38 = vmul.f32 -1.442695, %v893_v30 }
  0xfb   :  { %740 = vpow2.f32 %v573_v28  ;;  %v564_v39 = vmul.f32 -1.442695, %v898_v35  ;;  %v572_v40 = vmul.f32 -1.442695, %v901_v36 }
  0xfc   :  { %742 = vpow2.f32 %v563_v33 }
  0xfd   :  { %744 = vpow2.f32 %v571_v34  ;;  %v696_v41 = vpop.f32.mrb[4].mxu0  ;;  %v704_v42 = vpop.f32.mrb[4].mxu1 }
  0xfe   :  { %746 = vpow2.f32 %v566_v37  ;;  %v908_v43 = vadd.f32 %v696_v41, %v873_v16  ;;  %v911_v44 = vadd.f32 %v704_v42, %v873_v16  ;;  %v229_v45 = vpop.f32.mrb[5].mxu0  ;;  %v261_v46 = vpop.f32.mrb[5].mxu1 }
  0xff   :  { %748 = vpow2.f32 %v574_v38  ;;  %v914_v47 = vadd.f32 %v873_v16, %v229_v45  ;;  %v697_v48 = vpop.f32.mrb[6].mxu0  ;;  %v705_v49 = vpop.f32.mrb[6].mxu1  ;;  %v924_v0 = vadd.f32 %v873_v16, %v261_v46 }
 0x100   :  { %750 = vpow2.f32 %v564_v39  ;;  %v569_v50 = vmul.f32 -1.442695, %v908_v43  ;;  %v577_v51 = vmul.f32 -1.442695, %v911_v44  ;;  %v919_v52 = vadd.f32 %v697_v48, %v873_v16  ;;  %v232_v53 = vpop.f32.mrb[7].mxu0  ;;  %v264_v54 = vpop.f32.mrb[7].mxu1 }
 0x101   :  { %752 = vpow2.f32 %v572_v40  ;;  %v567_v55 = vmul.f32 -1.442695, %v914_v47  ;;  %v575_v9 = vmul.f32 -1.442695, %v924_v0  ;;  %v928_v12 = vadd.f32 %v705_v49, %v873_v16 }
 0x102   :  { %754 = vpow2.f32 %v569_v50  ;;  %v570_v56 = vmul.f32 -1.442695, %v919_v52  ;;  %v931_v14 = vadd.f32 %v873_v16, %v232_v53  ;;  %v934_v17 = vadd.f32 %v873_v16, %v264_v54 }
 0x103   :  { %756 = vpow2.f32 %v577_v51  ;;  %v578_v22 = vmul.f32 -1.442695, %v928_v12 }
 0x104   :  { %v739_v57 = vpop.eup %738  ;;  %758 = vpow2.f32 %v567_v55  ;;  %v568_v27 = vmul.f32 -1.442695, %v931_v14  ;;  %v576_v31 = vmul.f32 -1.442695, %v934_v17 }
 0x105   :  { %v741_v58 = vpop.eup %740  ;;  %v400_v59 = vadd.f32 1.0, %v739_v57  ;;  %760 = vpow2.f32 %v570_v56 }
 0x106   :  { %v743_v60 = vpop.eup %742  ;;  %v408_v61 = vadd.f32 1.0, %v741_v58 }
 0x107   :  { %v745_v62 = vpop.eup %744  ;;  %762 = vrcp.f32 %v400_v59  ;;  %v398_v63 = vadd.f32 1.0, %v743_v60 }
 0x108   :  { %v747_v1 = vpop.eup %746  ;;  %764 = vrcp.f32 %v408_v61  ;;  %v406_v2 = vadd.f32 1.0, %v745_v62 }
 0x109   :  { %v749_v3 = vpop.eup %748  ;;  %766 = vrcp.f32 %v398_v63  ;;  %v401_v4 = vadd.f32 1.0, %v747_v1 }
 0x10a   :  { %v751_v5 = vpop.eup %750  ;;  %768 = vrcp.f32 %v406_v2  ;;  %v409_v6 = vadd.f32 1.0, %v749_v3 }
 0x10b   :  { %v753_v7 = vpop.eup %752  ;;  %770 = vrcp.f32 %v401_v4  ;;  %v399_v8 = vadd.f32 1.0, %v751_v5 }
 0x10c   :  { %v755_v10 = vpop.eup %754  ;;  %772 = vrcp.f32 %v409_v6  ;;  %v407_v11 = vadd.f32 1.0, %v753_v7 }
 0x10d   :  { %774 = vrcp.f32 %v399_v8  ;;  %v404_v13 = vadd.f32 1.0, %v755_v10  ;;  %v757_v15 = vpop.eup %756 }
 0x10e   :  { %776 = vrcp.f32 %v407_v11  ;;  %v759_v18 = vpop.eup %758 }
 0x10f   :  { %778 = vpow2.f32 %v575_v9  ;;  %v761_v21 = vpop.eup %760 }
 0x110   :  { %780 = vrcp.f32 %v404_v13  ;;  %v405_v26 = vadd.f32 1.0, %v761_v21 }
 0x111   :  { %v763_v25 = vpop.eup %762 }
 0x112   :  { %v765_v28 = vpop.eup %764  ;;  %782 = vrcp.f32 %v405_v26  ;;  %v448_v37 = vmul.f32 %v763_v25, %v876_v19 }
 0x113   :  { %v767_v32 = vpop.eup %766  ;;  %784 = vpow2.f32 %v578_v22  ;;  %v456_v40 = vmul.f32 %v765_v28, %v879_v20  ;;  %v412_v20 = vadd.f32 1.0, %v757_v15 }
 0x114   :  { %v769_v33 = vpop.eup %768  ;;  %786 = vpow2.f32 %v568_v27  ;;  %v446_v45 = vmul.f32 %v767_v32, %v882_v23 }
 0x115   :  { %v771_v34 = vpop.eup %770  ;;  %788 = vpow2.f32 %v576_v31  ;;  %v454_v50 = vmul.f32 %v769_v33, %v885_v24 }
 0x116   :  { %v773_v16 = vpop.eup %772  ;;  %v449_v38 = vmul.f32 %v771_v34, %v890_v29  ;;  %790 = vrcp.f32 %v412_v20 }
 0x117   :  { %v775_v39 = vpop.eup %774  ;;  %v457_v41 = vmul.f32 %v773_v16, %v893_v30  ;;  %v402_v30 = vadd.f32 1.0, %v759_v18 }
 0x118   :  { %v777_v42 = vpop.eup %776  ;;  %v619_v46 = vpack.c.bf16 %v449_v38, %v448_v37  ;;  %v447_v48 = vmul.f32 %v775_v39, %v898_v35 }
 0x119   :  { %v779_v49 = vpop.eup %778  ;;  %v639_v51 = vpack.c.bf16 %v457_v41, %v456_v40  ;;  %v455_v19 = vmul.f32 %v777_v42, %v901_v36  ;;  %792 = vrcp.f32 %v402_v30 }
 0x11a   :  { %651 = vst [vmem:[%s982_s3 + $0x8] sm:$0xff] %v619_v46   ;;  %v614_v29 = vpack.c.bf16 %v447_v48, %v446_v45  ;;  %v781_v53 = vpop.eup %780  ;;  %v410_v24 = vadd.f32 1.0, %v779_v49 }
 0x11b   :  { %655 = vst [vmem:[%s982_s3 + $0x28] sm:$0xff] %v639_v51   ;;  %v634_v23 = vpack.c.bf16 %v455_v19, %v454_v50  ;;  %v452_v54 = vmul.f32 %v781_v53, %v908_v43 }
 0x11c   :  { %615 = vst [vmem:[%s982_s3] sm:$0xff] %v614_v29   ;;  %v783_v35 = vpop.eup %782  ;;  %794 = vrcp.f32 %v410_v24 }
 0x11d   :  { %654 = vst [vmem:[%s982_s3 + $0x20] sm:$0xff] %v634_v23   ;;  %v785_v36 = vpop.eup %784  ;;  %v453_v55 = vmul.f32 %v783_v35, %v919_v52 }
 0x11e   :  { %v787_v56 = vpop.eup %786  ;;  %v413_v57 = vadd.f32 1.0, %v785_v36 }
 0x11f   :  { %v789_v58 = vpop.eup %788  ;;  %v629_v59 = vpack.c.bf16 %v453_v55, %v452_v54  ;;  %v403_v60 = vadd.f32 1.0, %v787_v56 }
 0x120   :  { %796 = vrcp.f32 %v413_v57  ;;  %v411_v61 = vadd.f32 1.0, %v789_v58  ;;  %v791_v62 = vpop.eup %790 }
 0x121   :  { %653 = vst [vmem:[%s982_s3 + $0x18] sm:$0xff] %v629_v59   ;;  %798 = vrcp.f32 %v403_v60  ;;  %v460_v2 = vmul.f32 %v791_v62, %v911_v44 }
 0x122   :  { %800 = vrcp.f32 %v411_v61 }
 0x123   :  { %v793_v43 = vpop.eup %792 }
 0x124   :  { %v450_v5 = vmul.f32 %v793_v43, %v914_v47 }
 0x126   :  { %v795_v63 = vpop.eup %794 }
 0x127   :  { %v458_v7 = vmul.f32 %v795_v63, %v924_v0 }
 0x12a   :  { %v797_v1 = vpop.eup %796 }
 0x12b   :  { %v799_v52 = vpop.eup %798  ;;  %v461_v3 = vmul.f32 %v797_v1, %v928_v12 }
 0x12c   :  { %v801_v4 = vpop.eup %800  ;;  %v451_v6 = vmul.f32 %v799_v52, %v931_v14 }
 0x12d   :  { %v649_v8 = vpack.c.bf16 %v461_v3, %v460_v2  ;;  %v459_v9 = vmul.f32 %v801_v4, %v934_v17 }
 0x12e   :  { %v624_v10 = vpack.c.bf16 %v451_v6, %v450_v5 }
 0x12f   :  { %657 = vst [vmem:[%s982_s3 + $0x38] sm:$0xff] %v649_v8   ;;  %v644_v11 = vpack.c.bf16 %v459_v9, %v458_v7 }
 0x130   :  { %652 = vst [vmem:[%s982_s3 + $0x10] sm:$0xff] %v624_v10  }
 0x131   :  { %656 = vst [vmem:[%s982_s3 + $0x30] sm:$0xff] %v644_v11  }

// kernel: fused_mbconv_stack_forward.7
= control target key start
LH: loop header
LB: loop body
LE: loop exit
PB: predicated region body
PF: predicated region fallthrough
CT: control target
= control target key end

     0   :  { %s2642_s1 = inlined_call_operand.vmem [shape: bf16[128,128], index: 1, kind: input, shape index: {}]   ;;  %s2643_s0 = inlined_call_operand.vmem [shape: bf16[512,128], index: 0, kind: input, shape index: {}]   ;;  %s2644_s3 = inlined_call_operand.vmem [shape: bf16[512,128], index: 3, kind: input, shape index: {}]   ;;  %s2645_s2 = inlined_call_operand.vmem [shape: f32[1,128], index: 2, kind: input, shape index: {}]   ;;  %s2646_s4 = inlined_call_operand.vmem [shape: bf16[512,128], index: 4, kind: output, shape index: {}]  }
   0x1   :  { %v2196_v0 = vld [vmem:[%s2642_s1] sm:$0xff]   ;;  %v2197_v1 = vld [vmem:[%s2642_s1 + $0x8] sm:$0xff]   ;;  %v2198_v2 = vld [vmem:[%s2642_s1 + $0x10] sm:$0xff]  }
   0x2   :  { %2100 = vmatprep.subr.bf16.mxu0 %v2196_v0  ;;  %2180 = vmatprep.subr.bf16.mxu1 %v2196_v0  ;;  %v2199_v3 = vld [vmem:[%s2642_s1 + $0x18] sm:$0xff]   ;;  %v2204_v4 = vld [vmem:[%s2643_s0] sm:$0xff]   ;;  %v2201_v7 = vld [vmem:[%s2642_s1 + $0x28] sm:$0xff]  }
   0x3   :  { %2101 = vmatpush3.bf16.msra.mxu0 %v2196_v0  ;;  %2188 = vmatpush3.bf16.msra.mxu1 %v2196_v0  ;;  %v2205_v5 = vld [vmem:[%s2643_s0 + $0x80] sm:$0xff]   ;;  %v2202_v8 = vld [vmem:[%s2642_s1 + $0x30] sm:$0xff]   ;;  %v2203_v9 = vld [vmem:[%s2642_s1 + $0x38] sm:$0xff]  }
   0x4   :  { %2102 = vmatprep.subr.bf16.mxu0 %v2197_v1  ;;  %2181 = vmatprep.subr.bf16.mxu1 %v2197_v1  ;;  %v2200_v6 = vld [vmem:[%s2642_s1 + $0x20] sm:$0xff]   ;;  %v2206_v10 = vld [vmem:[%s2643_s0 + $0x8] sm:$0xff]   ;;  %v2208_v12 = vld [vmem:[%s2643_s0 + $0x10] sm:$0xff]  }
   0x5   :  { %2116 = vmatprep.mubr.bf16.mxu0 %v2204_v4  ;;  %2148 = vmatprep.mubr.bf16.mxu1 %v2205_v5  ;;  %v2207_v11 = vld [vmem:[%s2643_s0 + $0x88] sm:$0xff]   ;;  %v2209_v13 = vld [vmem:[%s2643_s0 + $0x90] sm:$0xff]   ;;  %v2210_v14 = vld [vmem:[%s2643_s0 + $0x18] sm:$0xff]  }
   0x6   :  { %v2211_v15 = vld [vmem:[%s2643_s0 + $0x98] sm:$0xff]   ;;  %v2212_v16 = vld [vmem:[%s2643_s0 + $0x20] sm:$0xff]   ;;  %v2214_v18 = vld [vmem:[%s2643_s0 + $0x28] sm:$0xff]  }
   0x7   :  { %2103 = vmatpush3.bf16.msra.mxu0 %v2197_v1  ;;  %2189 = vmatpush3.bf16.msra.mxu1 %v2197_v1  ;;  %v2213_v17 = vld [vmem:[%s2643_s0 + $0xa0] sm:$0xff]   ;;  %v2215_v19 = vld [vmem:[%s2643_s0 + $0xa8] sm:$0xff]   ;;  %v2216_v20 = vld [vmem:[%s2643_s0 + $0x30] sm:$0xff]  }
   0x8   :  { %2104 = vmatprep.subr.bf16.mxu0 %v2198_v2  ;;  %2182 = vmatprep.subr.bf16.mxu1 %v2198_v2  ;;  %v2217_v21 = vld [vmem:[%s2643_s0 + $0xb0] sm:$0xff]   ;;  %v2218_v22 = vld [vmem:[%s2643_s0 + $0x38] sm:$0xff]   ;;  %v2220_v24 = vld [vmem:[%s2643_s0 + $0x40] sm:$0xff]  }
   0x9   :  { %v2219_v23 = vld [vmem:[%s2643_s0 + $0xb8] sm:$0xff]   ;;  %v2221_v25 = vld [vmem:[%s2643_s0 + $0xc0] sm:$0xff]   ;;  %v2222_v26 = vld [vmem:[%s2643_s0 + $0x48] sm:$0xff]  }
   0xa   :  { %v2223_v27 = vld [vmem:[%s2643_s0 + $0xc8] sm:$0xff]   ;;  %v2224_v28 = vld [vmem:[%s2643_s0 + $0x50] sm:$0xff]   ;;  %v2226_v30 = vld [vmem:[%s2643_s0 + $0x58] sm:$0xff]  }
   0xb   :  { %2105 = vmatpush3.bf16.msra.mxu0 %v2198_v2  ;;  %2190 = vmatpush3.bf16.msra.mxu1 %v2198_v2  ;;  %v2225_v29 = vld [vmem:[%s2643_s0 + $0xd0] sm:$0xff]   ;;  %v2227_v31 = vld [vmem:[%s2643_s0 + $0xd8] sm:$0xff]   ;;  %v2228_v32 = vld [vmem:[%s2643_s0 + $0x60] sm:$0xff]  }
   0xc   :  { %2106 = vmatprep.subr.bf16.mxu0 %v2199_v3  ;;  %2183 = vmatprep.subr.bf16.mxu1 %v2199_v3  ;;  %v2229_v33 = vld [vmem:[%s2643_s0 + $0xe0] sm:$0xff]   ;;  %v2230_v34 = vld [vmem:[%s2643_s0 + $0x68] sm:$0xff]   ;;  %v2232_v36 = vld [vmem:[%s2643_s0 + $0x70] sm:$0xff]  }
   0xd   :  { %v2231_v35 = vld [vmem:[%s2643_s0 + $0xe8] sm:$0xff]   ;;  %v2233_v37 = vld [vmem:[%s2643_s0 + $0xf0] sm:$0xff]   ;;  %v2234_v38 = vld [vmem:[%s2643_s0 + $0x78] sm:$0xff]  }
   0xe   :  { %v2235_v39 = vld [vmem:[%s2643_s0 + $0xf8] sm:$0xff]   ;;  %v1998_v40 = vld [vmem:[%s2644_s3 + $0x8] sm:$0xff]   ;;  %v1711_v42 = vld [vmem:[%s2644_s3] sm:$0xff]  }
   0xf   :  { %2107 = vmatpush3.bf16.msra.mxu0 %v2199_v3  ;;  %2191 = vmatpush3.bf16.msra.mxu1 %v2199_v3  ;;  %v2014_v41 = vld [vmem:[%s2644_s3 + $0x88] sm:$0xff]   ;;  %v2013_v43 = vld [vmem:[%s2644_s3 + $0x80] sm:$0xff]   ;;  %v1716_v46 = vunpack.c.l.bf16 %v1998_v40  ;;  %v1712_v49 = vunpack.c.l.bf16 %v1711_v42  ;;  %v1717_v55 = vunpack.c.h.bf16 %v1998_v40  ;;  %v1713_v61 = vunpack.c.h.bf16 %v1711_v42  ;;  %v2000_v5 = vld [vmem:[%s2644_s3 + $0x18] sm:$0xff]  }
  0x10   :  { %2108 = vmatprep.subr.bf16.mxu0 %v2200_v6  ;;  %2184 = vmatprep.subr.bf16.mxu1 %v2200_v6  ;;  %v2396_v44 = vld [vmem:[%s2645_s2] ss:$0 sm:$0xff]  ;;  %v1780_v48 = vunpack.c.l.bf16 %v2014_v41  ;;  %v1776_v50 = vunpack.c.l.bf16 %v2013_v43  ;;  %v1781_v56 = vunpack.c.h.bf16 %v2014_v41  ;;  %v1777_v62 = vunpack.c.h.bf16 %v2013_v43 }
  0x13   :  { %2109 = vmatpush3.bf16.msra.mxu0 %v2200_v6  ;;  %2192 = vmatpush3.bf16.msra.mxu1 %v2200_v6  ;;  %v2016_v6 = vld [vmem:[%s2644_s3 + $0x98] sm:$0xff]  }
  0x14   :  { %2110 = vmatprep.subr.bf16.mxu0 %v2201_v7  ;;  %2185 = vmatprep.subr.bf16.mxu1 %v2201_v7 }
  0x17   :  { %2111 = vmatpush3.bf16.msra.mxu0 %v2201_v7  ;;  %2193 = vmatpush3.bf16.msra.mxu1 %v2201_v7 }
  0x18   :  { %2112 = vmatprep.subr.bf16.mxu0 %v2202_v8  ;;  %2186 = vmatprep.subr.bf16.mxu1 %v2202_v8 }
  0x1b   :  { %2113 = vmatpush3.bf16.msra.mxu0 %v2202_v8  ;;  %2194 = vmatpush3.bf16.msra.mxu1 %v2202_v8 }
  0x1c   :  { %2114 = vmatprep.subr.bf16.mxu0 %v2203_v9  ;;  %2187 = vmatprep.subr.bf16.mxu1 %v2203_v9 }
  0x1f   :  { %2115 = vmatpush3.bf16.msra.mxu0 %v2203_v9  ;;  %2195 = vmatpush3.bf16.msra.mxu1 %v2203_v9 }
  0x22   :  { %2117 = vmatmul.mubr.bf16.vlgmr.msra.gmra.mrb[0].mxu0 %v2206_v10  ;;  %2149 = vmatmul.mubr.bf16.vlgmr.msra.gmra.mrb[0].mxu1 %v2207_v11  ;;  %v1999_v11 = vld [vmem:[%s2644_s3 + $0x10] sm:$0xff]  }
  0x23   :  { %2120 = vmatprep.mubr.bf16.mxu0 %v2208_v12  ;;  %2152 = vmatprep.mubr.bf16.mxu1 %v2209_v13  ;;  %v2015_v12 = vld [vmem:[%s2644_s3 + $0x90] sm:$0xff]  }
  0x2a   :  { %2121 = vmatmul.mubr.bf16.gmra.mrb[4].mxu0 %v2210_v14  ;;  %2153 = vmatmul.mubr.bf16.gmra.mrb[4].mxu1 %v2211_v15 }
  0x2b   :  { %2124 = vmatprep.mubr.bf16.mxu0 %v2212_v16  ;;  %2156 = vmatprep.mubr.bf16.mxu1 %v2213_v17 }
  0x32   :  { %2125 = vmatmul.mubr.bf16.gmra.mrb[8].mxu0 %v2214_v18  ;;  %2157 = vmatmul.mubr.bf16.gmra.mrb[8].mxu1 %v2215_v19  ;;  %v1724_v19 = vunpack.c.l.bf16 %v2000_v5 }
  0x33   :  { %2128 = vmatprep.mubr.bf16.mxu0 %v2216_v20  ;;  %2160 = vmatprep.mubr.bf16.mxu1 %v2217_v21  ;;  %v1788_v20 = vunpack.c.l.bf16 %v2016_v6 }
  0x3a   :  { %2129 = vmatmul.mubr.bf16.gmra.mrb[12].mxu0 %v2218_v22  ;;  %2161 = vmatmul.mubr.bf16.gmra.mrb[12].mxu1 %v2219_v23 }
  0x3b   :  { %2132 = vmatprep.mubr.bf16.mxu0 %v2220_v24  ;;  %2164 = vmatprep.mubr.bf16.mxu1 %v2221_v25  ;;  %v1720_v25 = vunpack.c.l.bf16 %v1999_v11 }
  0x42   :  { %2133 = vmatmul.mubr.bf16.gmra.mrb[16].mxu0 %v2222_v26  ;;  %2165 = vmatmul.mubr.bf16.gmra.mrb[16].mxu1 %v2223_v27  ;;  %v1784_v26 = vunpack.c.l.bf16 %v2015_v12 }
  0x43   :  { %2136 = vmatprep.mubr.bf16.mxu0 %v2224_v28  ;;  %2168 = vmatprep.mubr.bf16.mxu1 %v2225_v29 }
  0x4a   :  { %2137 = vmatmul.mubr.bf16.gmra.mrb[20].mxu0 %v2226_v30  ;;  %2169 = vmatmul.mubr.bf16.gmra.mrb[20].mxu1 %v2227_v31  ;;  %v1725_v31 = vunpack.c.h.bf16 %v2000_v5 }
  0x4b   :  { %2140 = vmatprep.mubr.bf16.mxu0 %v2228_v32  ;;  %2172 = vmatprep.mubr.bf16.mxu1 %v2229_v33  ;;  %v1789_v32 = vunpack.c.h.bf16 %v2016_v6 }
  0x52   :  { %2141 = vmatmul.mubr.bf16.gmra.mrb[24].mxu0 %v2230_v34  ;;  %2173 = vmatmul.mubr.bf16.gmra.mrb[24].mxu1 %v2231_v35 }
  0x53   :  { %2144 = vmatprep.mubr.bf16.mxu0 %v2232_v36  ;;  %2176 = vmatprep.mubr.bf16.mxu1 %v2233_v37  ;;  %v1721_v37 = vunpack.c.h.bf16 %v1999_v11 }
  0x5a   :  { %2145 = vmatmul.mubr.bf16.gmra.mrb[28].mxu0 %v2234_v38  ;;  %2177 = vmatmul.mubr.bf16.gmra.mrb[28].mxu1 %v2235_v39  ;;  %v1785_v38 = vunpack.c.h.bf16 %v2015_v12 }
  0xf5   :  { %v2118_v45 = vpop.f32.mrb[0].mxu0  ;;  %v2150_v47 = vpop.f32.mrb[0].mxu1 }
  0xf6   :  { %v963_v51 = vadd.f32 %v2118_v45, %v2396_v44  ;;  %v995_v52 = vadd.f32 %v2150_v47, %v2396_v44  ;;  %v504_v53 = vpop.f32.mrb[1].mxu0  ;;  %v632_v54 = vpop.f32.mrb[1].mxu1  ;;  %v2018_v47 = vld [vmem:[%s2644_s3 + $0xa8] sm:$0xff]  }
  0xf7   :  { %v961_v57 = vadd.f32 %v2396_v44, %v504_v53  ;;  %v993_v58 = vadd.f32 %v2396_v44, %v632_v54  ;;  %v2119_v59 = vpop.f32.mrb[2].mxu0  ;;  %v2151_v60 = vpop.f32.mrb[2].mxu1  ;;  %v2017_v53 = vld [vmem:[%s2644_s3 + $0xa0] sm:$0xff]  }
  0xf8   :  { %v964_v63 = vadd.f32 %v2119_v59, %v2396_v44  ;;  %v996_v0 = vadd.f32 %v2151_v60, %v2396_v44  ;;  %v507_v1 = vpop.f32.mrb[3].mxu0  ;;  %v635_v2 = vpop.f32.mrb[3].mxu1  ;;  %v1155_v7 = vadd.f32 %v1716_v46, %v963_v51  ;;  %v1187_v8 = vadd.f32 %v1780_v48, %v995_v52  ;;  %v2002_v46 = vld [vmem:[%s2644_s3 + $0x28] sm:$0xff]   ;;  %v2001_v52 = vld [vmem:[%s2644_s3 + $0x20] sm:$0xff]  }
  0xf9   :  { %v962_v3 = vadd.f32 %v2396_v44, %v507_v1  ;;  %v994_v4 = vadd.f32 %v2396_v44, %v635_v2  ;;  %v1153_v13 = vadd.f32 %v1712_v49, %v961_v57  ;;  %v1185_v14 = vadd.f32 %v1776_v50, %v993_v58 }
  0xfa   :  { %v1156_v9 = vadd.f32 %v1717_v55, %v964_v63  ;;  %v1188_v10 = vadd.f32 %v1781_v56, %v996_v0  ;;  %v1732_v60 = vunpack.c.l.bf16 %v2002_v46  ;;  %v1728_v2 = vunpack.c.l.bf16 %v2001_v52 }
  0xfb   :  { %v1154_v15 = vadd.f32 %v1713_v61, %v962_v3  ;;  %v1186_v16 = vadd.f32 %v1777_v62, %v994_v4  ;;  %v1796_v61 = vunpack.c.l.bf16 %v2018_v47  ;;  %v1792_v3 = vunpack.c.l.bf16 %v2017_v53 }
  0xfc   :  { %v1846_v17 = vpack.c.bf16 %v1156_v9, %v1155_v7  ;;  %v1926_v18 = vpack.c.bf16 %v1188_v10, %v1187_v8  ;;  %v1733_v8 = vunpack.c.h.bf16 %v2002_v46  ;;  %v1797_v9 = vunpack.c.h.bf16 %v2018_v47 }
  0xfd   :  { %v1841_v21 = vpack.c.bf16 %v1154_v15, %v1153_v13  ;;  %v1921_v22 = vpack.c.bf16 %v1186_v16, %v1185_v14  ;;  %v2122_v23 = vpop.f32.mrb[4].mxu0  ;;  %v2154_v24 = vpop.f32.mrb[4].mxu1  ;;  %v1729_v14 = vunpack.c.h.bf16 %v2001_v52  ;;  %v1793_v15 = vunpack.c.h.bf16 %v2017_v53 }
  0xfe   :  { %2029 = vst [vmem:[%s2646_s4 + $0x8] sm:$0xff] %v1846_v17   ;;  %2045 = vst [vmem:[%s2646_s4 + $0x88] sm:$0xff] %v1926_v18   ;;  %v967_v27 = vadd.f32 %v2122_v23, %v2396_v44  ;;  %v999_v28 = vadd.f32 %v2154_v24, %v2396_v44  ;;  %v520_v29 = vpop.f32.mrb[5].mxu0  ;;  %v648_v30 = vpop.f32.mrb[5].mxu1  ;;  %v2020_v23 = vld [vmem:[%s2644_s3 + $0xb8] sm:$0xff]  }
  0xff   :  { %1842 = vst [vmem:[%s2646_s4] sm:$0xff] %v1841_v21   ;;  %2044 = vst [vmem:[%s2646_s4 + $0x80] sm:$0xff] %v1921_v22   ;;  %v965_v33 = vadd.f32 %v2396_v44, %v520_v29  ;;  %v997_v34 = vadd.f32 %v2396_v44, %v648_v30  ;;  %v2123_v35 = vpop.f32.mrb[6].mxu0  ;;  %v2155_v36 = vpop.f32.mrb[6].mxu1  ;;  %v2004_v22 = vld [vmem:[%s2644_s3 + $0x38] sm:$0xff]   ;;  %v2019_v29 = vld [vmem:[%s2644_s3 + $0xb0] sm:$0xff]  }
 0x100   :  { %v968_v39 = vadd.f32 %v2123_v35, %v2396_v44  ;;  %v1000_v40 = vadd.f32 %v2155_v36, %v2396_v44  ;;  %v523_v41 = vpop.f32.mrb[7].mxu0  ;;  %v651_v42 = vpop.f32.mrb[7].mxu1  ;;  %v1159_v48 = vadd.f32 %v1724_v19, %v967_v27  ;;  %v1191_v49 = vadd.f32 %v1788_v20, %v999_v28  ;;  %v2003_v28 = vld [vmem:[%s2644_s3 + $0x30] sm:$0xff]  }
 0x101   :  { %v966_v43 = vadd.f32 %v2396_v44, %v523_v41  ;;  %v998_v45 = vadd.f32 %v2396_v44, %v651_v42  ;;  %v1157_v54 = vadd.f32 %v1720_v25, %v965_v33  ;;  %v1189_v55 = vadd.f32 %v1784_v26, %v997_v34 }
 0x102   :  { %v1160_v50 = vadd.f32 %v1725_v31, %v968_v39  ;;  %v1192_v51 = vadd.f32 %v1789_v32, %v1000_v40  ;;  %v1740_v36 = vunpack.c.l.bf16 %v2004_v22  ;;  %v1736_v42 = vunpack.c.l.bf16 %v2003_v28 }
 0x103   :  { %v1158_v56 = vadd.f32 %v1721_v37, %v966_v43  ;;  %v1190_v57 = vadd.f32 %v1785_v38, %v998_v45  ;;  %v1804_v37 = vunpack.c.l.bf16 %v2020_v23  ;;  %v1800_v43 = vunpack.c.l.bf16 %v2019_v29 }
 0x104   :  { %v1856_v58 = vpack.c.bf16 %v1160_v50, %v1159_v48  ;;  %v1936_v59 = vpack.c.bf16 %v1192_v51, %v1191_v49  ;;  %v1741_v49 = vunpack.c.h.bf16 %v2004_v22  ;;  %v1805_v50 = vunpack.c.h.bf16 %v2020_v23 }
 0x105   :  { %v1851_v62 = vpack.c.bf16 %v1158_v56, %v1157_v54  ;;  %v1931_v63 = vpack.c.bf16 %v1190_v57, %v1189_v55  ;;  %v2126_v0 = vpop.f32.mrb[8].mxu0  ;;  %v2158_v1 = vpop.f32.mrb[8].mxu1  ;;  %v1737_v55 = vunpack.c.h.bf16 %v2003_v28  ;;  %v1801_v56 = vunpack.c.h.bf16 %v2019_v29 }
 0x106   :  { %2031 = vst [vmem:[%s2646_s4 + $0x18] sm:$0xff] %v1856_v58   ;;  %2047 = vst [vmem:[%s2646_s4 + $0x98] sm:$0xff] %v1936_v59   ;;  %v971_v4 = vadd.f32 %v2126_v0, %v2396_v44  ;;  %v1003_v5 = vadd.f32 %v2158_v1, %v2396_v44  ;;  %v536_v6 = vpop.f32.mrb[9].mxu0  ;;  %v664_v7 = vpop.f32.mrb[9].mxu1  ;;  %v2022_v0 = vld [vmem:[%s2644_s3 + $0xc8] sm:$0xff]  }
 0x107   :  { %2030 = vst [vmem:[%s2646_s4 + $0x10] sm:$0xff] %v1851_v62   ;;  %2046 = vst [vmem:[%s2646_s4 + $0x90] sm:$0xff] %v1931_v63   ;;  %v969_v10 = vadd.f32 %v2396_v44, %v536_v6  ;;  %v1001_v11 = vadd.f32 %v2396_v44, %v664_v7  ;;  %v2127_v12 = vpop.f32.mrb[10].mxu0  ;;  %v2159_v13 = vpop.f32.mrb[10].mxu1  ;;  %v2006_v63 = vld [vmem:[%s2644_s3 + $0x48] sm:$0xff]   ;;  %v2021_v6 = vld [vmem:[%s2644_s3 + $0xc0] sm:$0xff]  }
 0x108   :  { %v972_v16 = vadd.f32 %v2127_v12, %v2396_v44  ;;  %v1004_v17 = vadd.f32 %v2159_v13, %v2396_v44  ;;  %v539_v18 = vpop.f32.mrb[11].mxu0  ;;  %v667_v19 = vpop.f32.mrb[11].mxu1  ;;  %v1163_v24 = vadd.f32 %v1732_v60, %v971_v4  ;;  %v1195_v25 = vadd.f32 %v1796_v61, %v1003_v5  ;;  %v2005_v5 = vld [vmem:[%s2644_s3 + $0x40] sm:$0xff]  }
 0x109   :  { %v970_v20 = vadd.f32 %v2396_v44, %v539_v18  ;;  %v1002_v21 = vadd.f32 %v2396_v44, %v667_v19  ;;  %v1161_v30 = vadd.f32 %v1728_v2, %v969_v10  ;;  %v1193_v31 = vadd.f32 %v1792_v3, %v1001_v11 }
 0x10a   :  { %v1164_v26 = vadd.f32 %v1733_v8, %v972_v16  ;;  %v1196_v27 = vadd.f32 %v1797_v9, %v1004_v17  ;;  %v1748_v13 = vunpack.c.l.bf16 %v2006_v63  ;;  %v1744_v19 = vunpack.c.l.bf16 %v2005_v5 }
 0x10b   :  { %v1162_v32 = vadd.f32 %v1729_v14, %v970_v20  ;;  %v1194_v33 = vadd.f32 %v1793_v15, %v1002_v21  ;;  %v1812_v14 = vunpack.c.l.bf16 %v2022_v0  ;;  %v1808_v20 = vunpack.c.l.bf16 %v2021_v6 }
 0x10c   :  { %v1866_v34 = vpack.c.bf16 %v1164_v26, %v1163_v24  ;;  %v1946_v35 = vpack.c.bf16 %v1196_v27, %v1195_v25  ;;  %v1749_v25 = vunpack.c.h.bf16 %v2006_v63  ;;  %v1813_v26 = vunpack.c.h.bf16 %v2022_v0 }
 0x10d   :  { %v1861_v38 = vpack.c.bf16 %v1162_v32, %v1161_v30  ;;  %v1941_v39 = vpack.c.bf16 %v1194_v33, %v1193_v31  ;;  %v2130_v40 = vpop.f32.mrb[12].mxu0  ;;  %v2162_v41 = vpop.f32.mrb[12].mxu1  ;;  %v1745_v31 = vunpack.c.h.bf16 %v2005_v5  ;;  %v1809_v32 = vunpack.c.h.bf16 %v2021_v6 }
 0x10e   :  { %2033 = vst [vmem:[%s2646_s4 + $0x28] sm:$0xff] %v1866_v34   ;;  %2049 = vst [vmem:[%s2646_s4 + $0xa8] sm:$0xff] %v1946_v35   ;;  %v975_v45 = vadd.f32 %v2130_v40, %v2396_v44  ;;  %v1007_v46 = vadd.f32 %v2162_v41, %v2396_v44  ;;  %v552_v47 = vpop.f32.mrb[13].mxu0  ;;  %v680_v48 = vpop.f32.mrb[13].mxu1  ;;  %v2024_v40 = vld [vmem:[%s2644_s3 + $0xd8] sm:$0xff]  }
 0x10f   :  { %2032 = vst [vmem:[%s2646_s4 + $0x20] sm:$0xff] %v1861_v38   ;;  %2048 = vst [vmem:[%s2646_s4 + $0xa0] sm:$0xff] %v1941_v39   ;;  %v973_v51 = vadd.f32 %v2396_v44, %v552_v47  ;;  %v1005_v52 = vadd.f32 %v2396_v44, %v680_v48  ;;  %v2131_v53 = vpop.f32.mrb[14].mxu0  ;;  %v2163_v54 = vpop.f32.mrb[14].mxu1  ;;  %v2008_v39 = vld [vmem:[%s2644_s3 + $0x58] sm:$0xff]   ;;  %v2023_v47 = vld [vmem:[%s2644_s3 + $0xd0] sm:$0xff]  }
 0x110   :  { %v976_v57 = vadd.f32 %v2131_v53, %v2396_v44  ;;  %v1008_v58 = vadd.f32 %v2163_v54, %v2396_v44  ;;  %v555_v59 = vpop.f32.mrb[15].mxu0  ;;  %v683_v60 = vpop.f32.mrb[15].mxu1  ;;  %v1167_v1 = vadd.f32 %v1740_v36, %v975_v45  ;;  %v1199_v2 = vadd.f32 %v1804_v37, %v1007_v46  ;;  %v2007_v46 = vld [vmem:[%s2644_s3 + $0x50] sm:$0xff]  }
 0x111   :  { %v974_v61 = vadd.f32 %v2396_v44, %v555_v59  ;;  %v1006_v62 = vadd.f32 %v2396_v44, %v683_v60  ;;  %v1165_v7 = vadd.f32 %v1736_v42, %v973_v51  ;;  %v1197_v8 = vadd.f32 %v1800_v43, %v1005_v52 }
 0x112   :  { %v1168_v3 = vadd.f32 %v1741_v49, %v976_v57  ;;  %v1200_v4 = vadd.f32 %v1805_v50, %v1008_v58  ;;  %v1756_v54 = vunpack.c.l.bf16 %v2008_v39  ;;  %v1752_v60 = vunpack.c.l.bf16 %v2007_v46 }
 0x113   :  { %v1166_v9 = vadd.f32 %v1737_v55, %v974_v61  ;;  %v1198_v10 = vadd.f32 %v1801_v56, %v1006_v62  ;;  %v1820_v55 = vunpack.c.l.bf16 %v2024_v40  ;;  %v1816_v61 = vunpack.c.l.bf16 %v2023_v47 }
 0x114   :  { %v1876_v11 = vpack.c.bf16 %v1168_v3, %v1167_v1  ;;  %v1956_v12 = vpack.c.bf16 %v1200_v4, %v1199_v2  ;;  %v1757_v2 = vunpack.c.h.bf16 %v2008_v39  ;;  %v1821_v3 = vunpack.c.h.bf16 %v2024_v40 }
 0x115   :  { %v1871_v15 = vpack.c.bf16 %v1166_v9, %v1165_v7  ;;  %v1951_v16 = vpack.c.bf16 %v1198_v10, %v1197_v8  ;;  %v2134_v17 = vpop.f32.mrb[16].mxu0  ;;  %v2166_v18 = vpop.f32.mrb[16].mxu1  ;;  %v1753_v8 = vunpack.c.h.bf16 %v2007_v46  ;;  %v1817_v9 = vunpack.c.h.bf16 %v2023_v47 }
 0x116   :  { %2035 = vst [vmem:[%s2646_s4 + $0x38] sm:$0xff] %v1876_v11   ;;  %2051 = vst [vmem:[%s2646_s4 + $0xb8] sm:$0xff] %v1956_v12   ;;  %v979_v21 = vadd.f32 %v2134_v17, %v2396_v44  ;;  %v1011_v22 = vadd.f32 %v2166_v18, %v2396_v44  ;;  %v568_v23 = vpop.f32.mrb[17].mxu0  ;;  %v696_v24 = vpop.f32.mrb[17].mxu1  ;;  %v2026_v17 = vld [vmem:[%s2644_s3 + $0xe8] sm:$0xff]  }
 0x117   :  { %2034 = vst [vmem:[%s2646_s4 + $0x30] sm:$0xff] %v1871_v15   ;;  %2050 = vst [vmem:[%s2646_s4 + $0xb0] sm:$0xff] %v1951_v16   ;;  %v977_v27 = vadd.f32 %v2396_v44, %v568_v23  ;;  %v1009_v28 = vadd.f32 %v2396_v44, %v696_v24  ;;  %v2135_v29 = vpop.f32.mrb[18].mxu0  ;;  %v2167_v30 = vpop.f32.mrb[18].mxu1  ;;  %v2010_v16 = vld [vmem:[%s2644_s3 + $0x68] sm:$0xff]   ;;  %v2025_v23 = vld [vmem:[%s2644_s3 + $0xe0] sm:$0xff]  }
 0x118   :  { %v980_v33 = vadd.f32 %v2135_v29, %v2396_v44  ;;  %v1012_v34 = vadd.f32 %v2167_v30, %v2396_v44  ;;  %v571_v35 = vpop.f32.mrb[19].mxu0  ;;  %v699_v36 = vpop.f32.mrb[19].mxu1  ;;  %v1171_v41 = vadd.f32 %v1748_v13, %v979_v21  ;;  %v1203_v42 = vadd.f32 %v1812_v14, %v1011_v22  ;;  %v2009_v22 = vld [vmem:[%s2644_s3 + $0x60] sm:$0xff]  }
 0x119   :  { %v978_v37 = vadd.f32 %v2396_v44, %v571_v35  ;;  %v1010_v38 = vadd.f32 %v2396_v44, %v699_v36  ;;  %v1169_v48 = vadd.f32 %v1744_v19, %v977_v27  ;;  %v1201_v49 = vadd.f32 %v1808_v20, %v1009_v28 }
 0x11a   :  { %v1172_v43 = vadd.f32 %v1749_v25, %v980_v33  ;;  %v1204_v45 = vadd.f32 %v1813_v26, %v1012_v34  ;;  %v1764_v30 = vunpack.c.l.bf16 %v2010_v16  ;;  %v1760_v36 = vunpack.c.l.bf16 %v2009_v22 }
 0x11b   :  { %v1170_v50 = vadd.f32 %v1745_v31, %v978_v37  ;;  %v1202_v51 = vadd.f32 %v1809_v32, %v1010_v38  ;;  %v1828_v31 = vunpack.c.l.bf16 %v2026_v17  ;;  %v1824_v37 = vunpack.c.l.bf16 %v2025_v23 }
 0x11c   :  { %v1886_v52 = vpack.c.bf16 %v1172_v43, %v1171_v41  ;;  %v1966_v53 = vpack.c.bf16 %v1204_v45, %v1203_v42  ;;  %v1765_v42 = vunpack.c.h.bf16 %v2010_v16  ;;  %v1829_v43 = vunpack.c.h.bf16 %v2026_v17 }
 0x11d   :  { %v1881_v56 = vpack.c.bf16 %v1170_v50, %v1169_v48  ;;  %v1961_v57 = vpack.c.bf16 %v1202_v51, %v1201_v49  ;;  %v2138_v58 = vpop.f32.mrb[20].mxu0  ;;  %v2170_v59 = vpop.f32.mrb[20].mxu1  ;;  %v1761_v49 = vunpack.c.h.bf16 %v2009_v22  ;;  %v1825_v50 = vunpack.c.h.bf16 %v2025_v23 }
 0x11e   :  { %2037 = vst [vmem:[%s2646_s4 + $0x48] sm:$0xff] %v1886_v52   ;;  %2053 = vst [vmem:[%s2646_s4 + $0xc8] sm:$0xff] %v1966_v53   ;;  %v983_v62 = vadd.f32 %v2138_v58, %v2396_v44  ;;  %v1015_v63 = vadd.f32 %v2170_v59, %v2396_v44  ;;  %v584_v0 = vpop.f32.mrb[21].mxu0  ;;  %v712_v1 = vpop.f32.mrb[21].mxu1  ;;  %v2028_v58 = vld [vmem:[%s2644_s3 + $0xf8] sm:$0xff]  }
 0x11f   :  { %2036 = vst [vmem:[%s2646_s4 + $0x40] sm:$0xff] %v1881_v56   ;;  %2052 = vst [vmem:[%s2646_s4 + $0xc0] sm:$0xff] %v1961_v57   ;;  %v981_v4 = vadd.f32 %v2396_v44, %v584_v0  ;;  %v1013_v5 = vadd.f32 %v2396_v44, %v712_v1  ;;  %v2139_v6 = vpop.f32.mrb[22].mxu0  ;;  %v2171_v7 = vpop.f32.mrb[22].mxu1  ;;  %v2012_v57 = vld [vmem:[%s2644_s3 + $0x78] sm:$0xff]   ;;  %v2027_v0 = vld [vmem:[%s2644_s3 + $0xf0] sm:$0xff]  }
 0x120   :  { %v984_v10 = vadd.f32 %v2139_v6, %v2396_v44  ;;  %v1016_v11 = vadd.f32 %v2171_v7, %v2396_v44  ;;  %v587_v12 = vpop.f32.mrb[23].mxu0  ;;  %v715_v13 = vpop.f32.mrb[23].mxu1  ;;  %v1175_v18 = vadd.f32 %v1756_v54, %v983_v62  ;;  %v1207_v19 = vadd.f32 %v1820_v55, %v1015_v63  ;;  %v2011_v63 = vld [vmem:[%s2644_s3 + $0x70] sm:$0xff]  }
 0x121   :  { %v982_v14 = vadd.f32 %v2396_v44, %v587_v12  ;;  %v1014_v15 = vadd.f32 %v2396_v44, %v715_v13  ;;  %v1173_v24 = vadd.f32 %v1752_v60, %v981_v4  ;;  %v1205_v25 = vadd.f32 %v1816_v61, %v1013_v5 }
 0x122   :  { %v1176_v20 = vadd.f32 %v1757_v2, %v984_v10  ;;  %v1208_v21 = vadd.f32 %v1821_v3, %v1016_v11  ;;  %v1772_v7 = vunpack.c.l.bf16 %v2012_v57  ;;  %v1768_v13 = vunpack.c.l.bf16 %v2011_v63 }
 0x123   :  { %v1174_v26 = vadd.f32 %v1753_v8, %v982_v14  ;;  %v1206_v27 = vadd.f32 %v1817_v9, %v1014_v15  ;;  %v1836_v8 = vunpack.c.l.bf16 %v2028_v58  ;;  %v1832_v14 = vunpack.c.l.bf16 %v2027_v0 }
 0x124   :  { %v1896_v28 = vpack.c.bf16 %v1176_v20, %v1175_v18  ;;  %v1976_v29 = vpack.c.bf16 %v1208_v21, %v1207_v19  ;;  %v1773_v19 = vunpack.c.h.bf16 %v2012_v57  ;;  %v1837_v20 = vunpack.c.h.bf16 %v2028_v58 }
 0x125   :  { %v1891_v32 = vpack.c.bf16 %v1174_v26, %v1173_v24  ;;  %v1971_v33 = vpack.c.bf16 %v1206_v27, %v1205_v25  ;;  %v2142_v34 = vpop.f32.mrb[24].mxu0  ;;  %v2174_v35 = vpop.f32.mrb[24].mxu1  ;;  %v1769_v25 = vunpack.c.h.bf16 %v2011_v63  ;;  %v1833_v26 = vunpack.c.h.bf16 %v2027_v0 }
 0x126   :  { %2039 = vst [vmem:[%s2646_s4 + $0x58] sm:$0xff] %v1896_v28   ;;  %2055 = vst [vmem:[%s2646_s4 + $0xd8] sm:$0xff] %v1976_v29   ;;  %v987_v38 = vadd.f32 %v2142_v34, %v2396_v44  ;;  %v1019_v39 = vadd.f32 %v2174_v35, %v2396_v44  ;;  %v600_v40 = vpop.f32.mrb[25].mxu0  ;;  %v728_v41 = vpop.f32.mrb[25].mxu1 }
 0x127   :  { %2038 = vst [vmem:[%s2646_s4 + $0x50] sm:$0xff] %v1891_v32   ;;  %2054 = vst [vmem:[%s2646_s4 + $0xd0] sm:$0xff] %v1971_v33   ;;  %v985_v45 = vadd.f32 %v2396_v44, %v600_v40  ;;  %v1017_v46 = vadd.f32 %v2396_v44, %v728_v41  ;;  %v2143_v47 = vpop.f32.mrb[26].mxu0  ;;  %v2175_v48 = vpop.f32.mrb[26].mxu1 }
 0x128   :  { %v988_v51 = vadd.f32 %v2143_v47, %v2396_v44  ;;  %v1020_v52 = vadd.f32 %v2175_v48, %v2396_v44  ;;  %v603_v53 = vpop.f32.mrb[27].mxu0  ;;  %v731_v54 = vpop.f32.mrb[27].mxu1  ;;  %v1179_v59 = vadd.f32 %v1764_v30, %v987_v38  ;;  %v1211_v60 = vadd.f32 %v1828_v31, %v1019_v39 }
 0x129   :  { %v986_v55 = vadd.f32 %v2396_v44, %v603_v53  ;;  %v1018_v56 = vadd.f32 %v2396_v44, %v731_v54  ;;  %v1177_v1 = vadd.f32 %v1760_v36, %v985_v45  ;;  %v1209_v2 = vadd.f32 %v1824_v37, %v1017_v46 }
 0x12a   :  { %v1180_v61 = vadd.f32 %v1765_v42, %v988_v51  ;;  %v1212_v62 = vadd.f32 %v1829_v43, %v1020_v52 }
 0x12b   :  { %v1178_v3 = vadd.f32 %v1761_v49, %v986_v55  ;;  %v1210_v4 = vadd.f32 %v1825_v50, %v1018_v56 }
 0x12c   :  { %v1906_v5 = vpack.c.bf16 %v1180_v61, %v1179_v59  ;;  %v1986_v6 = vpack.c.bf16 %v1212_v62, %v1211_v60 }
 0x12d   :  { %v1901_v9 = vpack.c.bf16 %v1178_v3, %v1177_v1  ;;  %v1981_v10 = vpack.c.bf16 %v1210_v4, %v1209_v2  ;;  %v2146_v11 = vpop.f32.mrb[28].mxu0  ;;  %v2178_v12 = vpop.f32.mrb[28].mxu1 }
 0x12e   :  { %2041 = vst [vmem:[%s2646_s4 + $0x68] sm:$0xff] %v1906_v5   ;;  %2057 = vst [vmem:[%s2646_s4 + $0xe8] sm:$0xff] %v1986_v6   ;;  %v991_v15 = vadd.f32 %v2146_v11, %v2396_v44  ;;  %v1023_v16 = vadd.f32 %v2178_v12, %v2396_v44  ;;  %v616_v17 = vpop.f32.mrb[29].mxu0  ;;  %v744_v18 = vpop.f32.mrb[29].mxu1 }
 0x12f   :  { %2040 = vst [vmem:[%s2646_s4 + $0x60] sm:$0xff] %v1901_v9   ;;  %2056 = vst [vmem:[%s2646_s4 + $0xe0] sm:$0xff] %v1981_v10   ;;  %v989_v21 = vadd.f32 %v2396_v44, %v616_v17  ;;  %v1021_v22 = vadd.f32 %v2396_v44, %v744_v18  ;;  %v2147_v23 = vpop.f32.mrb[30].mxu0  ;;  %v2179_v24 = vpop.f32.mrb[30].mxu1 }
 0x130   :  { %v992_v27 = vadd.f32 %v2147_v23, %v2396_v44  ;;  %v1024_v28 = vadd.f32 %v2179_v24, %v2396_v44  ;;  %v619_v29 = vpop.f32.mrb[31].mxu0  ;;  %v747_v30 = vpop.f32.mrb[31].mxu1  ;;  %v1183_v33 = vadd.f32 %v1772_v7, %v991_v15  ;;  %v1215_v34 = vadd.f32 %v1836_v8, %v1023_v16 }
 0x131   :  { %v990_v31 = vadd.f32 %v2396_v44, %v619_v29  ;;  %v1022_v32 = vadd.f32 %v2396_v44, %v747_v30  ;;  %v1181_v37 = vadd.f32 %v1768_v13, %v989_v21  ;;  %v1213_v38 = vadd.f32 %v1832_v14, %v1021_v22 }
 0x132   :  { %v1184_v35 = vadd.f32 %v1773_v19, %v992_v27  ;;  %v1216_v36 = vadd.f32 %v1837_v20, %v1024_v28 }
 0x133   :  { %v1182_v39 = vadd.f32 %v1769_v25, %v990_v31  ;;  %v1214_v40 = vadd.f32 %v1833_v26, %v1022_v32 }
 0x134   :  { %v1916_v41 = vpack.c.bf16 %v1184_v35, %v1183_v33  ;;  %v1996_v42 = vpack.c.bf16 %v1216_v36, %v1215_v34 }
 0x135   :  { %v1911_v43 = vpack.c.bf16 %v1182_v39, %v1181_v37  ;;  %v1991_v45 = vpack.c.bf16 %v1214_v40, %v1213_v38 }
 0x136   :  { %2043 = vst [vmem:[%s2646_s4 + $0x78] sm:$0xff] %v1916_v41   ;;  %2059 = vst [vmem:[%s2646_s4 + $0xf8] sm:$0xff] %v1996_v42  }
 0x137   :  { %2042 = vst [vmem:[%s2646_s4 + $0x70] sm:$0xff] %v1911_v43   ;;  %2058 = vst [vmem:[%s2646_s4 + $0xf0] sm:$0xff] %v1991_v45  }

// kernel: fused_mbconv_stack_forward.9
= control target key start
LH: loop header
LB: loop body
LE: loop exit
PB: predicated region body
PF: predicated region fallthrough
CT: control target
= control target key end

     0   :  { %s705_s1 = inlined_call_operand.vmem [shape: bf16[128,128], index: 1, kind: input, shape index: {}]   ;;  %s706_s0 = inlined_call_operand.vmem [shape: bf16[128,128], index: 0, kind: input, shape index: {}]   ;;  %s707_s2 = inlined_call_operand.vmem [shape: f32[1,128], index: 2, kind: input, shape index: {}]   ;;  %s708_s3 = inlined_call_operand.vmem [shape: bf16[128,128], index: 3, kind: output, shape index: {}]  }
   0x1   :  { %v594_v0 = vld [vmem:[%s705_s1] sm:$0xff]   ;;  %v595_v1 = vld [vmem:[%s705_s1 + $0x8] sm:$0xff]   ;;  %v596_v2 = vld [vmem:[%s705_s1 + $0x10] sm:$0xff]  }
   0x2   :  { %546 = vmatprep.subr.bf16.mxu0 %v594_v0  ;;  %578 = vmatprep.subr.bf16.mxu1 %v594_v0  ;;  %v597_v3 = vld [vmem:[%s705_s1 + $0x18] sm:$0xff]   ;;  %v602_v4 = vld [vmem:[%s706_s0] sm:$0xff]   ;;  %v599_v7 = vld [vmem:[%s705_s1 + $0x28] sm:$0xff]  }
   0x3   :  { %547 = vmatpush3.bf16.msra.mxu0 %v594_v0  ;;  %586 = vmatpush3.bf16.msra.mxu1 %v594_v0  ;;  %v603_v5 = vld [vmem:[%s706_s0 + $0x20] sm:$0xff]   ;;  %v600_v8 = vld [vmem:[%s705_s1 + $0x30] sm:$0xff]   ;;  %v601_v9 = vld [vmem:[%s705_s1 + $0x38] sm:$0xff]  }
   0x4   :  { %548 = vmatprep.subr.bf16.mxu0 %v595_v1  ;;  %579 = vmatprep.subr.bf16.mxu1 %v595_v1  ;;  %v598_v6 = vld [vmem:[%s705_s1 + $0x20] sm:$0xff]   ;;  %v604_v10 = vld [vmem:[%s706_s0 + $0x8] sm:$0xff]   ;;  %v606_v12 = vld [vmem:[%s706_s0 + $0x10] sm:$0xff]  }
   0x5   :  { %562 = vmatprep.mubr.bf16.mxu0 %v602_v4  ;;  %570 = vmatprep.mubr.bf16.mxu1 %v603_v5  ;;  %v605_v11 = vld [vmem:[%s706_s0 + $0x28] sm:$0xff]   ;;  %v607_v13 = vld [vmem:[%s706_s0 + $0x30] sm:$0xff]   ;;  %v608_v14 = vld [vmem:[%s706_s0 + $0x18] sm:$0xff]  }
   0x6   :  { %v609_v15 = vld [vmem:[%s706_s0 + $0x38] sm:$0xff]   ;;  %v450_v17 = vld [vmem:[%s707_s2] ss:$0 sm:$0xff] }
   0x7   :  { %549 = vmatpush3.bf16.msra.mxu0 %v595_v1  ;;  %587 = vmatpush3.bf16.msra.mxu1 %v595_v1 }
   0x8   :  { %550 = vmatprep.subr.bf16.mxu0 %v596_v2  ;;  %580 = vmatprep.subr.bf16.mxu1 %v596_v2 }
   0xb   :  { %551 = vmatpush3.bf16.msra.mxu0 %v596_v2  ;;  %588 = vmatpush3.bf16.msra.mxu1 %v596_v2 }
   0xc   :  { %552 = vmatprep.subr.bf16.mxu0 %v597_v3  ;;  %581 = vmatprep.subr.bf16.mxu1 %v597_v3 }
   0xf   :  { %553 = vmatpush3.bf16.msra.mxu0 %v597_v3  ;;  %589 = vmatpush3.bf16.msra.mxu1 %v597_v3 }
  0x10   :  { %554 = vmatprep.subr.bf16.mxu0 %v598_v6  ;;  %582 = vmatprep.subr.bf16.mxu1 %v598_v6 }
  0x13   :  { %555 = vmatpush3.bf16.msra.mxu0 %v598_v6  ;;  %590 = vmatpush3.bf16.msra.mxu1 %v598_v6 }
  0x14   :  { %556 = vmatprep.subr.bf16.mxu0 %v599_v7  ;;  %583 = vmatprep.subr.bf16.mxu1 %v599_v7 }
  0x17   :  { %557 = vmatpush3.bf16.msra.mxu0 %v599_v7  ;;  %591 = vmatpush3.bf16.msra.mxu1 %v599_v7 }
  0x18   :  { %558 = vmatprep.subr.bf16.mxu0 %v600_v8  ;;  %584 = vmatprep.subr.bf16.mxu1 %v600_v8 }
  0x1b   :  { %559 = vmatpush3.bf16.msra.mxu0 %v600_v8  ;;  %592 = vmatpush3.bf16.msra.mxu1 %v600_v8 }
  0x1c   :  { %560 = vmatprep.subr.bf16.mxu0 %v601_v9  ;;  %585 = vmatprep.subr.bf16.mxu1 %v601_v9 }
  0x1f   :  { %561 = vmatpush3.bf16.msra.mxu0 %v601_v9  ;;  %593 = vmatpush3.bf16.msra.mxu1 %v601_v9 }
  0x22   :  { %563 = vmatmul.mubr.bf16.vlgmr.msra.gmra.mrb[0].mxu0 %v604_v10  ;;  %571 = vmatmul.mubr.bf16.vlgmr.msra.gmra.mrb[0].mxu1 %v605_v11 }
  0x23   :  { %566 = vmatprep.mubr.bf16.mxu0 %v606_v12  ;;  %574 = vmatprep.mubr.bf16.mxu1 %v607_v13 }
  0x2a   :  { %567 = vmatmul.mubr.bf16.gmra.mrb[4].mxu0 %v608_v14  ;;  %575 = vmatmul.mubr.bf16.gmra.mrb[4].mxu1 %v609_v15 }
  0xf5   :  { %v564_v16 = vpop.f32.mrb[0].mxu0  ;;  %v572_v18 = vpop.f32.mrb[0].mxu1 }
  0xf6   :  { %v213_v19 = vpop.f32.mrb[1].mxu0  ;;  %v245_v20 = vpop.f32.mrb[1].mxu1  ;;  %v336_v23 = vadd.f32 %v564_v16, %v450_v17  ;;  %v344_v24 = vadd.f32 %v572_v18, %v450_v17 }
  0xf7   :  { %v565_v21 = vpop.f32.mrb[2].mxu0  ;;  %v573_v22 = vpop.f32.mrb[2].mxu1  ;;  %v334_v29 = vadd.f32 %v450_v17, %v213_v19  ;;  %v342_v30 = vadd.f32 %v450_v17, %v245_v20 }
  0xf8   :  { %v337_v25 = vadd.f32 %v565_v21, %v450_v17  ;;  %v345_v26 = vadd.f32 %v573_v22, %v450_v17  ;;  %v216_v27 = vpop.f32.mrb[3].mxu0  ;;  %v248_v28 = vpop.f32.mrb[3].mxu1 }
  0xf9   :  { %v335_v31 = vadd.f32 %v450_v17, %v216_v27  ;;  %v343_v32 = vadd.f32 %v450_v17, %v248_v28 }
  0xfa   :  { %v491_v33 = vpack.c.bf16 %v337_v25, %v336_v23  ;;  %v511_v34 = vpack.c.bf16 %v345_v26, %v344_v24 }
  0xfb   :  { %v486_v35 = vpack.c.bf16 %v335_v31, %v334_v29  ;;  %v506_v36 = vpack.c.bf16 %v343_v32, %v342_v30 }
  0xfc   :  { %523 = vst [vmem:[%s708_s3 + $0x8] sm:$0xff] %v491_v33   ;;  %527 = vst [vmem:[%s708_s3 + $0x28] sm:$0xff] %v511_v34  }
  0xfd   :  { %487 = vst [vmem:[%s708_s3] sm:$0xff] %v486_v35   ;;  %526 = vst [vmem:[%s708_s3 + $0x20] sm:$0xff] %v506_v36   ;;  %v568_v37 = vpop.f32.mrb[4].mxu0  ;;  %v576_v38 = vpop.f32.mrb[4].mxu1 }
  0xfe   :  { %v229_v39 = vpop.f32.mrb[5].mxu0  ;;  %v261_v40 = vpop.f32.mrb[5].mxu1  ;;  %v340_v43 = vadd.f32 %v568_v37, %v450_v17  ;;  %v348_v44 = vadd.f32 %v576_v38, %v450_v17 }
  0xff   :  { %v569_v41 = vpop.f32.mrb[6].mxu0  ;;  %v577_v42 = vpop.f32.mrb[6].mxu1  ;;  %v338_v49 = vadd.f32 %v450_v17, %v229_v39  ;;  %v346_v50 = vadd.f32 %v450_v17, %v261_v40 }
 0x100   :  { %v341_v45 = vadd.f32 %v569_v41, %v450_v17  ;;  %v349_v46 = vadd.f32 %v577_v42, %v450_v17  ;;  %v232_v47 = vpop.f32.mrb[7].mxu0  ;;  %v264_v48 = vpop.f32.mrb[7].mxu1 }
 0x101   :  { %v339_v51 = vadd.f32 %v450_v17, %v232_v47  ;;  %v347_v52 = vadd.f32 %v450_v17, %v264_v48 }
 0x102   :  { %v501_v53 = vpack.c.bf16 %v341_v45, %v340_v43  ;;  %v521_v54 = vpack.c.bf16 %v349_v46, %v348_v44 }
 0x103   :  { %v496_v55 = vpack.c.bf16 %v339_v51, %v338_v49  ;;  %v516_v56 = vpack.c.bf16 %v347_v52, %v346_v50 }
 0x104   :  { %525 = vst [vmem:[%s708_s3 + $0x18] sm:$0xff] %v501_v53   ;;  %529 = vst [vmem:[%s708_s3 + $0x38] sm:$0xff] %v521_v54  }
 0x105   :  { %524 = vst [vmem:[%s708_s3 + $0x10] sm:$0xff] %v496_v55   ;;  %528 = vst [vmem:[%s708_s3 + $0x30] sm:$0xff] %v516_v56  }

</bundles_post_ra>
